<compile_context>
chip_gen: v7x
topology: tpu7x:2x2x1
jax: 0.10.0
libtpu: 0.0.40
codegen_flags: <defaults>
</compile_context>

<pallas_src>
import functools

import jax
import jax.numpy as jnp
from jax.experimental import pallas as pl
from jax.experimental.pallas import tpu as pltpu

OBS = 8        # observation_space
ACT = 4        # action_space
HID = 800      # n_hidden (module default)
HID_PAD = 896  # 800 padded up to a multiple of 128
OUT_PAD = 128  # lane-dense output width (padded logits driven to -inf)


def lunar_lander_kernel(x_ref, w1_ref, b1_ref, w2_ref, b2_ref, o_ref):
    # fc1: Linear(8 -> 896 padded) + Dropout + ReLU.  Everything is f32; no
    # in-kernel dtype casts (previous casts forced a VMEM spill round-trip).
    x = x_ref[...]                                    # (TB, OBS) f32
    h = jnp.dot(x, w1_ref[...], preferred_element_type=jnp.float32) + b1_ref[...]
    # TODO(synk): nn.Dropout(0.5) is stochastic only in training mode; the
    #             eval-mode forward is identity, which is what we implement.
    h = jnp.maximum(h, 0.0)                           # (TB, HID_PAD); padded cols stay 0

    # fc2: Linear(896 -> 128 padded).  Padded weight columns are exactly 0 and
    # padded bias columns are -inf, so padded logits are -inf -> exp() == 0.
    logits = jnp.dot(h, w2_ref[...], preferred_element_type=jnp.float32) + b2_ref[...]

    # softmax over the lane-dense (padded) action axis
    m = jnp.max(logits, axis=-1, keepdims=True)
    e = jnp.exp(logits - m)
    denom = jnp.sum(e, axis=-1, keepdims=True)
    inv = pl.reciprocal(denom, approx=True)           # EUP vrcp (slot otherwise idle)
    inv = inv * (2.0 - denom * inv)                   # one Newton step -> ~f32 accuracy
    o_ref[...] = e * inv


@functools.partial(jax.jit, static_argnames=("num_tiles",))
def lunar_lander_forward(x, w1p, b1p, w2p, b2p, *, num_tiles=1):
    B = x.shape[0]
    assert B % num_tiles == 0, "batch must split evenly across batch tiles"
    tb = B // num_tiles
    assert tb % 8 == 0, "batch tile must be a multiple of the 8-row sublane"

    out = pl.pallas_call(
        lunar_lander_kernel,
        out_shape=jax.ShapeDtypeStruct((B, OUT_PAD), jnp.float32),
        grid=(num_tiles,),
        in_specs=[
            pl.BlockSpec((tb, OBS), lambda i: (i, 0)),           # x: tiled over batch
            pl.BlockSpec((OBS, HID_PAD), lambda i: (0, 0)),      # w1: replicated
            pl.BlockSpec((1, HID_PAD), lambda i: (0, 0)),        # b1: replicated
            pl.BlockSpec((HID_PAD, OUT_PAD), lambda i: (0, 0)),  # w2: replicated
            pl.BlockSpec((1, OUT_PAD), lambda i: (0, 0)),        # b2: replicated
        ],
        out_specs=pl.BlockSpec((tb, OUT_PAD), lambda i: (i, 0)),
        compiler_params=pltpu.CompilerParams(
            dimension_semantics=("parallel",)),  # shards batch tiles across TCs on v7x
    )(x, w1p, b1p, w2p, b2p)

    return out[:, :ACT]


def pick_num_batch_tiles(batch):
    """v5e/v6e: one TensorCore -> single whole-batch block (grid=(1,)).
    v7x: two TensorCores -> two 'parallel' batch tiles."""
    try:
        kind = jax.devices()[0].device_kind.lower()
    except Exception:
        return 1
    tiles = 2 if ("v7" in kind or "7x" in kind) else 1
    if batch % (8 * tiles) != 0:
        return 1
    return tiles


def init_params(key):
    """PyTorch nn.Linear-style init (uniform +/- 1/sqrt(fan_in)); weights are
    stored transposed as (in_features, out_features) so the kernel does x @ W."""
    k1, k2, k3, k4 = jax.random.split(key, 4)
    lim1 = 1.0 / jnp.sqrt(jnp.float32(OBS))
    lim2 = 1.0 / jnp.sqrt(jnp.float32(HID))
    w1 = jax.random.uniform(k1, (OBS, HID), jnp.float32, -lim1, lim1)
    b1 = jax.random.uniform(k2, (HID,), jnp.float32, -lim1, lim1)
    w2 = jax.random.uniform(k3, (HID, ACT), jnp.float32, -lim2, lim2)
    b2 = jax.random.uniform(k4, (ACT,), jnp.float32, -lim2, lim2)
    return w1, b1, w2, b2


def prepare_params(w1, b1, w2, b2):
    """Kernel layout (all f32): HID padded 800->896 with zeros; action axis
    padded 4->128 with zero weight columns and -inf bias columns."""
    w1p = jnp.pad(w1, ((0, 0), (0, HID_PAD - HID))).astype(jnp.float32)
    b1p = jnp.pad(b1, (0, HID_PAD - HID)).reshape(1, HID_PAD).astype(jnp.float32)
    w2p = jnp.pad(w2, ((0, HID_PAD - HID), (0, OUT_PAD - ACT))).astype(jnp.float32)
    b2p = jnp.pad(b2, (0, OUT_PAD - ACT), constant_values=-jnp.inf)
    b2p = b2p.reshape(1, OUT_PAD).astype(jnp.float32)
    return w1p, b1p, w2p, b2p


def reference_forward(x, w1, b1, w2, b2):
    """Pure-JAX f32 reference on the original (unpadded) parameters."""
    hp = jax.lax.Precision.HIGHEST
    h = jnp.maximum(jnp.dot(x, w1, precision=hp) + b1, 0.0)
    return jax.nn.softmax(jnp.dot(h, w2, precision=hp) + b2, axis=1)


if __name__ == "__main__":
    key = jax.random.PRNGKey(0)
    kx, kp = jax.random.split(key)

    # Batch of environment states; divides evenly into 1 or 2 tiles.
    B = 256
    x = jax.random.normal(kx, (B, OBS), jnp.float32)
    w1, b1, w2, b2 = init_params(kp)
    w1p, b1p, w2p, b2p = prepare_params(w1, b1, w2, b2)

    num_tiles = pick_num_batch_tiles(B)

    out = lunar_lander_forward(x, w1p, b1p, w2p, b2p, num_tiles=num_tiles)
    out = jax.block_until_ready(out)

    ref = reference_forward(x, w1, b1, w2, b2)
    assert out.shape == (B, ACT)
    assert bool(jnp.all(jnp.isfinite(out)))
    assert jnp.allclose(jnp.sum(out, axis=1), 1.0, atol=1e-5)
    assert jnp.allclose(out, ref, atol=1e-4, rtol=1e-4)

    print("KERNEL_OK")
</pallas_src>

<mosaic_0001>
module attributes {stable_mosaic.version = 11 : i64} {
  func.func @lunar_lander_kernel(%arg0: i32, %arg1: memref<256x8xf32, #tpu.memory_space<vmem>>, %arg2: memref<8x896xf32, #tpu.memory_space<vmem>>, %arg3: memref<1x896xf32, #tpu.memory_space<vmem>>, %arg4: memref<896x128xf32, #tpu.memory_space<vmem>>, %arg5: memref<1x128xf32, #tpu.memory_space<vmem>>, %arg6: memref<256x128xf32, #tpu.memory_space<vmem>>) attributes {dimension_semantics = [#tpu.dimension_semantics<parallel>], iteration_bounds = array<i64: 1>, scalar_prefetch = 0 : i64, scratch_operands = 0 : i64, tpu.core_type = #tpu.core_type<tc>, window_params = [{transform_indices = @transform_0, window_bounds = array<i64: 256, 8>}, {pipeline_mode = #tpu.pipeline_mode<synchronous>, transform_indices = @transform_1, window_bounds = array<i64: 8, 896>}, {pipeline_mode = #tpu.pipeline_mode<synchronous>, transform_indices = @transform_2, window_bounds = array<i64: 1, 896>}, {pipeline_mode = #tpu.pipeline_mode<synchronous>, transform_indices = @transform_3, window_bounds = array<i64: 896, 128>}, {pipeline_mode = #tpu.pipeline_mode<synchronous>, transform_indices = @transform_4, window_bounds = array<i64: 1, 128>}, {transform_indices = @transform_5, window_bounds = array<i64: 256, 128>}]} {
    %c0 = arith.constant 0 : index
    %c0_0 = arith.constant 0 : index
    %0 = vector.load %arg1[%c0, %c0_0] : memref<256x8xf32, #tpu.memory_space<vmem>>, vector<256x8xf32>
    %c0_1 = arith.constant 0 : index
    %c0_2 = arith.constant 0 : index
    %1 = vector.load %arg2[%c0_1, %c0_2] : memref<8x896xf32, #tpu.memory_space<vmem>>, vector<8x896xf32>
    %cst = arith.constant dense<0.000000e+00> : vector<256x896xf32>
    %2 = tpu.matmul %0, %1, %cst {dimension_numbers = #tpu.dot_dimension_numbers<[1], [0], [0], [1], [0, 0, 1, 1], [], []>} : vector<256x8xf32>, vector<8x896xf32>, vector<256x896xf32> -> vector<256x896xf32>
    %c0_3 = arith.constant 0 : index
    %c0_4 = arith.constant 0 : index
    %3 = vector.load %arg3[%c0_3, %c0_4] : memref<1x896xf32, #tpu.memory_space<vmem>>, vector<1x896xf32>
    %4 = vector.broadcast %3 : vector<1x896xf32> to vector<256x896xf32>
    %5 = arith.addf %2, %4 : vector<256x896xf32>
    %cst_5 = arith.constant 0.000000e+00 : f32
    %6 = vector.broadcast %cst_5 : f32 to vector<256x896xf32>
    %7 = arith.maximumf %5, %6 : vector<256x896xf32>
    %c0_6 = arith.constant 0 : index
    %c0_7 = arith.constant 0 : index
    %8 = vector.load %arg4[%c0_6, %c0_7] : memref<896x128xf32, #tpu.memory_space<vmem>>, vector<896x128xf32>
    %cst_8 = arith.constant dense<0.000000e+00> : vector<256x128xf32>
    %9 = tpu.matmul %7, %8, %cst_8 {dimension_numbers = #tpu.dot_dimension_numbers<[1], [0], [0], [1], [0, 0, 1, 1], [], []>} : vector<256x896xf32>, vector<896x128xf32>, vector<256x128xf32> -> vector<256x128xf32>
    %c0_9 = arith.constant 0 : index
    %c0_10 = arith.constant 0 : index
    %10 = vector.load %arg5[%c0_9, %c0_10] : memref<1x128xf32, #tpu.memory_space<vmem>>, vector<1x128xf32>
    %11 = vector.broadcast %10 : vector<1x128xf32> to vector<256x128xf32>
    %12 = arith.addf %9, %11 : vector<256x128xf32>
    %cst_11 = arith.constant dense<0xFF800000> : vector<256xf32>
    %13 = vector.multi_reduction <maximumf>, %12, %cst_11 [1] : vector<256x128xf32> to vector<256xf32>
    %14 = vector.shape_cast %13 : vector<256xf32> to vector<256x1xf32>
    %15 = vector.broadcast %14 : vector<256x1xf32> to vector<256x128xf32>
    %16 = arith.subf %12, %15 : vector<256x128xf32>
    %17 = math.exp %16 : vector<256x128xf32>
    %cst_12 = arith.constant dense<0.000000e+00> : vector<256xf32>
    %18 = vector.multi_reduction <add>, %17, %cst_12 [1] : vector<256x128xf32> to vector<256xf32>
    %19 = vector.shape_cast %18 : vector<256xf32> to vector<256x1xf32>
    %20 = tpu.reciprocal %19 {approx = true} : vector<256x1xf32> -> vector<256x1xf32>
    %21 = arith.mulf %19, %20 : vector<256x1xf32>
    %cst_13 = arith.constant 2.000000e+00 : f32
    %22 = vector.broadcast %cst_13 : f32 to vector<256x1xf32>
    %23 = arith.subf %22, %21 : vector<256x1xf32>
    %24 = arith.mulf %20, %23 : vector<256x1xf32>
    %25 = vector.broadcast %24 : vector<256x1xf32> to vector<256x128xf32>
    %26 = arith.mulf %17, %25 : vector<256x128xf32>
    %c0_14 = arith.constant 0 : index
    %c0_15 = arith.constant 0 : index
    %27 = vector.load %arg6[%c0_14, %c0_15] : memref<256x128xf32, #tpu.memory_space<vmem>>, vector<256x128xf32>
    tpu.vector_store %arg6[%c0_14, %c0_15], %26 {strides = array<i32>} : memref<256x128xf32, #tpu.memory_space<vmem>>, vector<256x128xf32>,
    return
  }
  func.func @transform_0(%arg0: i32) -> (i32, i32) {
    %c0_i32 = arith.constant 0 : i32
    %c0_i32_0 = arith.constant 0 : i32
    return %arg0, %c0_i32 : i32, i32
  }
  func.func @transform_1(%arg0: i32) -> (i32, i32) {
    %c0_i32 = arith.constant 0 : i32
    %c0_i32_0 = arith.constant 0 : i32
    %c0_i32_1 = arith.constant 0 : i32
    return %c0_i32, %c0_i32_0 : i32, i32
  }
  func.func @transform_2(%arg0: i32) -> (i32, i32) {
    %c0_i32 = arith.constant 0 : i32
    %c0_i32_0 = arith.constant 0 : i32
    %c0_i32_1 = arith.constant 0 : i32
    return %c0_i32, %c0_i32_0 : i32, i32
  }
  func.func @transform_3(%arg0: i32) -> (i32, i32) {
    %c0_i32 = arith.constant 0 : i32
    %c0_i32_0 = arith.constant 0 : i32
    %c0_i32_1 = arith.constant 0 : i32
    return %c0_i32, %c0_i32_0 : i32, i32
  }
  func.func @transform_4(%arg0: i32) -> (i32, i32) {
    %c0_i32 = arith.constant 0 : i32
    %c0_i32_0 = arith.constant 0 : i32
    %c0_i32_1 = arith.constant 0 : i32
    return %c0_i32, %c0_i32_0 : i32, i32
  }
  func.func @transform_5(%arg0: i32) -> (i32, i32) {
    %c0_i32 = arith.constant 0 : i32
    %c0_i32_0 = arith.constant 0 : i32
    return %arg0, %c0_i32 : i32, i32
  }
}

</mosaic_0001>

<bundles_post_ra>
// kernel: lunar_lander_forward.1
= control target key start
LH: loop header
LB: loop body
LE: loop exit
PB: predicated region body
PF: predicated region fallthrough
CT: control target
= control target key end

     0   :  { %10 = vsyncpa [#allocation3], 0  ;;  %s3729_s18 = smov [#allocation2]   ;;  %s5237_s0 = inlined_call_operand.vmem [shape: f32[256,8], index: 0, kind: input, shape index: {}]   ;;  %s5238_s1 = inlined_call_operand.vmem [shape: f32[8,896], index: 1, kind: input, shape index: {}]   ;;  %s5239_s2 = inlined_call_operand.vmem [shape: f32[1,896], index: 2, kind: input, shape index: {}]   ;;  %s5240_s3 = inlined_call_operand.hbm [shape: f32[896,128], index: 3, kind: input, shape index: {}]   ;;  %s5241_s4 = inlined_call_operand.vmem [shape: f32[1,128], index: 4, kind: input, shape index: {}]   ;;  %s5242_s5 = inlined_call_operand.vmem [shape: f32[256,128], index: 5, kind: output, shape index: {}]  }
   0x1   :  { %s22_s19 = sshll.u32 %s3729_s18, 4  ;;  %s3705_s22 = scalar_lea.hbm %s5240_s3, 14336  ;;  %s23_s19 = int_to_ptr.vmem [resolvable:$true] %s22_s19 }
   0x2   :  { %p3706_p0 = scmp.ne.s32.totalorder %s5240_s3, %s3705_s22  ;;  %p3709_p1 = scmp.lt.u32.totalorder %s3705_s22, %s5240_s3 }
   0x4   :  { %p3711_p2 = pnand %p3709_p1, %p3706_p0 }
   0x6   :  { %3714 = shalt.err (!%p3711_p2)
}
   0x7   :  { %s3715_s27 = scalar_lea.vmem %s23_s19, 14336  ;;  %p3720_p4 = scmp.lt.s32.totalorder %s23_s19, %s23_s19 }
   0x8   :  { %p3716_p3 = scmp.ne.s32.totalorder %s23_s19, %s3715_s27  ;;  %p3721_p5 = scmp.lt.s32.totalorder %s3715_s27, %s3715_s27 }
   0xa   :  { %p3722_p6 = por %p3721_p5, %p3720_p4 }
   0xc   :  { %p3723_p7 = pnand %p3722_p6, %p3716_p3 }
   0xe   :  { %3726 = shalt.err (!%p3723_p7)
}
   0xf   :  { %s3730_s28 = smov 128   ;;  %s3731_s29 = smov 8  }
  0x10   :  { %28 = dma.hbm_to_vmem [thread:$0]  %s5240_s3, 14336, %s23_s19, [#allocation3], %s3730_s28, %s3730_s28, %s3731_s29  }
  0x11   :  { %3727 = dma.done.wait [#allocation3], 14336  }
  0x12   :  { %3728 = vsyncadd [#allocation3], 4294952960  ;;  %v3732_v0 = vmov 0.0   ;;  %v67_v1 = vld [vmem:[%s5238_s1 + $0x8] sm:$0xff]  ;;  %v66_v2 = vld [vmem:[%s5238_s1] sm:$0xff]  ;;  %vm110_vm0 = vcmask 64512  }
  0x13   :  { %271 = vmatprep.mubr.f32.mxu0 %v3732_v0  ;;  %v3786_v3 = vld [vmem:[%s5237_s0] sm:$0xff]  ;;  %207 = vmatprep.subr.mxu0 %v67_v1  ;;  %v69_v4 = vld [vmem:[%s5238_s1 + $0x18] sm:$0xff]  ;;  %v68_v5 = vld [vmem:[%s5238_s1 + $0x10] sm:$0xff]  ;;  %v3733_v18 = vmov 0.0|0.0  }
  0x14   :  { %3079 = vmatprep.mubr.msk.f32.mxu1 %vm110_vm0, %v3786_v3  ;;  %208 = vmatpush1.msra.mxu0 %v66_v2  ;;  %v3802_v6 = vld [vmem:[%s5237_s0 + $0x8] sm:$0xff]  ;;  %v3810_v7 = vld [vmem:[%s5237_s0 + $0x10] sm:$0xff]  ;;  %v3818_v8 = vld [vmem:[%s5237_s0 + $0x18] sm:$0xff] }
  0x15   :  { %2867 = vmatmul.mubr.msk.f32.vlgmr.msra.gmra.mrb[0].mxu0 %vm110_vm0, %v3786_v3  ;;  %464 = vmatprep.subr.mxu0 %v69_v4  ;;  %v71_v9 = vld [vmem:[%s5238_s1 + $0x28] sm:$0xff]  ;;  %v3829_v10 = vld [vmem:[%s5237_s0 + $0x20] sm:$0xff]  ;;  %v3845_v12 = vld [vmem:[%s5237_s0 + $0x30] sm:$0xff] }
  0x16   :  { %465 = vmatpush1.msra.mxu0 %v68_v5  ;;  %277 = vmatprep.mubr.f32.mxu0 %v3732_v0  ;;  %v3837_v11 = vld [vmem:[%s5237_s0 + $0x28] sm:$0xff]  ;;  %v72_v13 = vld [vmem:[%s5238_s1 + $0x30] sm:$0xff]  ;;  %v1427_v14 = vld [vmem:[#allocation2] sm:$0xff] }
  0x17   :  { %721 = vmatprep.subr.mxu0 %v71_v9  ;;  %3077 = vmatprep.subr.mxu1 %v72_v13  ;;  %v1428_v15 = vld [vmem:[#allocation2 + $0x8] sm:$0xff]  ;;  %v3856_v16 = vld [vmem:[%s5237_s0 + $0x38] sm:$0xff]  ;;  %v1429_v19 = vld [vmem:[#allocation2 + $0x10] sm:$0xff] }
  0x18   :  { %3078 = vmatpush3.msra.mxu1 %v72_v13  ;;  %v3208_v17 = vpack.c.bf16 %v1428_v15, %v1427_v14  ;;  %v1430_v20 = vld [vmem:[#allocation2 + $0x18] sm:$0xff]  ;;  %v3870_v21 = vld [vmem:[%s5237_s0 + $0x40] sm:$0xff]  ;;  %v1432_v24 = vld [vmem:[#allocation2 + $0x28] sm:$0xff] }
  0x19   :  { %2868 = vmatmul.mubr.msk.f32.gmra.mrb[2].mxu0 %vm110_vm0, %v3802_v6  ;;  %3080 = vmatmul.mubr.msk.f32.vlgmr.msra.gmra.mrb[0].mxu1 %vm110_vm0, %v3802_v6  ;;  %v3211_v22 = vpack.c.bf16 %v1430_v20, %v1429_v19  ;;  %v1431_v23 = vld [vmem:[#allocation2 + $0x20] sm:$0xff]  ;;  %v3883_v25 = vld [vmem:[%s5237_s0 + $0x48] sm:$0xff]  ;;  %v1433_v27 = vld [vmem:[#allocation2 + $0x30] sm:$0xff] }
  0x1a   :  { %283 = vmatprep.mubr.f32.mxu0 %v3732_v0  ;;  %3207 = vmatprep.subr.bf16.mxu1 %v3733_v18  ;;  %v3214_v26 = vpack.c.bf16 %v1432_v24, %v1431_v23  ;;  %v1434_v28 = vld [vmem:[#allocation2 + $0x38] sm:$0xff]  ;;  %v3896_v29 = vld [vmem:[%s5237_s0 + $0x50] sm:$0xff]  ;;  %v1435_v31 = vld [vmem:[#allocation2 + $0x40] sm:$0xff] }
  0x1b   :  { %3082 = vmatprep.mubr.msk.f32.mxu1 %vm110_vm0, %v3810_v7  ;;  %3209 = vmatpush1.bf16.msra.mxu1 %v3208_v17  ;;  %v3217_v30 = vpack.c.bf16 %v1434_v28, %v1433_v27  ;;  %v1436_v32 = vld [vmem:[#allocation2 + $0x48] sm:$0xff]  ;;  %v3909_v33 = vld [vmem:[%s5237_s0 + $0x58] sm:$0xff]  ;;  %v1437_v35 = vld [vmem:[#allocation2 + $0x50] sm:$0xff] }
  0x1c   :  { %3210 = vmatprep.subr.bf16.mxu1 %v3733_v18  ;;  %v3220_v34 = vpack.c.bf16 %v1436_v32, %v1435_v31  ;;  %v1438_v36 = vld [vmem:[#allocation2 + $0x58] sm:$0xff]  ;;  %v3922_v37 = vld [vmem:[%s5237_s0 + $0x60] sm:$0xff]  ;;  %v3933_v39 = vld [vmem:[%s5237_s0 + $0x68] sm:$0xff] }
  0x1d   :  { %2869 = vmatmul.mubr.msk.f32.gmra.mrb[4].mxu0 %vm110_vm0, %v3810_v7  ;;  %3083 = vmatmul.mubr.msk.f32.gmra.mrb[2].mxu1 %vm110_vm0, %v3818_v8  ;;  %v3223_v38 = vpack.c.bf16 %v1438_v36, %v1437_v35  ;;  %v1439_v40 = vld [vmem:[#allocation2 + $0x60] sm:$0xff]  ;;  %v1440_v41 = vld [vmem:[#allocation2 + $0x68] sm:$0xff]  ;;  %v3940_v42 = vld [vmem:[%s5237_s0 + $0x70] sm:$0xff] }
  0x1e   :  { %289 = vmatprep.mubr.f32.mxu0 %v3732_v0  ;;  %3085 = vmatprep.mubr.msk.f32.mxu1 %vm110_vm0, %v3829_v10  ;;  %v3226_v43 = vpack.c.bf16 %v1440_v41, %v1439_v40  ;;  %v3951_v44 = vld [vmem:[%s5237_s0 + $0x78] sm:$0xff]  ;;  %v1441_v45 = vld [vmem:[#allocation2 + $0x70] sm:$0xff]  ;;  %v3958_v47 = vld [vmem:[%s5237_s0 + $0x80] sm:$0xff] }
  0x1f   :  { %3212 = vmatpush1.bf16.msra.mxu1 %v3211_v22  ;;  %v1442_v46 = vld [vmem:[#allocation2 + $0x78] sm:$0xff]  ;;  %v3969_v49 = vld [vmem:[%s5237_s0 + $0x88] sm:$0xff]  ;;  %v1443_v50 = vld [vmem:[#allocation2 + $0x80] sm:$0xff] }
  0x20   :  { %3213 = vmatprep.subr.bf16.mxu1 %v3733_v18  ;;  %v3229_v48 = vpack.c.bf16 %v1442_v46, %v1441_v45  ;;  %v1444_v51 = vld [vmem:[#allocation2 + $0x88] sm:$0xff]  ;;  %v3976_v52 = vld [vmem:[%s5237_s0 + $0x90] sm:$0xff]  ;;  %v3987_v54 = vld [vmem:[%s5237_s0 + $0x98] sm:$0xff] }
  0x21   :  { %2870 = vmatmul.mubr.msk.f32.gmra.mrb[6].mxu0 %vm110_vm0, %v3818_v8  ;;  %3086 = vmatmul.mubr.msk.f32.gmra.mrb[4].mxu1 %vm110_vm0, %v3837_v11  ;;  %v3232_v53 = vpack.c.bf16 %v1444_v51, %v1443_v50  ;;  %v1445_v55 = vld [vmem:[#allocation2 + $0x90] sm:$0xff]  ;;  %v1446_v56 = vld [vmem:[#allocation2 + $0x98] sm:$0xff]  ;;  %v3994_v57 = vld [vmem:[%s5237_s0 + $0xa0] sm:$0xff] }
  0x22   :  { %295 = vmatprep.mubr.f32.mxu0 %v3732_v0  ;;  %3088 = vmatprep.mubr.msk.f32.mxu1 %vm110_vm0, %v3845_v12  ;;  %v3235_v58 = vpack.c.bf16 %v1446_v56, %v1445_v55  ;;  %v4005_v59 = vld [vmem:[%s5237_s0 + $0xa8] sm:$0xff]  ;;  %v1447_v60 = vld [vmem:[#allocation2 + $0xa0] sm:$0xff]  ;;  %v4012_v62 = vld [vmem:[%s5237_s0 + $0xb0] sm:$0xff] }
  0x23   :  { %3215 = vmatpush1.bf16.msra.mxu1 %v3214_v26  ;;  %v1448_v61 = vld [vmem:[#allocation2 + $0xa8] sm:$0xff]  ;;  %v4023_v1 = vld [vmem:[%s5237_s0 + $0xb8] sm:$0xff]  ;;  %v1449_v2 = vld [vmem:[#allocation2 + $0xb0] sm:$0xff] }
  0x24   :  { %3216 = vmatprep.subr.bf16.mxu1 %v3733_v18  ;;  %v3238_v63 = vpack.c.bf16 %v1448_v61, %v1447_v60  ;;  %v1450_v4 = vld [vmem:[#allocation2 + $0xb8] sm:$0xff]  ;;  %v4030_v5 = vld [vmem:[%s5237_s0 + $0xc0] sm:$0xff]  ;;  %v4041_v13 = vld [vmem:[%s5237_s0 + $0xc8] sm:$0xff] }
  0x25   :  { %2871 = vmatmul.mubr.msk.f32.gmra.mrb[8].mxu0 %vm110_vm0, %v3829_v10  ;;  %3089 = vmatmul.mubr.msk.f32.gmra.mrb[6].mxu1 %vm110_vm0, %v3856_v16  ;;  %v3241_v9 = vpack.c.bf16 %v1450_v4, %v1449_v2  ;;  %v1451_v14 = vld [vmem:[#allocation2 + $0xc0] sm:$0xff]  ;;  %v1452_v15 = vld [vmem:[#allocation2 + $0xc8] sm:$0xff]  ;;  %v4048_v17 = vld [vmem:[%s5237_s0 + $0xd0] sm:$0xff] }
  0x26   :  { %301 = vmatprep.mubr.f32.mxu0 %v3732_v0  ;;  %3091 = vmatprep.mubr.msk.f32.mxu1 %vm110_vm0, %v3870_v21  ;;  %v3244_v19 = vpack.c.bf16 %v1452_v15, %v1451_v14  ;;  %v4059_v20 = vld [vmem:[%s5237_s0 + $0xd8] sm:$0xff]  ;;  %v1453_v22 = vld [vmem:[#allocation2 + $0xd0] sm:$0xff]  ;;  %v4066_v24 = vld [vmem:[%s5237_s0 + $0xe0] sm:$0xff] }
  0x27   :  { %3218 = vmatpush1.bf16.msra.mxu1 %v3217_v30  ;;  %v1454_v23 = vld [vmem:[#allocation2 + $0xd8] sm:$0xff]  ;;  %v4077_v27 = vld [vmem:[%s5237_s0 + $0xe8] sm:$0xff]  ;;  %v1455_v28 = vld [vmem:[#allocation2 + $0xe0] sm:$0xff] }
  0x28   :  { %3219 = vmatprep.subr.bf16.mxu1 %v3733_v18  ;;  %v3247_v26 = vpack.c.bf16 %v1454_v23, %v1453_v22  ;;  %v1456_v30 = vld [vmem:[#allocation2 + $0xe8] sm:$0xff]  ;;  %v4084_v31 = vld [vmem:[%s5237_s0 + $0xf0] sm:$0xff]  ;;  %v1458_v36 = vld [vmem:[#allocation2 + $0xf8] sm:$0xff] }
  0x29   :  { %2872 = vmatmul.mubr.msk.f32.gmra.mrb[10].mxu0 %vm110_vm0, %v3837_v11  ;;  %3092 = vmatmul.mubr.msk.f32.gmra.mrb[8].mxu1 %vm110_vm0, %v3883_v25  ;;  %v3250_v32 = vpack.c.bf16 %v1456_v30, %v1455_v28  ;;  %v1457_v35 = vld [vmem:[#allocation2 + $0xf0] sm:$0xff]  ;;  %v70_v40 = vld [vmem:[%s5238_s1 + $0x20] sm:$0xff]  ;;  %v1462_v51 = vld [vmem:[#allocation2 + $0x118] sm:$0xff] }
  0x2a   :  { %307 = vmatprep.mubr.f32.mxu0 %v3732_v0  ;;  %3094 = vmatprep.mubr.msk.f32.mxu1 %vm110_vm0, %v3896_v29  ;;  %v1459_v41 = vld [vmem:[#allocation2 + $0x100] sm:$0xff]  ;;  %v1461_v50 = vld [vmem:[#allocation2 + $0x110] sm:$0xff]  ;;  %v1464_v60 = vld [vmem:[#allocation2 + $0x128] sm:$0xff] }
  0x2b   :  { %3221 = vmatpush1.bf16.msra.mxu1 %v3220_v34  ;;  %v4095_v34 = vld [vmem:[%s5237_s0 + $0xf8] sm:$0xff]  ;;  %v3259_v55 = vpack.c.bf16 %v1462_v51, %v1461_v50  ;;  %v1465_v22 = vld [vmem:[#allocation2 + $0x130] sm:$0xff]  ;;  %v1472_v50 = vld [vmem:[#allocation2 + $0x168] sm:$0xff] }
  0x2c   :  { %3222 = vmatprep.subr.bf16.mxu1 %v3733_v18  ;;  %v1466_v23 = vld [vmem:[#allocation2 + $0x138] sm:$0xff] }
  0x2d   :  { %2873 = vmatmul.mubr.msk.f32.gmra.mrb[12].mxu0 %vm110_vm0, %v3845_v12  ;;  %3095 = vmatmul.mubr.msk.f32.gmra.mrb[10].mxu1 %vm110_vm0, %v3909_v33 }
  0x2e   :  { %313 = vmatprep.mubr.f32.mxu0 %v3732_v0  ;;  %3097 = vmatprep.mubr.msk.f32.mxu1 %vm110_vm0, %v3922_v37 }
  0x2f   :  { %3224 = vmatpush1.bf16.msra.mxu1 %v3223_v38  ;;  %v3253_v38 = vpack.c.bf16 %v1458_v36, %v1457_v35 }
  0x30   :  { %3225 = vmatprep.subr.bf16.mxu1 %v3733_v18 }
  0x31   :  { %2874 = vmatmul.mubr.msk.f32.gmra.mrb[14].mxu0 %vm110_vm0, %v3856_v16  ;;  %3098 = vmatmul.mubr.msk.f32.gmra.mrb[12].mxu1 %vm110_vm0, %v3933_v39 }
  0x32   :  { %319 = vmatprep.mubr.f32.mxu0 %v3732_v0  ;;  %3100 = vmatprep.mubr.msk.f32.mxu1 %vm110_vm0, %v3940_v42 }
  0x33   :  { %3227 = vmatpush1.bf16.msra.mxu1 %v3226_v43 }
  0x34   :  { %3228 = vmatprep.subr.bf16.mxu1 %v3733_v18 }
  0x35   :  { %2875 = vmatmul.mubr.msk.f32.gmra.mrb[16].mxu0 %vm110_vm0, %v3870_v21  ;;  %3101 = vmatmul.mubr.msk.f32.gmra.mrb[14].mxu1 %vm110_vm0, %v3951_v44 }
  0x36   :  { %325 = vmatprep.mubr.f32.mxu0 %v3732_v0  ;;  %3103 = vmatprep.mubr.msk.f32.mxu1 %vm110_vm0, %v3958_v47 }
  0x37   :  { %3230 = vmatpush1.bf16.msra.mxu1 %v3229_v48 }
  0x38   :  { %3231 = vmatprep.subr.bf16.mxu1 %v3733_v18 }
  0x39   :  { %2876 = vmatmul.mubr.msk.f32.gmra.mrb[18].mxu0 %vm110_vm0, %v3883_v25  ;;  %3104 = vmatmul.mubr.msk.f32.gmra.mrb[16].mxu1 %vm110_vm0, %v3969_v49 }
  0x3a   :  { %331 = vmatprep.mubr.f32.mxu0 %v3732_v0  ;;  %3106 = vmatprep.mubr.msk.f32.mxu1 %vm110_vm0, %v3976_v52 }
  0x3b   :  { %3233 = vmatpush1.bf16.msra.mxu1 %v3232_v53 }
  0x3c   :  { %3234 = vmatprep.subr.bf16.mxu1 %v3733_v18 }
  0x3d   :  { %2877 = vmatmul.mubr.msk.f32.gmra.mrb[20].mxu0 %vm110_vm0, %v3896_v29  ;;  %3107 = vmatmul.mubr.msk.f32.gmra.mrb[18].mxu1 %vm110_vm0, %v3987_v54 }
  0x3e   :  { %337 = vmatprep.mubr.f32.mxu0 %v3732_v0  ;;  %3109 = vmatprep.mubr.msk.f32.mxu1 %vm110_vm0, %v3994_v57 }
  0x3f   :  { %3236 = vmatpush1.bf16.msra.mxu1 %v3235_v58 }
  0x40   :  { %3237 = vmatprep.subr.bf16.mxu1 %v3733_v18 }
  0x41   :  { %2878 = vmatmul.mubr.msk.f32.gmra.mrb[22].mxu0 %vm110_vm0, %v3909_v33  ;;  %3110 = vmatmul.mubr.msk.f32.gmra.mrb[20].mxu1 %vm110_vm0, %v4005_v59 }
  0x42   :  { %343 = vmatprep.mubr.f32.mxu0 %v3732_v0  ;;  %3112 = vmatprep.mubr.msk.f32.mxu1 %vm110_vm0, %v4012_v62 }
  0x43   :  { %3239 = vmatpush1.bf16.msra.mxu1 %v3238_v63  ;;  %v1524_v63 = vld [vmem:[#allocation2 + $0x308] sm:$0xff] }
  0x44   :  { %3240 = vmatprep.subr.bf16.mxu1 %v3733_v18 }
  0x45   :  { %2879 = vmatmul.mubr.msk.f32.gmra.mrb[24].mxu0 %vm110_vm0, %v3922_v37  ;;  %3113 = vmatmul.mubr.msk.f32.gmra.mrb[22].mxu1 %vm110_vm0, %v4023_v1 }
  0x46   :  { %349 = vmatprep.mubr.f32.mxu0 %v3732_v0  ;;  %3115 = vmatprep.mubr.msk.f32.mxu1 %vm110_vm0, %v4030_v5 }
  0x47   :  { %3242 = vmatpush1.bf16.msra.mxu1 %v3241_v9 }
  0x48   :  { %3243 = vmatprep.subr.bf16.mxu1 %v3733_v18 }
  0x49   :  { %2880 = vmatmul.mubr.msk.f32.gmra.mrb[26].mxu0 %vm110_vm0, %v3933_v39  ;;  %3116 = vmatmul.mubr.msk.f32.gmra.mrb[24].mxu1 %vm110_vm0, %v4041_v13 }
  0x4a   :  { %355 = vmatprep.mubr.f32.mxu0 %v3732_v0  ;;  %3118 = vmatprep.mubr.msk.f32.mxu1 %vm110_vm0, %v4048_v17 }
  0x4b   :  { %3245 = vmatpush1.bf16.msra.mxu1 %v3244_v19 }
  0x4c   :  { %3246 = vmatprep.subr.bf16.mxu1 %v3733_v18 }
  0x4d   :  { %2881 = vmatmul.mubr.msk.f32.gmra.mrb[28].mxu0 %vm110_vm0, %v3940_v42  ;;  %3119 = vmatmul.mubr.msk.f32.gmra.mrb[26].mxu1 %vm110_vm0, %v4059_v20 }
  0x4e   :  { %361 = vmatprep.mubr.f32.mxu0 %v3732_v0  ;;  %3121 = vmatprep.mubr.msk.f32.mxu1 %vm110_vm0, %v4066_v24 }
  0x4f   :  { %3248 = vmatpush1.bf16.msra.mxu1 %v3247_v26 }
  0x50   :  { %3249 = vmatprep.subr.bf16.mxu1 %v3733_v18 }
  0x51   :  { %2882 = vmatmul.mubr.msk.f32.gmra.mrb[30].mxu0 %vm110_vm0, %v3951_v44  ;;  %3122 = vmatmul.mubr.msk.f32.gmra.mrb[28].mxu1 %vm110_vm0, %v4077_v27 }
  0x52   :  { %367 = vmatprep.mubr.f32.mxu0 %v3732_v0  ;;  %3124 = vmatprep.mubr.msk.f32.mxu1 %vm110_vm0, %v4084_v31 }
  0x53   :  { %3251 = vmatpush1.bf16.msra.mxu1 %v3250_v32  ;;  %v3265_v32 = vpack.c.bf16 %v1466_v23, %v1465_v22  ;;  %v1476_v22 = vld [vmem:[#allocation2 + $0x188] sm:$0xff] }
  0x54   :  { %3252 = vmatprep.subr.bf16.mxu1 %v3733_v18 }
  0x55   :  { %2883 = vmatmul.mubr.msk.f32.gmra.mrb[32].mxu0 %vm110_vm0, %v3958_v47  ;;  %3125 = vmatmul.mubr.msk.f32.gmra.mrb[30].mxu1 %vm110_vm0, %v4095_v34 }
  0x56   :  { %373 = vmatprep.mubr.f32.mxu0 %v3732_v0 }
  0x57   :  { %3254 = vmatpush1.bf16.msra.mxu1 %v3253_v38  ;;  %v1467_v38 = vld [vmem:[#allocation2 + $0x140] sm:$0xff] }
  0x58   :  { %3255 = vmatprep.subr.bf16.mxu1 %v3733_v18 }
  0x59   :  { %2884 = vmatmul.mubr.msk.f32.gmra.mrb[34].mxu0 %vm110_vm0, %v3969_v49 }
  0x5a   :  { %379 = vmatprep.mubr.f32.mxu0 %v3732_v0 }
  0x5d   :  { %2885 = vmatmul.mubr.msk.f32.gmra.mrb[36].mxu0 %vm110_vm0, %v3976_v52 }
  0x5e   :  { %385 = vmatprep.mubr.f32.mxu0 %v3732_v0 }
  0x61   :  { %2886 = vmatmul.mubr.msk.f32.gmra.mrb[38].mxu0 %vm110_vm0, %v3987_v54 }
  0x62   :  { %391 = vmatprep.mubr.f32.mxu0 %v3732_v0 }
  0x65   :  { %2887 = vmatmul.mubr.msk.f32.gmra.mrb[40].mxu0 %vm110_vm0, %v3994_v57 }
  0x66   :  { %397 = vmatprep.mubr.f32.mxu0 %v3732_v0 }
  0x69   :  { %2888 = vmatmul.mubr.msk.f32.gmra.mrb[42].mxu0 %vm110_vm0, %v4005_v59 }
  0x6a   :  { %403 = vmatprep.mubr.f32.mxu0 %v3732_v0 }
  0x6d   :  { %2889 = vmatmul.mubr.msk.f32.gmra.mrb[44].mxu0 %vm110_vm0, %v4012_v62 }
  0x6e   :  { %409 = vmatprep.mubr.f32.mxu0 %v3732_v0 }
  0x71   :  { %2890 = vmatmul.mubr.msk.f32.gmra.mrb[46].mxu0 %vm110_vm0, %v4023_v1 }
  0x72   :  { %415 = vmatprep.mubr.f32.mxu0 %v3732_v0 }
  0x75   :  { %2891 = vmatmul.mubr.msk.f32.gmra.mrb[48].mxu0 %vm110_vm0, %v4030_v5 }
  0x76   :  { %421 = vmatprep.mubr.f32.mxu0 %v3732_v0 }
  0x79   :  { %2892 = vmatmul.mubr.msk.f32.gmra.mrb[50].mxu0 %vm110_vm0, %v4041_v13 }
  0x7a   :  { %427 = vmatprep.mubr.f32.mxu0 %v3732_v0 }
  0x7d   :  { %2893 = vmatmul.mubr.msk.f32.gmra.mrb[52].mxu0 %vm110_vm0, %v4048_v17 }
  0x7e   :  { %433 = vmatprep.mubr.f32.mxu0 %v3732_v0 }
  0x81   :  { %2894 = vmatmul.mubr.msk.f32.gmra.mrb[54].mxu0 %vm110_vm0, %v4059_v20 }
  0x82   :  { %439 = vmatprep.mubr.f32.mxu0 %v3732_v0 }
  0x85   :  { %2895 = vmatmul.mubr.msk.f32.gmra.mrb[56].mxu0 %vm110_vm0, %v4066_v24 }
  0x86   :  { %445 = vmatprep.mubr.f32.mxu0 %v3732_v0 }
  0x89   :  { %2896 = vmatmul.mubr.msk.f32.gmra.mrb[58].mxu0 %vm110_vm0, %v4077_v27 }
  0x8a   :  { %451 = vmatprep.mubr.f32.mxu0 %v3732_v0 }
  0x8d   :  { %2897 = vmatmul.mubr.msk.f32.gmra.mrb[60].mxu0 %vm110_vm0, %v4084_v31 }
  0x8e   :  { %457 = vmatprep.mubr.f32.mxu0 %v3732_v0 }
  0x91   :  { %2898 = vmatmul.mubr.msk.f32.gmra.mrb[62].mxu0 %vm110_vm0, %v4095_v34 }
  0x92   :  { %528 = vmatprep.mubr.f32.mxu0 %v3732_v0 }
  0x95   :  { %2899 = vmatmul.mubr.msk.f32.vlgmr.msra.gmra.mrb[64].mxu0 %vm110_vm0, %v3786_v3 }
  0x96   :  { %722 = vmatpush1.msra.mxu0 %v70_v40  ;;  %534 = vmatprep.mubr.f32.mxu0 %v3732_v0  ;;  %v1468_v40 = vld [vmem:[#allocation2 + $0x148] sm:$0xff] }
  0x99   :  { %2900 = vmatmul.mubr.msk.f32.gmra.mrb[66].mxu0 %vm110_vm0, %v3802_v6 }
  0x9a   :  { %540 = vmatprep.mubr.f32.mxu0 %v3732_v0 }
  0x9d   :  { %2901 = vmatmul.mubr.msk.f32.gmra.mrb[68].mxu0 %vm110_vm0, %v3810_v7 }
  0x9e   :  { %546 = vmatprep.mubr.f32.mxu0 %v3732_v0 }
  0xa1   :  { %2902 = vmatmul.mubr.msk.f32.gmra.mrb[70].mxu0 %vm110_vm0, %v3818_v8 }
  0xa2   :  { %552 = vmatprep.mubr.f32.mxu0 %v3732_v0 }
  0xa5   :  { %2903 = vmatmul.mubr.msk.f32.gmra.mrb[72].mxu0 %vm110_vm0, %v3829_v10  ;;  %v75_v10 = vlaneseq }
  0xa6   :  { %558 = vmatprep.mubr.f32.mxu0 %v3732_v0 }
  0xa9   :  { %2904 = vmatmul.mubr.msk.f32.gmra.mrb[74].mxu0 %vm110_vm0, %v3837_v11  ;;  %v4191_v11 = vshrl.u32 %v75_v10, 7 }
  0xaa   :  { %564 = vmatprep.mubr.f32.mxu0 %v3732_v0 }
  0xad   :  { %2905 = vmatmul.mubr.msk.f32.gmra.mrb[76].mxu0 %vm110_vm0, %v3845_v12  ;;  %v77_v12 = vsub.s32 0, %v4191_v11 }
  0xae   :  { %570 = vmatprep.mubr.f32.mxu0 %v3732_v0 }
  0xb1   :  { %2906 = vmatmul.mubr.msk.f32.gmra.mrb[78].mxu0 %vm110_vm0, %v3856_v16  ;;  %v4201_v16 = vld [vmem:[%s5239_s2] sm:$0xff] }
  0xb2   :  { %576 = vmatprep.mubr.f32.mxu0 %v3732_v0 }
  0xb5   :  { %2907 = vmatmul.mubr.msk.f32.gmra.mrb[80].mxu0 %vm110_vm0, %v3870_v21  ;;  %v81_v21 = vsub.s32 1, %v4191_v11 }
  0xb6   :  { %582 = vmatprep.mubr.f32.mxu0 %v3732_v0 }
  0xb9   :  { %2908 = vmatmul.mubr.msk.f32.gmra.mrb[82].mxu0 %vm110_vm0, %v3883_v25  ;;  %v4207_v25 = vrot.slane %v4201_v16, %v77_v12 }
  0xba   :  { %588 = vmatprep.mubr.f32.mxu0 %v3732_v0 }
  0xbd   :  { %2909 = vmatmul.mubr.msk.f32.gmra.mrb[84].mxu0 %vm110_vm0, %v3896_v29  ;;  %v4211_v29 = vrot.slane %v4201_v16, %v81_v21 }
  0xbe   :  { %594 = vmatprep.mubr.f32.mxu0 %v3732_v0 }
  0xc1   :  { %2910 = vmatmul.mubr.msk.f32.gmra.mrb[86].mxu0 %vm110_vm0, %v3909_v33 }
  0xc2   :  { %600 = vmatprep.mubr.f32.mxu0 %v3732_v0 }
  0xc5   :  { %2911 = vmatmul.mubr.msk.f32.gmra.mrb[88].mxu0 %vm110_vm0, %v3922_v37 }
  0xc6   :  { %606 = vmatprep.mubr.f32.mxu0 %v3732_v0 }
  0xc9   :  { %2912 = vmatmul.mubr.msk.f32.gmra.mrb[90].mxu0 %vm110_vm0, %v3933_v39 }
  0xca   :  { %612 = vmatprep.mubr.f32.mxu0 %v3732_v0 }
  0xcd   :  { %2913 = vmatmul.mubr.msk.f32.gmra.mrb[92].mxu0 %vm110_vm0, %v3940_v42  ;;  %v1460_v42 = vld [vmem:[#allocation2 + $0x108] sm:$0xff] }
  0xce   :  { %618 = vmatprep.mubr.f32.mxu0 %v3732_v0  ;;  %v3256_v46 = vpack.c.bf16 %v1460_v42, %v1459_v41  ;;  %v1470_v42 = vld [vmem:[#allocation2 + $0x158] sm:$0xff] }
  0xd1   :  { %2914 = vmatmul.mubr.msk.f32.gmra.mrb[94].mxu0 %vm110_vm0, %v3951_v44 }
  0xd2   :  { %624 = vmatprep.mubr.f32.mxu0 %v3732_v0 }
  0xd5   :  { %2915 = vmatmul.mubr.msk.f32.gmra.mrb[96].mxu0 %vm110_vm0, %v3958_v47 }
  0xd6   :  { %630 = vmatprep.mubr.f32.mxu0 %v3732_v0 }
  0xd9   :  { %2916 = vmatmul.mubr.msk.f32.gmra.mrb[98].mxu0 %vm110_vm0, %v3969_v49 }
  0xda   :  { %636 = vmatprep.mubr.f32.mxu0 %v3732_v0 }
  0xdd   :  { %2917 = vmatmul.mubr.msk.f32.gmra.mrb[100].mxu0 %vm110_vm0, %v3976_v52 }
  0xde   :  { %642 = vmatprep.mubr.f32.mxu0 %v3732_v0 }
  0xe1   :  { %2918 = vmatmul.mubr.msk.f32.gmra.mrb[102].mxu0 %vm110_vm0, %v3987_v54 }
  0xe2   :  { %648 = vmatprep.mubr.f32.mxu0 %v3732_v0 }
  0xe5   :  { %2919 = vmatmul.mubr.msk.f32.gmra.mrb[104].mxu0 %vm110_vm0, %v3994_v57 }
  0xe6   :  { %654 = vmatprep.mubr.f32.mxu0 %v3732_v0 }
  0xe8   :  { %v273_v33 = vpop.f32.mrb[0].mxu0 }
  0xe9   :  { %v274_v37 = vadd.f32 %v273_v33, %v4207_v25  ;;  %v275_v39 = vpop.f32.mrb[1].mxu0  ;;  %2920 = vmatmul.mubr.msk.f32.gmra.mrb[106].mxu0 %vm110_vm0, %v4005_v59  ;;  %v1463_v59 = vld [vmem:[#allocation2 + $0x120] sm:$0xff]  ;;  %v3268_v33 = vpack.c.bf16 %v1468_v40, %v1467_v38  ;;  %v1477_v38 = vld [vmem:[#allocation2 + $0x190] sm:$0xff]  ;;  %v1478_v40 = vld [vmem:[#allocation2 + $0x198] sm:$0xff] }
  0xea   :  { %v276_v43 = vadd.f32 %v275_v39, %v4211_v29  ;;  %660 = vmatprep.mubr.f32.mxu0 %v3732_v0  ;;  %v3262_v14 = vpack.c.bf16 %v1464_v60, %v1463_v59  ;;  %v1473_v59 = vld [vmem:[#allocation2 + $0x170] sm:$0xff]  ;;  %v1474_v60 = vld [vmem:[#allocation2 + $0x178] sm:$0xff] }
  0xeb   :  { %v1203_v47 = vmax.f32 %v274_v37, 0.0 }
  0xec   :  { %v1204_v44 = vmax.f32 %v276_v43, 0.0  ;;  %v279_v45 = vpop.f32.mrb[2].mxu0  ;;  %v4254_v51 = vpop.f32.mrb[0].mxu1 }
  0xed   :  { %v280_v48 = vadd.f32 %v279_v45, %v4207_v25  ;;  %v281_v49 = vpop.f32.mrb[3].mxu0  ;;  %2921 = vmatmul.mubr.msk.f32.gmra.mrb[108].mxu0 %vm110_vm0, %v4012_v62  ;;  %v1523_v62 = vld [vmem:[#allocation2 + $0x300] sm:$0xff] }
  0xee   :  { %v282_v52 = vadd.f32 %v281_v49, %v4211_v29  ;;  %1610 = vmatprep.mubr.f32.mxu1 %v1204_v44  ;;  %666 = vmatprep.mubr.f32.mxu0 %v3732_v0  ;;  %v4229_v2 = vpack.c.bf16 %v1524_v63, %v1523_v62 }
  0xef   :  { %1611 = vmatmul.mubr.f32.vlgmr.msra.gmra.mrb[32].mxu1 %v1203_v47  ;;  %v1210_v56 = vmax.f32 %v280_v48, 0.0 }
  0xf0   :  { %v1211_v53 = vmax.f32 %v282_v52, 0.0  ;;  %v285_v54 = vpop.f32.mrb[4].mxu0  ;;  %3257 = vmatpush1.bf16.msra.mxu1 %v3256_v46  ;;  %3352 = vmatprep.subr.bf16.mxu0 %v4229_v2 }
  0xf1   :  { %v286_v57 = vadd.f32 %v285_v54, %v4207_v25  ;;  %v287_v58 = vpop.f32.mrb[5].mxu0  ;;  %2922 = vmatmul.mubr.msk.f32.gmra.mrb[110].mxu0 %vm110_vm0, %v4023_v1  ;;  %3258 = vmatprep.subr.bf16.mxu1 %v3733_v18 }
  0xf2   :  { %v288_v61 = vadd.f32 %v287_v58, %v4211_v29  ;;  %1615 = vmatprep.mubr.f32.mxu1 %v1211_v53  ;;  %672 = vmatprep.mubr.f32.mxu0 %v3732_v0  ;;  %v4258_v53 = vpop.f32.mrb[1].mxu1 }
  0xf3   :  { %1616 = vmatmul.mubr.f32.gmra.mrb[34].mxu1 %v1210_v56  ;;  %v1217_v15 = vmax.f32 %v286_v57, 0.0 }
  0xf4   :  { %v1218_v4 = vmax.f32 %v288_v61, 0.0  ;;  %v291_v9 = vpop.f32.mrb[6].mxu0  ;;  %3260 = vmatpush1.bf16.msra.mxu1 %v3259_v55  ;;  %v4264_v61 = vpop.f32.mrb[2].mxu1 }
  0xf5   :  { %v292_v1 = vadd.f32 %v291_v9, %v4207_v25  ;;  %v293_v19 = vpop.f32.mrb[7].mxu0  ;;  %2923 = vmatmul.mubr.msk.f32.gmra.mrb[112].mxu0 %vm110_vm0, %v4030_v5  ;;  %3261 = vmatprep.subr.bf16.mxu1 %v3733_v18  ;;  %v4268_v63 = vpop.f32.mrb[3].mxu1 }
  0xf6   :  { %v294_v26 = vadd.f32 %v293_v19, %v4211_v29  ;;  %1620 = vmatprep.mubr.f32.mxu1 %v1218_v4  ;;  %678 = vmatprep.mubr.f32.mxu0 %v3732_v0  ;;  %v1475_v19 = vld [vmem:[#allocation2 + $0x180] sm:$0xff]  ;;  %v4274_v23 = vpop.f32.mrb[4].mxu1 }
  0xf7   :  { %1621 = vmatmul.mubr.f32.gmra.mrb[36].mxu1 %v1217_v15  ;;  %v1224_v35 = vmax.f32 %v292_v1, 0.0 }
  0xf8   :  { %v1225_v28 = vmax.f32 %v294_v26, 0.0  ;;  %v297_v30 = vpop.f32.mrb[8].mxu0  ;;  %3263 = vmatpush1.bf16.msra.mxu1 %v3262_v14  ;;  %v3277_v14 = vpack.c.bf16 %v1474_v60, %v1473_v59 }
  0xf9   :  { %v298_v36 = vadd.f32 %v297_v30, %v4207_v25  ;;  %v299_v5 = vpop.f32.mrb[9].mxu0  ;;  %2924 = vmatmul.mubr.msk.f32.gmra.mrb[114].mxu0 %vm110_vm0, %v4041_v13  ;;  %3264 = vmatprep.subr.bf16.mxu1 %v3733_v18  ;;  %v1469_v13 = vld [vmem:[#allocation2 + $0x150] sm:$0xff] }
  0xfa   :  { %v300_v10 = vadd.f32 %v299_v5, %v4211_v29  ;;  %1625 = vmatprep.mubr.f32.mxu1 %v1225_v28  ;;  %684 = vmatprep.mubr.f32.mxu0 %v3732_v0  ;;  %v3271_v46 = vpack.c.bf16 %v1470_v42, %v1469_v13  ;;  %v4278_v28 = vpop.f32.mrb[5].mxu1 }
  0xfb   :  { %1626 = vmatmul.mubr.f32.gmra.mrb[38].mxu1 %v1224_v35  ;;  %v1231_v37 = vmax.f32 %v298_v36, 0.0  ;;  %v3280_v35 = vpack.c.bf16 %v1476_v22, %v1475_v19  ;;  %v1484_v22 = vld [vmem:[#allocation2 + $0x1c8] sm:$0xff] }
  0xfc   :  { %v1232_v12 = vmax.f32 %v300_v10, 0.0  ;;  %v303_v21 = vpop.f32.mrb[10].mxu0  ;;  %3266 = vmatpush1.bf16.msra.mxu1 %v3265_v32  ;;  %v4284_v10 = vpop.f32.mrb[6].mxu1 }
  0xfd   :  { %v304_v39 = vadd.f32 %v303_v21, %v4207_v25  ;;  %v305_v41 = vpop.f32.mrb[11].mxu0  ;;  %2925 = vmatmul.mubr.msk.f32.gmra.mrb[116].mxu0 %vm110_vm0, %v4048_v17  ;;  %3267 = vmatprep.subr.bf16.mxu1 %v3733_v18  ;;  %v1471_v17 = vld [vmem:[#allocation2 + $0x160] sm:$0xff]  ;;  %v4288_v21 = vpop.f32.mrb[7].mxu1 }
  0xfe   :  { %v306_v43 = vadd.f32 %v305_v41, %v4211_v29  ;;  %1630 = vmatprep.mubr.f32.mxu1 %v1232_v12  ;;  %690 = vmatprep.mubr.f32.mxu0 %v3732_v0  ;;  %v3274_v56 = vpack.c.bf16 %v1472_v50, %v1471_v17  ;;  %v1479_v41 = vld [vmem:[#allocation2 + $0x1a0] sm:$0xff] }
  0xff   :  { %1631 = vmatmul.mubr.f32.gmra.mrb[40].mxu1 %v1231_v37  ;;  %v1238_v47 = vmax.f32 %v304_v39, 0.0  ;;  %v3283_v39 = vpack.c.bf16 %v1478_v40, %v1477_v38 }
 0x100   :  { %v1239_v44 = vmax.f32 %v306_v43, 0.0  ;;  %v309_v45 = vpop.f32.mrb[12].mxu0  ;;  %3269 = vmatpush1.bf16.msra.mxu1 %v3268_v33  ;;  %v1480_v43 = vld [vmem:[#allocation2 + $0x1a8] sm:$0xff] }
 0x101   :  { %v310_v48 = vadd.f32 %v309_v45, %v4207_v25  ;;  %v311_v49 = vpop.f32.mrb[13].mxu0  ;;  %2926 = vmatmul.mubr.msk.f32.gmra.mrb[118].mxu0 %vm110_vm0, %v4059_v20  ;;  %3270 = vmatprep.subr.bf16.mxu1 %v3733_v18  ;;  %v1526_v45 = vld [vmem:[#allocation2 + $0x318] sm:$0xff]  ;;  %v3286_v50 = vpack.c.bf16 %v1480_v43, %v1479_v41  ;;  %v1532_v41 = vld [vmem:[#allocation2 + $0x348] sm:$0xff] }
 0x102   :  { %v312_v52 = vadd.f32 %v311_v49, %v4211_v29  ;;  %1635 = vmatprep.mubr.f32.mxu1 %v1239_v44  ;;  %696 = vmatprep.mubr.f32.mxu0 %v3732_v0  ;;  %v1525_v44 = vld [vmem:[#allocation2 + $0x310] sm:$0xff] }
 0x103   :  { %1636 = vmatmul.mubr.f32.gmra.mrb[42].mxu1 %v1238_v47  ;;  %v1245_v57 = vmax.f32 %v310_v48, 0.0 }
 0x104   :  { %v1246_v54 = vmax.f32 %v312_v52, 0.0  ;;  %v315_v55 = vpop.f32.mrb[14].mxu0  ;;  %3272 = vmatpush1.bf16.msra.mxu1 %v3271_v46  ;;  %v4294_v46 = vpop.f32.mrb[8].mxu1  ;;  %v3355_v52 = vpack.c.bf16 %v1526_v45, %v1525_v44  ;;  %v1487_v45 = vld [vmem:[#allocation2 + $0x1e0] sm:$0xff] }
 0x105   :  { %v316_v20 = vadd.f32 %v315_v55, %v4207_v25  ;;  %v317_v58 = vpop.f32.mrb[15].mxu0  ;;  %2927 = vmatmul.mubr.msk.f32.gmra.mrb[120].mxu0 %vm110_vm0, %v4066_v24  ;;  %3273 = vmatprep.subr.bf16.mxu1 %v3733_v18  ;;  %v4298_v48 = vpop.f32.mrb[9].mxu1 }
 0x106   :  { %v318_v62 = vadd.f32 %v317_v58, %v4211_v29  ;;  %1640 = vmatprep.mubr.f32.mxu1 %v1246_v54  ;;  %702 = vmatprep.mubr.f32.mxu0 %v3732_v0  ;;  %v1528_v58 = vld [vmem:[#allocation2 + $0x328] sm:$0xff]  ;;  %v4304_v59 = vpop.f32.mrb[10].mxu1 }
 0x107   :  { %1641 = vmatmul.mubr.f32.gmra.mrb[44].mxu1 %v1245_v57  ;;  %v1252_v15 = vmax.f32 %v316_v20, 0.0  ;;  %v1482_v57 = vld [vmem:[#allocation2 + $0x1b8] sm:$0xff]  ;;  %v1527_v20 = vld [vmem:[#allocation2 + $0x320] sm:$0xff] }
 0x108   :  { %v1253_v4 = vmax.f32 %v318_v62, 0.0  ;;  %v321_v9 = vpop.f32.mrb[16].mxu0  ;;  %3275 = vmatpush1.bf16.msra.mxu1 %v3274_v56  ;;  %v4308_v62 = vpop.f32.mrb[11].mxu1 }
 0x109   :  { %v322_v24 = vadd.f32 %v321_v9, %v4207_v25  ;;  %v323_v1 = vpop.f32.mrb[17].mxu0  ;;  %2928 = vmatmul.mubr.msk.f32.gmra.mrb[122].mxu0 %vm110_vm0, %v4077_v27  ;;  %3276 = vmatprep.subr.bf16.mxu1 %v3733_v18 }
 0x10a   :  { %v324_v26 = vadd.f32 %v323_v1, %v4211_v29  ;;  %1645 = vmatprep.mubr.f32.mxu1 %v1253_v4  ;;  %708 = vmatprep.mubr.f32.mxu0 %v3732_v0 }
 0x10b   :  { %1646 = vmatmul.mubr.f32.gmra.mrb[46].mxu1 %v1252_v15  ;;  %v1259_v36 = vmax.f32 %v322_v24, 0.0  ;;  %v3359_v15 = vpack.c.bf16 %v1528_v58, %v1527_v20 }
 0x10c   :  { %v1260_v30 = vmax.f32 %v324_v26, 0.0  ;;  %v327_v32 = vpop.f32.mrb[18].mxu0  ;;  %3278 = vmatpush1.bf16.msra.mxu1 %v3277_v14  ;;  %v1483_v14 = vld [vmem:[#allocation2 + $0x1c0] sm:$0xff]  ;;  %v1529_v26 = vld [vmem:[#allocation2 + $0x330] sm:$0xff] }
 0x10d   :  { %v328_v27 = vadd.f32 %v327_v32, %v4207_v25  ;;  %v329_v5 = vpop.f32.mrb[19].mxu0  ;;  %2929 = vmatmul.mubr.msk.f32.gmra.mrb[124].mxu0 %vm110_vm0, %v4084_v31  ;;  %3279 = vmatprep.subr.bf16.mxu1 %v3733_v18 }
 0x10e   :  { %v330_v12 = vadd.f32 %v329_v5, %v4211_v29  ;;  %1650 = vmatprep.mubr.f32.mxu1 %v1260_v30  ;;  %714 = vmatprep.mubr.f32.mxu0 %v3732_v0  ;;  %v1530_v30 = vld [vmem:[#allocation2 + $0x338] sm:$0xff]  ;;  %v1485_v5 = vld [vmem:[#allocation2 + $0x1d0] sm:$0xff] }
 0x10f   :  { %1651 = vmatmul.mubr.f32.gmra.mrb[48].mxu1 %v1259_v36  ;;  %v1266_v31 = vmax.f32 %v328_v27, 0.0  ;;  %v3363_v38 = vpack.c.bf16 %v1530_v30, %v1529_v26 }
 0x110   :  { %v1267_v33 = vmax.f32 %v330_v12, 0.0  ;;  %v333_v37 = vpop.f32.mrb[20].mxu0  ;;  %3281 = vmatpush1.bf16.msra.mxu1 %v3280_v35 }
 0x111   :  { %v334_v13 = vadd.f32 %v333_v37, %v4207_v25  ;;  %v335_v42 = vpop.f32.mrb[21].mxu0  ;;  %2930 = vmatmul.mubr.msk.f32.gmra.mrb[126].mxu0 %vm110_vm0, %v4095_v34  ;;  %3282 = vmatprep.subr.bf16.mxu1 %v3733_v18  ;;  %v1481_v34 = vld [vmem:[#allocation2 + $0x1b0] sm:$0xff]  ;;  %v1486_v37 = vld [vmem:[#allocation2 + $0x1d8] sm:$0xff] }
 0x112   :  { %v336_v47 = vadd.f32 %v335_v42, %v4211_v29  ;;  %1655 = vmatprep.mubr.f32.mxu1 %v1267_v33  ;;  %785 = vmatprep.mubr.f32.mxu0 %v3732_v0 }
 0x113   :  { %1656 = vmatmul.mubr.f32.gmra.mrb[50].mxu1 %v1266_v31  ;;  %v1273_v54 = vmax.f32 %v334_v13, 0.0 }
 0x114   :  { %v1274_v49 = vmax.f32 %v336_v47, 0.0  ;;  %v339_v17 = vpop.f32.mrb[22].mxu0  ;;  %3284 = vmatpush1.bf16.msra.mxu1 %v3283_v39  ;;  %v1531_v39 = vld [vmem:[#allocation2 + $0x340] sm:$0xff] }
 0x115   :  { %v340_v55 = vadd.f32 %v339_v17, %v4207_v25  ;;  %v341_v56 = vpop.f32.mrb[23].mxu0  ;;  %2931 = vmatmul.mubr.msk.f32.vlgmr.msra.gmra.mrb[128].mxu0 %vm110_vm0, %v3786_v3  ;;  %3285 = vmatprep.subr.bf16.mxu1 %v3733_v18  ;;  %v3289_v3 = vpack.c.bf16 %v1482_v57, %v1481_v34  ;;  %v3367_v47 = vpack.c.bf16 %v1532_v41, %v1531_v39  ;;  %v1488_v34 = vld [vmem:[#allocation2 + $0x1e8] sm:$0xff] }
 0x116   :  { %v342_v60 = vadd.f32 %v341_v56, %v4211_v29  ;;  %1660 = vmatprep.mubr.f32.mxu1 %v1274_v49  ;;  %791 = vmatprep.mubr.f32.mxu0 %v3732_v0 }
 0x117   :  { %1661 = vmatmul.mubr.f32.gmra.mrb[52].mxu1 %v1273_v54  ;;  %3354 = vmatpush3.bf16.msra.mxu0 %v4229_v2  ;;  %v1280_v24 = vmax.f32 %v340_v55, 0.0  ;;  %v4315_v2 = vpop.f32.mrb[12].mxu1  ;;  %v1534_v54 = vld [vmem:[#allocation2 + $0x358] sm:$0xff] }
 0x118   :  { %v1281_v4 = vmax.f32 %v342_v60, 0.0  ;;  %v345_v9 = vpop.f32.mrb[24].mxu0  ;;  %3287 = vmatpush1.bf16.msra.mxu1 %v3286_v50  ;;  %3356 = vmatprep.subr.bf16.mxu0 %v3355_v52  ;;  %v4319_v35 = vpop.f32.mrb[13].mxu1  ;;  %v1489_v60 = vld [vmem:[#allocation2 + $0x1f0] sm:$0xff] }
 0x119   :  { %v346_v1 = vadd.f32 %v345_v9, %v4207_v25  ;;  %v347_v19 = vpop.f32.mrb[25].mxu0  ;;  %2932 = vmatmul.mubr.msk.f32.gmra.mrb[130].mxu0 %vm110_vm0, %v3802_v6  ;;  %3288 = vmatprep.subr.bf16.mxu1 %v3733_v18  ;;  %v3292_v6 = vpack.c.bf16 %v1484_v22, %v1483_v14  ;;  %v4325_v31 = vpop.f32.mrb[14].mxu1 }
 0x11a   :  { %v348_v32 = vadd.f32 %v347_v19, %v4211_v29  ;;  %1665 = vmatprep.mubr.f32.mxu1 %v1281_v4  ;;  %797 = vmatprep.mubr.f32.mxu0 %v3732_v0  ;;  %v4329_v42 = vpop.f32.mrb[15].mxu1  ;;  %v1536_v19 = vld [vmem:[#allocation2 + $0x368] sm:$0xff] }
 0x11b   :  { %1666 = vmatmul.mubr.f32.gmra.mrb[54].mxu1 %v1280_v24  ;;  %3358 = vmatpush3.bf16.msra.mxu0 %v3355_v52  ;;  %v1287_v40 = vmax.f32 %v346_v1, 0.0  ;;  %v1533_v52 = vld [vmem:[#allocation2 + $0x350] sm:$0xff]  ;;  %v4335_v55 = vpop.f32.mrb[16].mxu1  ;;  %v1490_v24 = vld [vmem:[#allocation2 + $0x1f8] sm:$0xff]  ;;  %v1535_v1 = vld [vmem:[#allocation2 + $0x360] sm:$0xff] }
 0x11c   :  { %v1288_v36 = vmax.f32 %v348_v32, 0.0  ;;  %v351_v27 = vpop.f32.mrb[26].mxu0  ;;  %3290 = vmatpush1.bf16.msra.mxu1 %v3289_v3  ;;  %3360 = vmatprep.subr.bf16.mxu0 %v3359_v15  ;;  %v4339_v57 = vpop.f32.mrb[17].mxu1  ;;  %v3371_v4 = vpack.c.bf16 %v1534_v54, %v1533_v52 }
 0x11d   :  { %v352_v12 = vadd.f32 %v351_v27, %v4207_v25  ;;  %v353_v33 = vpop.f32.mrb[27].mxu0  ;;  %2933 = vmatmul.mubr.msk.f32.gmra.mrb[132].mxu0 %vm110_vm0, %v3810_v7  ;;  %3291 = vmatprep.subr.bf16.mxu1 %v3733_v18  ;;  %v3295_v7 = vpack.c.bf16 %v1486_v37, %v1485_v5  ;;  %v4347_v22 = vpop.f32.mrb[18].mxu1  ;;  %v3301_v27 = vpack.c.bf16 %v1490_v24, %v1489_v60  ;;  %v1538_v37 = vld [vmem:[#allocation2 + $0x378] sm:$0xff] }
 0x11e   :  { %v354_v13 = vadd.f32 %v353_v33, %v4211_v29  ;;  %1670 = vmatprep.mubr.f32.mxu1 %v1288_v36  ;;  %803 = vmatprep.mubr.f32.mxu0 %v3732_v0  ;;  %v4351_v30 = vpop.f32.mrb[19].mxu1  ;;  %v1537_v33 = vld [vmem:[#allocation2 + $0x370] sm:$0xff]  ;;  %v3679_v60 = vld [vmem:[%s5237_s0 + $0x38] sm:$0xff] }
 0x11f   :  { %1671 = vmatmul.mubr.f32.gmra.mrb[56].mxu1 %v1287_v40  ;;  %3362 = vmatpush3.bf16.msra.mxu0 %v3359_v15  ;;  %v1294_v49 = vmax.f32 %v352_v12, 0.0  ;;  %v3676_v15 = vld [vmem:[%s5237_s0 + $0x20] sm:$0xff]  ;;  %v3677_v12 = vld [vmem:[%s5237_s0 + $0x28] sm:$0xff]  ;;  %v4359_v39 = vpop.f32.mrb[20].mxu1 }
 0x120   :  { %v1295_v43 = vmax.f32 %v354_v13, 0.0  ;;  %v357_v44 = vpop.f32.mrb[28].mxu0  ;;  %3293 = vmatpush1.bf16.msra.mxu1 %v3292_v6  ;;  %3364 = vmatprep.subr.bf16.mxu0 %v3363_v38  ;;  %v3375_v6 = vpack.c.bf16 %v1536_v19, %v1535_v1  ;;  %v4363_v13 = vpop.f32.mrb[21].mxu1 }
 0x121   :  { %v358_v17 = vadd.f32 %v357_v44, %v4207_v25  ;;  %v359_v50 = vpop.f32.mrb[29].mxu0  ;;  %2934 = vmatmul.mubr.msk.f32.gmra.mrb[134].mxu0 %vm110_vm0, %v3818_v8  ;;  %3294 = vmatprep.subr.bf16.mxu1 %v3733_v18  ;;  %v3298_v8 = vpack.c.bf16 %v1488_v34, %v1487_v45 }
 0x122   :  { %v360_v56 = vadd.f32 %v359_v50, %v4211_v29  ;;  %1675 = vmatprep.mubr.f32.mxu1 %v1295_v43  ;;  %809 = vmatprep.mubr.f32.mxu0 %v3732_v0  ;;  %v4371_v50 = vpop.f32.mrb[22].mxu1 }
 0x123   :  { %1676 = vmatmul.mubr.f32.gmra.mrb[58].mxu1 %v1294_v49  ;;  %3366 = vmatpush3.bf16.msra.mxu0 %v3363_v38  ;;  %v1301_v9 = vmax.f32 %v358_v17, 0.0  ;;  %v3678_v17 = vld [vmem:[%s5237_s0 + $0x30] sm:$0xff]  ;;  %v4375_v52 = vpop.f32.mrb[23].mxu1 }
 0x124   :  { %v1302_v20 = vmax.f32 %v360_v56, 0.0  ;;  %v363_v58 = vpop.f32.mrb[30].mxu0  ;;  %3296 = vmatpush1.bf16.msra.mxu1 %v3295_v7  ;;  %3368 = vmatprep.subr.bf16.mxu0 %v3367_v47  ;;  %v3379_v7 = vpack.c.bf16 %v1538_v37, %v1537_v33  ;;  %v3681_v33 = vld [vmem:[%s5237_s0 + $0x48] sm:$0xff]  ;;  %v101_v37 = vsub.s32 6, %v4191_v11 }
 0x125   :  { %v364_v3 = vadd.f32 %v363_v58, %v4207_v25  ;;  %v365_v14 = vpop.f32.mrb[31].mxu0  ;;  %2935 = vmatmul.mubr.msk.f32.gmra.mrb[136].mxu0 %vm110_vm0, %v3676_v15  ;;  %3297 = vmatprep.subr.bf16.mxu1 %v3733_v18 }
 0x126   :  { %v366_v26 = vadd.f32 %v365_v14, %v4211_v29  ;;  %1680 = vmatprep.mubr.f32.mxu1 %v1302_v20  ;;  %815 = vmatprep.mubr.f32.mxu0 %v3732_v0 }
 0x127   :  { %1681 = vmatmul.mubr.f32.gmra.mrb[60].mxu1 %v1301_v9  ;;  %3370 = vmatpush3.bf16.msra.mxu0 %v3367_v47  ;;  %v1308_v5 = vmax.f32 %v364_v3, 0.0 }
 0x128   :  { %v1309_v32 = vmax.f32 %v366_v26, 0.0  ;;  %v369_v36 = vpop.f32.mrb[32].mxu0  ;;  %3299 = vmatpush1.bf16.msra.mxu1 %v3298_v8  ;;  %3372 = vmatprep.subr.bf16.mxu0 %v3371_v4  ;;  %v3680_v26 = vld [vmem:[%s5237_s0 + $0x40] sm:$0xff] }
 0x129   :  { %v370_v38 = vadd.f32 %v369_v36, %v4207_v25  ;;  %v371_v40 = vpop.f32.mrb[33].mxu0  ;;  %2936 = vmatmul.mubr.msk.f32.gmra.mrb[138].mxu0 %vm110_vm0, %v3677_v12  ;;  %3300 = vmatprep.subr.bf16.mxu1 %v3733_v18 }
 0x12a   :  { %v372_v41 = vadd.f32 %v371_v40, %v4211_v29  ;;  %1685 = vmatprep.mubr.f32.mxu1 %v1309_v32  ;;  %821 = vmatprep.mubr.f32.mxu0 %v3732_v0 }
 0x12b   :  { %1686 = vmatmul.mubr.f32.gmra.mrb[62].mxu1 %v1308_v5  ;;  %3374 = vmatpush3.bf16.msra.mxu0 %v3371_v4  ;;  %v1315_v45 = vmax.f32 %v370_v38, 0.0  ;;  %v4382_v4 = vpop.f32.mrb[24].mxu1 }
 0x12c   :  { %v1316_v43 = vmax.f32 %v372_v41, 0.0  ;;  %v375_v44 = vpop.f32.mrb[34].mxu0  ;;  %3302 = vmatpush1.bf16.msra.mxu1 %v3301_v27  ;;  %3376 = vmatprep.subr.bf16.mxu0 %v3375_v6  ;;  %v4386_v3 = vpop.f32.mrb[25].mxu1 }
 0x12d   :  { %v376_v47 = vadd.f32 %v375_v44, %v4207_v25  ;;  %v377_v49 = vpop.f32.mrb[35].mxu0  ;;  %2937 = vmatmul.mubr.msk.f32.gmra.mrb[140].mxu0 %vm110_vm0, %v3678_v17  ;;  %3303 = vmatprep.subr.bf16.mxu1 %v3733_v18  ;;  %v4393_v32 = vpop.f32.mrb[26].mxu1 }
 0x12e   :  { %v378_v34 = vadd.f32 %v377_v49, %v4211_v29  ;;  %1690 = vmatprep.mubr.f32.mxu1 %v1316_v43  ;;  %827 = vmatprep.mubr.f32.mxu0 %v3732_v0  ;;  %v4397_v27 = vpop.f32.mrb[27].mxu1 }
 0x12f   :  { %1691 = vmatmul.mubr.f32.gmra.mrb[64].mxu1 %v1315_v45  ;;  %3378 = vmatpush3.bf16.msra.mxu0 %v3375_v6  ;;  %v1322_v20 = vmax.f32 %v376_v47, 0.0  ;;  %v4405_v41 = vpop.f32.mrb[28].mxu1 }
 0x130   :  { %v1323_v54 = vmax.f32 %v378_v34, 0.0  ;;  %v381_v56 = vpop.f32.mrb[36].mxu0  ;;  %3380 = vmatprep.subr.bf16.mxu0 %v3379_v7  ;;  %v4409_v44 = vpop.f32.mrb[29].mxu1  ;;  %v3682_v34 = vld [vmem:[%s5237_s0 + $0x50] sm:$0xff] }
 0x131   :  { %v382_v58 = vadd.f32 %v381_v56, %v4207_v25  ;;  %v383_v8 = vpop.f32.mrb[37].mxu0  ;;  %2938 = vmatmul.mubr.msk.f32.gmra.mrb[142].mxu0 %vm110_vm0, %v3679_v60  ;;  %v3126_v56 = vpop.f32.mrb[30].mxu1 }
 0x132   :  { %v384_v9 = vadd.f32 %v383_v8, %v4211_v29  ;;  %1695 = vmatprep.mubr.f32.mxu1 %v1323_v54  ;;  %833 = vmatprep.mubr.f32.mxu0 %v3732_v0  ;;  %v4417_v54 = vrot.slane %v4201_v16, %v101_v37 }
 0x133   :  { %1696 = vmatmul.mubr.f32.gmra.mrb[66].mxu1 %v1322_v20  ;;  %3382 = vmatpush3.bf16.msra.mxu0 %v3379_v7  ;;  %v1329_v24 = vmax.f32 %v382_v58, 0.0  ;;  %v4421_v58 = vpop.f32.mrb[31].mxu1 }
 0x134   :  { %v1330_v14 = vmax.f32 %v384_v9, 0.0  ;;  %v387_v15 = vpop.f32.mrb[38].mxu0  ;;  %v4424_v8 = vadd.f32 %v3126_v56, %v4417_v54 }
 0x135   :  { %v388_v1 = vadd.f32 %v387_v15, %v4207_v25  ;;  %v389_v19 = vpop.f32.mrb[39].mxu0  ;;  %2939 = vmatmul.mubr.msk.f32.gmra.mrb[144].mxu0 %vm110_vm0, %v3680_v26 }
 0x136   :  { %v390_v36 = vadd.f32 %v389_v19, %v4211_v29  ;;  %1700 = vmatprep.mubr.f32.mxu1 %v1330_v14  ;;  %839 = vmatprep.mubr.f32.mxu0 %v3732_v0 }
 0x137   :  { %1701 = vmatmul.mubr.f32.gmra.mrb[68].mxu1 %v1329_v24  ;;  %v1336_v38 = vmax.f32 %v388_v1, 0.0  ;;  %v3683_v1 = vld [vmem:[%s5237_s0 + $0x58] sm:$0xff] }
 0x138   :  { %v1337_v6 = vmax.f32 %v390_v36, 0.0  ;;  %v393_v5 = vpop.f32.mrb[40].mxu0 }
 0x139   :  { %v394_v40 = vadd.f32 %v393_v5, %v4207_v25  ;;  %v395_v12 = vpop.f32.mrb[41].mxu0  ;;  %2940 = vmatmul.mubr.msk.f32.gmra.mrb[146].mxu0 %vm110_vm0, %v3681_v33 }
 0x13a   :  { %v396_v43 = vadd.f32 %v395_v12, %v4211_v29  ;;  %1705 = vmatprep.mubr.f32.mxu1 %v1337_v6  ;;  %845 = vmatprep.mubr.f32.mxu0 %v3732_v0 }
 0x13b   :  { %1706 = vmatmul.mubr.f32.gmra.mrb[70].mxu1 %v1336_v38  ;;  %v1343_v47 = vmax.f32 %v394_v40, 0.0  ;;  %v3684_v40 = vld [vmem:[%s5237_s0 + $0x60] sm:$0xff] }
 0x13c   :  { %v1344_v7 = vmax.f32 %v396_v43, 0.0  ;;  %v399_v45 = vpop.f32.mrb[42].mxu0 }
 0x13d   :  { %v400_v49 = vadd.f32 %v399_v45, %v4207_v25  ;;  %v401_v17 = vpop.f32.mrb[43].mxu0  ;;  %2941 = vmatmul.mubr.msk.f32.gmra.mrb[148].mxu0 %vm110_vm0, %v3682_v34 }
 0x13e   :  { %v402_v20 = vadd.f32 %v401_v17, %v4211_v29  ;;  %1710 = vmatprep.mubr.f32.mxu1 %v1344_v7  ;;  %851 = vmatprep.mubr.f32.mxu0 %v3732_v0 }
 0x13f   :  { %1711 = vmatmul.mubr.f32.gmra.mrb[72].mxu1 %v1343_v47  ;;  %v1350_v14 = vmax.f32 %v400_v49, 0.0  ;;  %v3685_v47 = vld [vmem:[%s5237_s0 + $0x68] sm:$0xff] }
 0x140   :  { %v1351_v60 = vmax.f32 %v402_v20, 0.0  ;;  %v405_v9 = vpop.f32.mrb[44].mxu0 }
 0x141   :  { %v406_v15 = vadd.f32 %v405_v9, %v4207_v25  ;;  %v407_v24 = vpop.f32.mrb[45].mxu0  ;;  %2942 = vmatmul.mubr.msk.f32.gmra.mrb[150].mxu0 %vm110_vm0, %v3683_v1  ;;  %v3686_v9 = vld [vmem:[%s5237_s0 + $0x70] sm:$0xff] }
 0x142   :  { %v408_v19 = vadd.f32 %v407_v24, %v4211_v29  ;;  %1715 = vmatprep.mubr.f32.mxu1 %v1351_v60  ;;  %857 = vmatprep.mubr.f32.mxu0 %v3732_v0 }
 0x143   :  { %1716 = vmatmul.mubr.f32.gmra.mrb[74].mxu1 %v1350_v14  ;;  %v1357_v6 = vmax.f32 %v406_v15, 0.0 }
 0x144   :  { %v1358_v26 = vmax.f32 %v408_v19, 0.0  ;;  %v411_v36 = vpop.f32.mrb[46].mxu0 }
 0x145   :  { %v412_v5 = vadd.f32 %v411_v36, %v4207_v25  ;;  %v413_v38 = vpop.f32.mrb[47].mxu0  ;;  %2943 = vmatmul.mubr.msk.f32.gmra.mrb[152].mxu0 %vm110_vm0, %v3684_v40  ;;  %v3687_v36 = vld [vmem:[%s5237_s0 + $0x78] sm:$0xff] }
 0x146   :  { %v414_v12 = vadd.f32 %v413_v38, %v4211_v29  ;;  %1720 = vmatprep.mubr.f32.mxu1 %v1358_v26  ;;  %863 = vmatprep.mubr.f32.mxu0 %v3732_v0 }
 0x147   :  { %1721 = vmatmul.mubr.f32.gmra.mrb[76].mxu1 %v1357_v6  ;;  %v1364_v43 = vmax.f32 %v412_v5, 0.0 }
 0x148   :  { %v1365_v33 = vmax.f32 %v414_v12, 0.0  ;;  %v417_v37 = vpop.f32.mrb[48].mxu0 }
 0x149   :  { %v418_v7 = vadd.f32 %v417_v37, %v4207_v25  ;;  %v419_v45 = vpop.f32.mrb[49].mxu0  ;;  %2944 = vmatmul.mubr.msk.f32.gmra.mrb[154].mxu0 %vm110_vm0, %v3685_v47  ;;  %v3688_v37 = vld [vmem:[%s5237_s0 + $0x80] sm:$0xff] }
 0x14a   :  { %v420_v49 = vadd.f32 %v419_v45, %v4211_v29  ;;  %1725 = vmatprep.mubr.f32.mxu1 %v1365_v33  ;;  %869 = vmatprep.mubr.f32.mxu0 %v3732_v0 }
 0x14b   :  { %1726 = vmatmul.mubr.f32.gmra.mrb[78].mxu1 %v1364_v43  ;;  %v1371_v56 = vmax.f32 %v418_v7, 0.0 }
 0x14c   :  { %v1372_v17 = vmax.f32 %v420_v49, 0.0  ;;  %v423_v34 = vpop.f32.mrb[50].mxu0 }
 0x14d   :  { %v424_v20 = vadd.f32 %v423_v34, %v4207_v25  ;;  %v425_v60 = vpop.f32.mrb[51].mxu0  ;;  %2945 = vmatmul.mubr.msk.f32.gmra.mrb[156].mxu0 %vm110_vm0, %v3686_v9  ;;  %v3689_v34 = vld [vmem:[%s5237_s0 + $0x88] sm:$0xff] }
 0x14e   :  { %v426_v14 = vadd.f32 %v425_v60, %v4211_v29  ;;  %1730 = vmatprep.mubr.f32.mxu1 %v1372_v17  ;;  %875 = vmatprep.mubr.f32.mxu0 %v3732_v0 }
 0x14f   :  { %1731 = vmatmul.mubr.f32.gmra.mrb[80].mxu1 %v1371_v56  ;;  %v1378_v1 = vmax.f32 %v424_v20, 0.0 }
 0x150   :  { %v1379_v15 = vmax.f32 %v426_v14, 0.0  ;;  %v429_v24 = vpop.f32.mrb[52].mxu0 }
 0x151   :  { %v430_v19 = vadd.f32 %v429_v24, %v4207_v25  ;;  %v431_v26 = vpop.f32.mrb[53].mxu0  ;;  %2946 = vmatmul.mubr.msk.f32.gmra.mrb[158].mxu0 %vm110_vm0, %v3687_v36  ;;  %v3690_v24 = vld [vmem:[%s5237_s0 + $0x90] sm:$0xff] }
 0x152   :  { %v432_v6 = vadd.f32 %v431_v26, %v4211_v29  ;;  %1735 = vmatprep.mubr.f32.mxu1 %v1379_v15  ;;  %881 = vmatprep.mubr.f32.mxu0 %v3732_v0 }
 0x153   :  { %1736 = vmatmul.mubr.f32.gmra.mrb[82].mxu1 %v1378_v1  ;;  %v1385_v40 = vmax.f32 %v430_v19, 0.0 }
 0x154   :  { %v1386_v5 = vmax.f32 %v432_v6, 0.0  ;;  %v435_v38 = vpop.f32.mrb[54].mxu0 }
 0x155   :  { %v436_v12 = vadd.f32 %v435_v38, %v4207_v25  ;;  %v437_v33 = vpop.f32.mrb[55].mxu0  ;;  %2947 = vmatmul.mubr.msk.f32.gmra.mrb[160].mxu0 %vm110_vm0, %v3688_v37  ;;  %v3691_v38 = vld [vmem:[%s5237_s0 + $0x98] sm:$0xff] }
 0x156   :  { %v438_v43 = vadd.f32 %v437_v33, %v4211_v29  ;;  %1740 = vmatprep.mubr.f32.mxu1 %v1386_v5  ;;  %887 = vmatprep.mubr.f32.mxu0 %v3732_v0  ;;  %v89_v33 = vsub.s32 3, %v4191_v11 }
 0x157   :  { %1741 = vmatmul.mubr.f32.gmra.mrb[84].mxu1 %v1385_v40  ;;  %v1392_v47 = vmax.f32 %v436_v12, 0.0  ;;  %v85_v40 = vsub.s32 2, %v4191_v11 }
 0x158   :  { %v1393_v7 = vmax.f32 %v438_v43, 0.0  ;;  %v441_v45 = vpop.f32.mrb[56].mxu0 }
 0x159   :  { %v442_v49 = vadd.f32 %v441_v45, %v4207_v25  ;;  %v443_v17 = vpop.f32.mrb[57].mxu0  ;;  %2948 = vmatmul.mubr.msk.f32.gmra.mrb[162].mxu0 %vm110_vm0, %v3689_v34 }
 0x15a   :  { %v444_v56 = vadd.f32 %v443_v17, %v4211_v29  ;;  %1745 = vmatprep.mubr.f32.mxu1 %v1393_v7  ;;  %893 = vmatprep.mubr.f32.mxu0 %v3732_v0  ;;  %v4497_v17 = vrot.slane %v4201_v16, %v85_v40  ;;  %v1493_v40 = vld [vmem:[#allocation2 + $0x210] sm:$0xff] }
 0x15b   :  { %1746 = vmatmul.mubr.f32.gmra.mrb[86].mxu1 %v1392_v47  ;;  %v1399_v9 = vmax.f32 %v442_v49, 0.0  ;;  %v3692_v49 = vld [vmem:[%s5237_s0 + $0xa0] sm:$0xff] }
 0x15c   :  { %v1400_v20 = vmax.f32 %v444_v56, 0.0  ;;  %v447_v60 = vpop.f32.mrb[58].mxu0  ;;  %v4502_v56 = vrot.slane %v4201_v16, %v89_v33 }
 0x15d   :  { %v448_v14 = vadd.f32 %v447_v60, %v4207_v25  ;;  %v449_v15 = vpop.f32.mrb[59].mxu0  ;;  %2949 = vmatmul.mubr.msk.f32.gmra.mrb[164].mxu0 %vm110_vm0, %v3690_v24  ;;  %v1492_v24 = vld [vmem:[#allocation2 + $0x208] sm:$0xff] }
 0x15e   :  { %v450_v1 = vadd.f32 %v449_v15, %v4211_v29  ;;  %1750 = vmatprep.mubr.f32.mxu1 %v1400_v20  ;;  %899 = vmatprep.mubr.f32.mxu0 %v3732_v0  ;;  %v3693_v15 = vld [vmem:[%s5237_s0 + $0xa8] sm:$0xff] }
 0x15f   :  { %1751 = vmatmul.mubr.f32.gmra.mrb[88].mxu1 %v1399_v9  ;;  %v1406_v36 = vmax.f32 %v448_v14, 0.0 }
 0x160   :  { %v1407_v19 = vmax.f32 %v450_v1, 0.0  ;;  %v453_v26 = vpop.f32.mrb[60].mxu0 }
 0x161   :  { %v454_v6 = vadd.f32 %v453_v26, %v4207_v25  ;;  %v455_v5 = vpop.f32.mrb[61].mxu0  ;;  %2950 = vmatmul.mubr.msk.f32.gmra.mrb[166].mxu0 %vm110_vm0, %v3691_v38  ;;  %v3694_v38 = vld [vmem:[%s5237_s0 + $0xb0] sm:$0xff] }
 0x162   :  { %v456_v12 = vadd.f32 %v455_v5, %v4211_v29  ;;  %1755 = vmatprep.mubr.f32.mxu1 %v1407_v19  ;;  %905 = vmatprep.mubr.f32.mxu0 %v3732_v0 }
 0x163   :  { %1756 = vmatmul.mubr.f32.gmra.mrb[90].mxu1 %v1406_v36  ;;  %v1413_v7 = vmax.f32 %v454_v6, 0.0 }
 0x164   :  { %v1414_v37 = vmax.f32 %v456_v12, 0.0  ;;  %v459_v43 = vpop.f32.mrb[62].mxu0  ;;  %v1494_v12 = vld [vmem:[#allocation2 + $0x218] sm:$0xff] }
 0x165   :  { %v460_v45 = vadd.f32 %v459_v43, %v4207_v25  ;;  %v461_v47 = vpop.f32.mrb[63].mxu0  ;;  %2951 = vmatmul.mubr.msk.f32.gmra.mrb[168].mxu0 %vm110_vm0, %v3692_v49 }
 0x166   :  { %v462_v34 = vadd.f32 %v461_v47, %v4211_v29  ;;  %1760 = vmatprep.mubr.f32.mxu1 %v1414_v37  ;;  %911 = vmatprep.mubr.f32.mxu0 %v3732_v0  ;;  %v1491_v29 = vld [vmem:[#allocation2 + $0x200] sm:$0xff] }
 0x167   :  { %1761 = vmatmul.mubr.f32.gmra.mrb[92].mxu1 %v1413_v7  ;;  %v1420_v60 = vmax.f32 %v460_v45, 0.0  ;;  %v3304_v26 = vpack.c.bf16 %v1492_v24, %v1491_v29  ;;  %v3307_v7 = vpack.c.bf16 %v1494_v12, %v1493_v40 }
 0x168   :  { %v1421_v25 = vmax.f32 %v462_v34, 0.0  ;;  %v530_v20 = vpop.f32.mrb[64].mxu0  ;;  %v3695_v34 = vld [vmem:[%s5237_s0 + $0xb8] sm:$0xff] }
 0x169   :  { %v531_v9 = vadd.f32 %v530_v20, %v4497_v17  ;;  %v532_v14 = vpop.f32.mrb[65].mxu0  ;;  %2952 = vmatmul.mubr.msk.f32.gmra.mrb[170].mxu0 %vm110_vm0, %v3693_v15  ;;  %v1496_v20 = vld [vmem:[#allocation2 + $0x228] sm:$0xff] }
 0x16a   :  { %v533_v1 = vadd.f32 %v532_v14, %v4502_v56  ;;  %1765 = vmatprep.mubr.f32.mxu1 %v1421_v25  ;;  %917 = vmatprep.mubr.f32.mxu0 %v3732_v0  ;;  %v1495_v25 = vld [vmem:[#allocation2 + $0x220] sm:$0xff] }
 0x16b   :  { %1766 = vmatmul.mubr.f32.gmra.mrb[94].mxu1 %v1420_v60  ;;  %v1205_v36 = vmax.f32 %v531_v9, 0.0  ;;  %v3310_v15 = vpack.c.bf16 %v1496_v20, %v1495_v25 }
 0x16c   :  { %v1206_v16 = vmax.f32 %v533_v1, 0.0  ;;  %v536_v19 = vpop.f32.mrb[66].mxu0 }
 0x16d   :  { %v537_v6 = vadd.f32 %v536_v19, %v4497_v17  ;;  %v538_v5 = vpop.f32.mrb[67].mxu0  ;;  %2953 = vmatmul.mubr.msk.f32.gmra.mrb[172].mxu0 %vm110_vm0, %v3694_v38  ;;  %v1497_v19 = vld [vmem:[#allocation2 + $0x230] sm:$0xff] }
 0x16e   :  { %v539_v33 = vadd.f32 %v538_v5, %v4502_v56  ;;  %1835 = vmatprep.mubr.f32.mxu1 %v1206_v16  ;;  %923 = vmatprep.mubr.f32.mxu0 %v3732_v0  ;;  %v3696_v16 = vld [vmem:[%s5237_s0 + $0xc0] sm:$0xff] }
 0x16f   :  { %1836 = vmatmul.mubr.f32.vlgmr.msra.gmra.mrb[32].mxu1 %v1205_v36  ;;  %v1212_v45 = vmax.f32 %v537_v6, 0.0 }
 0x170   :  { %v1213_v37 = vmax.f32 %v539_v33, 0.0  ;;  %v542_v43 = vpop.f32.mrb[68].mxu0  ;;  %3305 = vmatpush1.bf16.msra.mxu1 %v3304_v26  ;;  %v1498_v26 = vld [vmem:[#allocation2 + $0x238] sm:$0xff] }
 0x171   :  { %v543_v47 = vadd.f32 %v542_v43, %v4497_v17  ;;  %v544_v49 = vpop.f32.mrb[69].mxu0  ;;  %2954 = vmatmul.mubr.msk.f32.gmra.mrb[174].mxu0 %vm110_vm0, %v3695_v34  ;;  %3306 = vmatprep.subr.bf16.mxu1 %v3733_v18  ;;  %v3313_v38 = vpack.c.bf16 %v1498_v26, %v1497_v19  ;;  %v1499_v43 = vld [vmem:[#allocation2 + $0x240] sm:$0xff] }
 0x172   :  { %v545_v60 = vadd.f32 %v544_v49, %v4502_v56  ;;  %1840 = vmatprep.mubr.f32.mxu1 %v1213_v37  ;;  %929 = vmatprep.mubr.f32.mxu0 %v3732_v0  ;;  %v3697_v37 = vld [vmem:[%s5237_s0 + $0xc8] sm:$0xff] }
 0x173   :  { %1841 = vmatmul.mubr.f32.gmra.mrb[34].mxu1 %v1212_v45  ;;  %v1219_v29 = vmax.f32 %v543_v47, 0.0 }
 0x174   :  { %v1220_v9 = vmax.f32 %v545_v60, 0.0  ;;  %v548_v14 = vpop.f32.mrb[70].mxu0  ;;  %3308 = vmatpush1.bf16.msra.mxu1 %v3307_v7  ;;  %v1500_v7 = vld [vmem:[#allocation2 + $0x248] sm:$0xff] }
 0x175   :  { %v549_v24 = vadd.f32 %v548_v14, %v4497_v17  ;;  %v550_v1 = vpop.f32.mrb[71].mxu0  ;;  %2955 = vmatmul.mubr.msk.f32.gmra.mrb[176].mxu0 %vm110_vm0, %v3696_v16  ;;  %3309 = vmatprep.subr.bf16.mxu1 %v3733_v18  ;;  %v3316_v34 = vpack.c.bf16 %v1500_v7, %v1499_v43  ;;  %v1501_v14 = vld [vmem:[#allocation2 + $0x250] sm:$0xff] }
 0x176   :  { %v551_v36 = vadd.f32 %v550_v1, %v4502_v56  ;;  %1845 = vmatprep.mubr.f32.mxu1 %v1220_v9  ;;  %935 = vmatprep.mubr.f32.mxu0 %v3732_v0  ;;  %v3698_v9 = vld [vmem:[%s5237_s0 + $0xd0] sm:$0xff] }
 0x177   :  { %1846 = vmatmul.mubr.f32.gmra.mrb[36].mxu1 %v1219_v29  ;;  %v1226_v40 = vmax.f32 %v549_v24, 0.0 }
 0x178   :  { %v1227_v6 = vmax.f32 %v551_v36, 0.0  ;;  %v554_v5 = vpop.f32.mrb[72].mxu0  ;;  %3311 = vmatpush1.bf16.msra.mxu1 %v3310_v15  ;;  %v1502_v15 = vld [vmem:[#allocation2 + $0x258] sm:$0xff] }
 0x179   :  { %v555_v12 = vadd.f32 %v554_v5, %v4497_v17  ;;  %v556_v33 = vpop.f32.mrb[73].mxu0  ;;  %2956 = vmatmul.mubr.msk.f32.gmra.mrb[178].mxu0 %vm110_vm0, %v3697_v37  ;;  %3312 = vmatprep.subr.bf16.mxu1 %v3733_v18  ;;  %v3319_v16 = vpack.c.bf16 %v1502_v15, %v1501_v14  ;;  %v1503_v5 = vld [vmem:[#allocation2 + $0x260] sm:$0xff] }
 0x17a   :  { %v557_v45 = vadd.f32 %v556_v33, %v4502_v56  ;;  %1850 = vmatprep.mubr.f32.mxu1 %v1227_v6  ;;  %941 = vmatprep.mubr.f32.mxu0 %v3732_v0  ;;  %v3699_v6 = vld [vmem:[%s5237_s0 + $0xd8] sm:$0xff] }
 0x17b   :  { %1851 = vmatmul.mubr.f32.gmra.mrb[38].mxu1 %v1226_v40  ;;  %v1233_v25 = vmax.f32 %v555_v12, 0.0 }
 0x17c   :  { %v1234_v47 = vmax.f32 %v557_v45, 0.0  ;;  %v560_v49 = vpop.f32.mrb[74].mxu0  ;;  %3314 = vmatpush1.bf16.msra.mxu1 %v3313_v38  ;;  %v1504_v38 = vld [vmem:[#allocation2 + $0x268] sm:$0xff] }
 0x17d   :  { %v561_v20 = vadd.f32 %v560_v49, %v4497_v17  ;;  %v562_v60 = vpop.f32.mrb[75].mxu0  ;;  %2957 = vmatmul.mubr.msk.f32.gmra.mrb[180].mxu0 %vm110_vm0, %v3698_v9  ;;  %3315 = vmatprep.subr.bf16.mxu1 %v3733_v18  ;;  %v3322_v37 = vpack.c.bf16 %v1504_v38, %v1503_v5  ;;  %v1505_v49 = vld [vmem:[#allocation2 + $0x270] sm:$0xff] }
 0x17e   :  { %v563_v29 = vadd.f32 %v562_v60, %v4502_v56  ;;  %1855 = vmatprep.mubr.f32.mxu1 %v1234_v47  ;;  %947 = vmatprep.mubr.f32.mxu0 %v3732_v0  ;;  %v3700_v47 = vld [vmem:[%s5237_s0 + $0xe0] sm:$0xff] }
 0x17f   :  { %1856 = vmatmul.mubr.f32.gmra.mrb[40].mxu1 %v1233_v25  ;;  %v1240_v19 = vmax.f32 %v561_v20, 0.0 }
 0x180   :  { %v1241_v24 = vmax.f32 %v563_v29, 0.0  ;;  %v566_v1 = vpop.f32.mrb[76].mxu0  ;;  %3317 = vmatpush1.bf16.msra.mxu1 %v3316_v34  ;;  %v1506_v34 = vld [vmem:[#allocation2 + $0x278] sm:$0xff] }
 0x181   :  { %v567_v26 = vadd.f32 %v566_v1, %v4497_v17  ;;  %v568_v36 = vpop.f32.mrb[77].mxu0  ;;  %2958 = vmatmul.mubr.msk.f32.gmra.mrb[182].mxu0 %vm110_vm0, %v3699_v6  ;;  %3318 = vmatprep.subr.bf16.mxu1 %v3733_v18  ;;  %v3325_v9 = vpack.c.bf16 %v1506_v34, %v1505_v49  ;;  %v1507_v1 = vld [vmem:[#allocation2 + $0x280] sm:$0xff] }
 0x182   :  { %v569_v40 = vadd.f32 %v568_v36, %v4502_v56  ;;  %1860 = vmatprep.mubr.f32.mxu1 %v1241_v24  ;;  %953 = vmatprep.mubr.f32.mxu0 %v3732_v0  ;;  %v3701_v24 = vld [vmem:[%s5237_s0 + $0xe8] sm:$0xff] }
 0x183   :  { %1861 = vmatmul.mubr.f32.gmra.mrb[42].mxu1 %v1240_v19  ;;  %v1247_v43 = vmax.f32 %v567_v26, 0.0  ;;  %v1045_v26 = vadd.f32 %v4258_v53, %v4417_v54 }
 0x184   :  { %v1248_v12 = vmax.f32 %v569_v40, 0.0  ;;  %v572_v33 = vpop.f32.mrb[78].mxu0  ;;  %3320 = vmatpush1.bf16.msra.mxu1 %v3319_v16  ;;  %v1508_v16 = vld [vmem:[#allocation2 + $0x288] sm:$0xff] }
 0x185   :  { %v573_v7 = vadd.f32 %v572_v33, %v4497_v17  ;;  %v574_v45 = vpop.f32.mrb[79].mxu0  ;;  %2959 = vmatmul.mubr.msk.f32.gmra.mrb[184].mxu0 %vm110_vm0, %v3700_v47  ;;  %3321 = vmatprep.subr.bf16.mxu1 %v3733_v18  ;;  %v3328_v5 = vpack.c.bf16 %v1508_v16, %v1507_v1  ;;  %v3702_v33 = vld [vmem:[%s5237_s0 + $0xf0] sm:$0xff]  ;;  %v1055_v47 = vadd.f32 %v4268_v63, %v4417_v54 }
 0x186   :  { %v575_v25 = vadd.f32 %v574_v45, %v4502_v56  ;;  %1865 = vmatprep.mubr.f32.mxu1 %v1248_v12  ;;  %959 = vmatprep.mubr.f32.mxu0 %v3732_v0  ;;  %v1209_v45 = vmax.f32 %v1045_v26, 0.0  ;;  %v1065_v1 = vadd.f32 %v4278_v28, %v4417_v54  ;;  %v1070_v28 = vadd.f32 %v4274_v23, %v4417_v54 }
 0x187   :  { %1866 = vmatmul.mubr.f32.gmra.mrb[44].mxu1 %v1247_v43  ;;  %v1254_v14 = vmax.f32 %v573_v7, 0.0  ;;  %v1510_v43 = vld [vmem:[#allocation2 + $0x298] sm:$0xff]  ;;  %v1050_v7 = vadd.f32 %v4254_v51, %v4417_v54  ;;  %v1511_v51 = vld [vmem:[#allocation2 + $0x2a0] sm:$0xff] }
 0x188   :  { %v1255_v20 = vmax.f32 %v575_v25, 0.0  ;;  %v578_v60 = vpop.f32.mrb[80].mxu0  ;;  %3323 = vmatpush1.bf16.msra.mxu1 %v3322_v37  ;;  %v1509_v37 = vld [vmem:[#allocation2 + $0x290] sm:$0xff] }
 0x189   :  { %v579_v15 = vadd.f32 %v578_v60, %v4497_v17  ;;  %v580_v29 = vpop.f32.mrb[81].mxu0  ;;  %2960 = vmatmul.mubr.msk.f32.gmra.mrb[186].mxu0 %vm110_vm0, %v3701_v24  ;;  %3324 = vmatprep.subr.bf16.mxu1 %v3733_v18  ;;  %v3331_v25 = vpack.c.bf16 %v1510_v43, %v1509_v37  ;;  %v1223_v24 = vmax.f32 %v1055_v47, 0.0  ;;  %v1075_v37 = vadd.f32 %v4288_v21, %v4417_v54 }
 0x18a   :  { %v581_v19 = vadd.f32 %v580_v29, %v4502_v56  ;;  %1870 = vmatprep.mubr.f32.mxu1 %v1255_v20  ;;  %965 = vmatprep.mubr.f32.mxu0 %v3732_v0  ;;  %v1060_v29 = vadd.f32 %v4264_v61, %v4417_v54  ;;  %v1080_v21 = vadd.f32 %v4284_v10, %v4417_v54 }
 0x18b   :  { %1871 = vmatmul.mubr.f32.gmra.mrb[46].mxu1 %v1254_v14  ;;  %v1261_v38 = vmax.f32 %v579_v15, 0.0  ;;  %v1512_v14 = vld [vmem:[#allocation2 + $0x2a8] sm:$0xff]  ;;  %v1216_v15 = vmax.f32 %v1050_v7, 0.0 }
 0x18c   :  { %v1262_v36 = vmax.f32 %v581_v19, 0.0  ;;  %v584_v6 = vpop.f32.mrb[82].mxu0  ;;  %3326 = vmatpush1.bf16.msra.mxu1 %v3325_v9  ;;  %v3334_v26 = vpack.c.bf16 %v1512_v14, %v1511_v51 }
 0x18d   :  { %v585_v40 = vadd.f32 %v584_v6, %v4497_v17  ;;  %v586_v12 = vpop.f32.mrb[83].mxu0  ;;  %2961 = vmatmul.mubr.msk.f32.gmra.mrb[188].mxu0 %vm110_vm0, %v3702_v33  ;;  %3327 = vmatprep.subr.bf16.mxu1 %v3733_v18  ;;  %v1237_v33 = vmax.f32 %v1065_v1, 0.0  ;;  %v1518_v1 = vld [vmem:[#allocation2 + $0x2d8] sm:$0xff] }
 0x18e   :  { %v587_v53 = vadd.f32 %v586_v12, %v4502_v56  ;;  %1875 = vmatprep.mubr.f32.mxu1 %v1262_v36  ;;  %971 = vmatprep.mubr.f32.mxu0 %v3732_v0  ;;  %v3703_v0 = vld [vmem:[%s5237_s0 + $0xf8] sm:$0xff]  ;;  %v1230_v12 = vmax.f32 %v1060_v29, 0.0 }
 0x18f   :  { %1876 = vmatmul.mubr.f32.gmra.mrb[48].mxu1 %v1261_v38  ;;  %v1268_v20 = vmax.f32 %v585_v40, 0.0  ;;  %v1513_v38 = vld [vmem:[#allocation2 + $0x2b0] sm:$0xff]  ;;  %v1514_v40 = vld [vmem:[#allocation2 + $0x2b8] sm:$0xff] }
 0x190   :  { %v1269_v49 = vmax.f32 %v587_v53, 0.0  ;;  %v590_v34 = vpop.f32.mrb[84].mxu0  ;;  %3329 = vmatpush1.bf16.msra.mxu1 %v3328_v5  ;;  %v3337_v7 = vpack.c.bf16 %v1514_v40, %v1513_v38 }
 0x191   :  { %v591_v60 = vadd.f32 %v590_v34, %v4497_v17  ;;  %v592_v9 = vpop.f32.mrb[85].mxu0  ;;  %2962 = vmatmul.mubr.msk.f32.gmra.mrb[190].mxu0 %vm110_vm0, %v3703_v0  ;;  %3330 = vmatprep.subr.bf16.mxu1 %v3733_v18  ;;  %v1515_v34 = vld [vmem:[#allocation2 + $0x2c0] sm:$0xff] }
 0x192   :  { %v593_v63 = vadd.f32 %v592_v9, %v4502_v56  ;;  %1880 = vmatprep.mubr.f32.mxu1 %v1269_v49  ;;  %3159 = vmatprep.mubr.f32.mxu0 %v1209_v45  ;;  %v1085_v9 = vadd.f32 %v4298_v48, %v4417_v54  ;;  %v1090_v48 = vadd.f32 %v4294_v46, %v4417_v54 }
 0x193   :  { %1881 = vmatmul.mubr.f32.gmra.mrb[50].mxu1 %v1268_v20  ;;  %v1275_v36 = vmax.f32 %v591_v60, 0.0  ;;  %v1244_v20 = vmax.f32 %v1070_v28, 0.0  ;;  %v1251_v60 = vmax.f32 %v1075_v37, 0.0  ;;  %v1520_v28 = vld [vmem:[#allocation2 + $0x2e8] sm:$0xff] }
 0x194   :  { %v1276_v16 = vmax.f32 %v593_v63, 0.0  ;;  %v596_v19 = vpop.f32.mrb[86].mxu0  ;;  %3332 = vmatpush1.bf16.msra.mxu1 %v3331_v25  ;;  %v1516_v25 = vld [vmem:[#allocation2 + $0x2c8] sm:$0xff] }
 0x195   :  { %v597_v6 = vadd.f32 %v596_v19, %v4497_v17  ;;  %v598_v5 = vpop.f32.mrb[87].mxu0  ;;  %3160 = vmatmul.mubr.f32.vlgmr.msra.gmra.mrb[192].mxu0 %v1216_v15  ;;  %3333 = vmatprep.subr.bf16.mxu1 %v3733_v18  ;;  %v3340_v14 = vpack.c.bf16 %v1516_v25, %v1515_v34  ;;  %v1265_v19 = vmax.f32 %v1085_v9, 0.0  ;;  %v1521_v25 = vld [vmem:[#allocation2 + $0x2f0] sm:$0xff] }
 0x196   :  { %v599_v61 = vadd.f32 %v598_v5, %v4502_v56  ;;  %1885 = vmatprep.mubr.f32.mxu1 %v1276_v16  ;;  %3162 = vmatprep.mubr.f32.mxu0 %v1223_v24  ;;  %v1517_v24 = vld [vmem:[#allocation2 + $0x2d0] sm:$0xff]  ;;  %v1258_v16 = vmax.f32 %v1080_v21, 0.0 }
 0x197   :  { %1886 = vmatmul.mubr.f32.gmra.mrb[52].mxu1 %v1275_v36  ;;  %v1282_v45 = vmax.f32 %v597_v6, 0.0  ;;  %v3343_v5 = vpack.c.bf16 %v1518_v1, %v1517_v24  ;;  %v1120_v24 = vadd.f32 %v4325_v31, %v4417_v54  ;;  %v1125_v1 = vadd.f32 %v4339_v57, %v4417_v54 }
 0x198   :  { %v1283_v43 = vmax.f32 %v599_v61, 0.0  ;;  %v602_v53 = vpop.f32.mrb[88].mxu0  ;;  %3335 = vmatpush1.bf16.msra.mxu1 %v3334_v26  ;;  %v1095_v26 = vadd.f32 %v4308_v62, %v4417_v54  ;;  %v1100_v62 = vadd.f32 %v4304_v59, %v4417_v54  ;;  %v1130_v31 = vadd.f32 %v4335_v55, %v4417_v54 }
 0x199   :  { %v603_v47 = vadd.f32 %v602_v53, %v4497_v17  ;;  %v604_v49 = vpop.f32.mrb[89].mxu0  ;;  %3163 = vmatmul.mubr.f32.gmra.mrb[194].mxu0 %v1230_v12  ;;  %3336 = vmatprep.subr.bf16.mxu1 %v3733_v18  ;;  %v1519_v12 = vld [vmem:[#allocation2 + $0x2e0] sm:$0xff]  ;;  %v1135_v57 = vadd.f32 %v4351_v30, %v4417_v54  ;;  %v1140_v55 = vadd.f32 %v4347_v22, %v4417_v54 }
 0x19a   :  { %v605_v23 = vadd.f32 %v604_v49, %v4502_v56  ;;  %1890 = vmatprep.mubr.f32.mxu1 %v1283_v43  ;;  %3165 = vmatprep.mubr.f32.mxu0 %v1237_v33  ;;  %v1272_v33 = vmax.f32 %v1090_v48, 0.0  ;;  %v1279_v37 = vmax.f32 %v1095_v26, 0.0  ;;  %v1105_v43 = vadd.f32 %v4319_v35, %v4417_v54 }
 0x19b   :  { %1891 = vmatmul.mubr.f32.gmra.mrb[54].mxu1 %v1282_v45  ;;  %v1289_v63 = vmax.f32 %v603_v47, 0.0  ;;  %v3346_v45 = vpack.c.bf16 %v1520_v28, %v1519_v12  ;;  %v1110_v35 = vadd.f32 %v4315_v2, %v4417_v54  ;;  %v1145_v30 = vadd.f32 %v4363_v13, %v4417_v54 }
 0x19c   :  { %v1290_v0 = vmax.f32 %v605_v23, 0.0  ;;  %v608_v51 = vpop.f32.mrb[90].mxu0  ;;  %3338 = vmatpush1.bf16.msra.mxu1 %v3337_v7  ;;  %v1522_v23 = vld [vmem:[#allocation2 + $0x2f8] sm:$0xff]  ;;  %v1293_v21 = vmax.f32 %v1105_v43, 0.0  ;;  %v1150_v22 = vadd.f32 %v4359_v39, %v4417_v54  ;;  %v1155_v13 = vadd.f32 %v4375_v52, %v4417_v54 }
 0x19d   :  { %v609_v15 = vadd.f32 %v608_v51, %v4497_v17  ;;  %v610_v29 = vpop.f32.mrb[91].mxu0  ;;  %3166 = vmatmul.mubr.f32.gmra.mrb[196].mxu0 %v1244_v20  ;;  %3339 = vmatprep.subr.bf16.mxu1 %v3733_v18  ;;  %v1286_v20 = vmax.f32 %v1100_v62, 0.0  ;;  %v3349_v51 = vpack.c.bf16 %v1522_v23, %v1521_v25  ;;  %v1300_v2 = vmax.f32 %v1110_v35, 0.0 }
 0x19e   :  { %v611_v10 = vadd.f32 %v610_v29, %v4502_v56  ;;  %1895 = vmatprep.mubr.f32.mxu1 %v1290_v0  ;;  %3168 = vmatprep.mubr.f32.mxu0 %v1251_v60  ;;  %v1115_v60 = vadd.f32 %v4329_v42, %v4417_v54  ;;  %v1160_v39 = vadd.f32 %v4371_v50, %v4417_v54 }
 0x19f   :  { %1896 = vmatmul.mubr.f32.gmra.mrb[56].mxu1 %v1289_v63  ;;  %v1296_v38 = vmax.f32 %v609_v15, 0.0  ;;  %v1165_v52 = vadd.f32 %v4386_v3, %v4417_v54  ;;  %v1170_v50 = vadd.f32 %v4382_v4, %v4417_v54  ;;  %v1175_v3 = vadd.f32 %v4397_v27, %v4417_v54 }
 0x1a0   :  { %v1297_v36 = vmax.f32 %v611_v10, 0.0  ;;  %v614_v6 = vpop.f32.mrb[92].mxu0  ;;  %3341 = vmatpush1.bf16.msra.mxu1 %v3340_v14  ;;  %v1307_v42 = vmax.f32 %v1115_v60, 0.0  ;;  %v1363_v60 = vmax.f32 %v1155_v13, 0.0  ;;  %v1180_v4 = vadd.f32 %v4393_v32, %v4417_v54 }
 0x1a1   :  { %v615_v40 = vadd.f32 %v614_v6, %v4497_v17  ;;  %v616_v61 = vpop.f32.mrb[93].mxu0  ;;  %3169 = vmatmul.mubr.f32.gmra.mrb[198].mxu0 %v1258_v16  ;;  %3342 = vmatprep.subr.bf16.mxu1 %v3733_v18  ;;  %v1321_v6 = vmax.f32 %v1125_v1, 0.0  ;;  %v1185_v27 = vadd.f32 %v4409_v44, %v4417_v54  ;;  %v1190_v32 = vadd.f32 %v4405_v41, %v4417_v54 }
 0x1a2   :  { %v617_v46 = vadd.f32 %v616_v61, %v4502_v56  ;;  %1900 = vmatprep.mubr.f32.mxu1 %v1297_v36  ;;  %3171 = vmatprep.mubr.f32.mxu0 %v1265_v19  ;;  %v1314_v36 = vmax.f32 %v1120_v24, 0.0  ;;  %v1195_v44 = vadd.f32 %v4421_v58, %v4417_v54 }
 0x1a3   :  { %1901 = vmatmul.mubr.f32.gmra.mrb[58].mxu1 %v1296_v38  ;;  %v1303_v47 = vmax.f32 %v615_v40, 0.0 }
 0x1a4   :  { %v1304_v53 = vmax.f32 %v617_v46, 0.0  ;;  %v620_v7 = vpop.f32.mrb[94].mxu0  ;;  %3344 = vmatpush1.bf16.msra.mxu1 %v3343_v5  ;;  %v1328_v46 = vmax.f32 %v1130_v31, 0.0 }
 0x1a5   :  { %v621_v49 = vadd.f32 %v620_v7, %v4497_v17  ;;  %v622_v34 = vpop.f32.mrb[95].mxu0  ;;  %3172 = vmatmul.mubr.f32.gmra.mrb[200].mxu0 %v1272_v33  ;;  %3345 = vmatprep.subr.bf16.mxu1 %v3733_v18  ;;  %v1335_v33 = vmax.f32 %v1135_v57, 0.0 }
 0x1a6   :  { %v623_v59 = vadd.f32 %v622_v34, %v4502_v56  ;;  %1905 = vmatprep.mubr.f32.mxu1 %v1304_v53  ;;  %3174 = vmatprep.mubr.f32.mxu0 %v1279_v37 }
 0x1a7   :  { %1906 = vmatmul.mubr.f32.gmra.mrb[60].mxu1 %v1303_v47  ;;  %v1310_v14 = vmax.f32 %v621_v49, 0.0  ;;  %v1342_v47 = vmax.f32 %v1140_v55, 0.0  ;;  %v1349_v49 = vmax.f32 %v1145_v30, 0.0  ;;  %v1412_v30 = vmax.f32 %v1190_v32, 0.0 }
 0x1a8   :  { %v1311_v9 = vmax.f32 %v623_v59, 0.0  ;;  %v626_v0 = vpop.f32.mrb[96].mxu0  ;;  %3347 = vmatpush1.bf16.msra.mxu1 %v3346_v45 }
 0x1a9   :  { %v627_v63 = vadd.f32 %v626_v0, %v4497_v17  ;;  %v628_v15 = vpop.f32.mrb[97].mxu0  ;;  %3175 = vmatmul.mubr.f32.gmra.mrb[202].mxu0 %v1286_v20  ;;  %3348 = vmatprep.subr.bf16.mxu1 %v3733_v18 }
 0x1aa   :  { %v629_v29 = vadd.f32 %v628_v15, %v4502_v56  ;;  %1910 = vmatprep.mubr.f32.mxu1 %v1311_v9  ;;  %3177 = vmatprep.mubr.f32.mxu0 %v1293_v21  ;;  %v1356_v21 = vmax.f32 %v1150_v22, 0.0 }
 0x1ab   :  { %1911 = vmatmul.mubr.f32.gmra.mrb[62].mxu1 %v1310_v14  ;;  %v1317_v48 = vmax.f32 %v627_v63, 0.0 }
 0x1ac   :  { %v1318_v10 = vmax.f32 %v629_v29, 0.0  ;;  %v632_v16 = vpop.f32.mrb[98].mxu0  ;;  %3350 = vmatpush1.bf16.msra.mxu1 %v3349_v51  ;;  %v1370_v29 = vmax.f32 %v1160_v39, 0.0 }
 0x1ad   :  { %v633_v19 = vadd.f32 %v632_v16, %v4497_v17  ;;  %v634_v18 = vpop.f32.mrb[99].mxu0  ;;  %3178 = vmatmul.mubr.f32.gmra.mrb[204].mxu0 %v1300_v2  ;;  %v1377_v2 = vmax.f32 %v1165_v52, 0.0 }
 0x1ae   :  { %v635_v26 = vadd.f32 %v634_v18, %v4502_v56  ;;  %1915 = vmatprep.mubr.f32.mxu1 %v1318_v10  ;;  %3180 = vmatprep.mubr.f32.mxu0 %v1307_v42  ;;  %v1391_v18 = vmax.f32 %v1175_v3, 0.0 }
 0x1af   :  { %1916 = vmatmul.mubr.f32.gmra.mrb[64].mxu1 %v1317_v48  ;;  %v1324_v40 = vmax.f32 %v633_v19, 0.0  ;;  %v1384_v19 = vmax.f32 %v1170_v50, 0.0 }
 0x1b0   :  { %v1325_v5 = vmax.f32 %v635_v26, 0.0  ;;  %v638_v38 = vpop.f32.mrb[100].mxu0 }
 0x1b1   :  { %v639_v61 = vadd.f32 %v638_v38, %v4497_v17  ;;  %v640_v12 = vpop.f32.mrb[101].mxu0  ;;  %3181 = vmatmul.mubr.f32.gmra.mrb[206].mxu0 %v1314_v36  ;;  %v1398_v38 = vmax.f32 %v1180_v4, 0.0 }
 0x1b2   :  { %v641_v28 = vadd.f32 %v640_v12, %v4502_v56  ;;  %1920 = vmatprep.mubr.f32.mxu1 %v1325_v5  ;;  %3183 = vmatprep.mubr.f32.mxu0 %v1321_v6 }
 0x1b3   :  { %1921 = vmatmul.mubr.f32.gmra.mrb[66].mxu1 %v1324_v40  ;;  %v1331_v43 = vmax.f32 %v639_v61, 0.0  ;;  %v1405_v40 = vmax.f32 %v1185_v27, 0.0 }
 0x1b4   :  { %v1332_v62 = vmax.f32 %v641_v28, 0.0  ;;  %v644_v37 = vpop.f32.mrb[102].mxu0 }
 0x1b5   :  { %v645_v53 = vadd.f32 %v644_v37, %v4497_v17  ;;  %v646_v7 = vpop.f32.mrb[103].mxu0  ;;  %3184 = vmatmul.mubr.f32.gmra.mrb[208].mxu0 %v1328_v46 }
 0x1b6   :  { %v647_v45 = vadd.f32 %v646_v7, %v4502_v56  ;;  %1925 = vmatprep.mubr.f32.mxu1 %v1332_v62  ;;  %3186 = vmatprep.mubr.f32.mxu0 %v1335_v33  ;;  %v1419_v62 = vmax.f32 %v1195_v44, 0.0  ;;  %v1426_v7 = vmax.f32 %v4424_v8, 0.0 }
 0x1b7   :  { %1926 = vmatmul.mubr.f32.gmra.mrb[68].mxu1 %v1331_v43  ;;  %v1338_v23 = vmax.f32 %v645_v53, 0.0 }
 0x1b8   :  { %v1339_v34 = vmax.f32 %v647_v45, 0.0  ;;  %v650_v25 = vpop.f32.mrb[104].mxu0 }
 0x1b9   :  { %v651_v59 = vadd.f32 %v650_v25, %v4497_v17  ;;  %v652_v20 = vpop.f32.mrb[105].mxu0  ;;  %3187 = vmatmul.mubr.f32.gmra.mrb[210].mxu0 %v1342_v47 }
 0x1ba   :  { %v653_v35 = vadd.f32 %v652_v20, %v4502_v56  ;;  %1930 = vmatprep.mubr.f32.mxu1 %v1339_v34  ;;  %3189 = vmatprep.mubr.f32.mxu0 %v1349_v49 }
 0x1bb   :  { %1931 = vmatmul.mubr.f32.gmra.mrb[70].mxu1 %v1338_v23  ;;  %v1345_v51 = vmax.f32 %v651_v59, 0.0 }
 0x1bc   :  { %v1346_v9 = vmax.f32 %v653_v35, 0.0  ;;  %v656_v0 = vpop.f32.mrb[106].mxu0 }
 0x1bd   :  { %v657_v14 = vadd.f32 %v656_v0, %v4497_v17  ;;  %v658_v63 = vpop.f32.mrb[107].mxu0  ;;  %3190 = vmatmul.mubr.f32.gmra.mrb[212].mxu0 %v1356_v21 }
 0x1be   :  { %v659_v15 = vadd.f32 %v658_v63, %v4502_v56  ;;  %1935 = vmatprep.mubr.f32.mxu1 %v1346_v9  ;;  %3192 = vmatprep.mubr.f32.mxu0 %v1363_v60 }
 0x1bf   :  { %1936 = vmatmul.mubr.f32.gmra.mrb[72].mxu1 %v1345_v51  ;;  %v1352_v1 = vmax.f32 %v657_v14, 0.0 }
 0x1c0   :  { %v1353_v24 = vmax.f32 %v659_v15, 0.0  ;;  %v662_v42 = vpop.f32.mrb[108].mxu0 }
 0x1c1   :  { %v663_v10 = vadd.f32 %v662_v42, %v4497_v17  ;;  %v664_v16 = vpop.f32.mrb[109].mxu0  ;;  %3193 = vmatmul.mubr.f32.gmra.mrb[214].mxu0 %v1370_v29 }
 0x1c2   :  { %v665_v48 = vadd.f32 %v664_v16, %v4502_v56  ;;  %1940 = vmatprep.mubr.f32.mxu1 %v1353_v24  ;;  %3195 = vmatprep.mubr.f32.mxu0 %v1377_v2 }
 0x1c3   :  { %1941 = vmatmul.mubr.f32.gmra.mrb[74].mxu1 %v1352_v1  ;;  %v1359_v31 = vmax.f32 %v663_v10, 0.0  ;;  %v93_v10 = vsub.s32 4, %v4191_v11 }
 0x1c4   :  { %v1360_v26 = vmax.f32 %v665_v48, 0.0  ;;  %v668_v36 = vpop.f32.mrb[110].mxu0  ;;  %v97_v48 = vsub.s32 5, %v4191_v11 }
 0x1c5   :  { %v669_v6 = vadd.f32 %v668_v36, %v4497_v17  ;;  %v670_v57 = vpop.f32.mrb[111].mxu0  ;;  %3196 = vmatmul.mubr.f32.gmra.mrb[216].mxu0 %v1384_v19  ;;  %v3704_v36 = vld [vmem:[%s5239_s2] sm:$0xff] }
 0x1c6   :  { %v671_v5 = vadd.f32 %v670_v57, %v4502_v56  ;;  %1945 = vmatprep.mubr.f32.mxu1 %v1360_v26  ;;  %3198 = vmatprep.mubr.f32.mxu0 %v1391_v18  ;;  %v4707_v57 = vrot.slane %v3704_v36, %v97_v48 }
 0x1c7   :  { %1946 = vmatmul.mubr.f32.gmra.mrb[76].mxu1 %v1359_v31  ;;  %v1366_v28 = vmax.f32 %v669_v6, 0.0  ;;  %v4704_v31 = vrot.slane %v3704_v36, %v93_v10 }
 0x1c8   :  { %v1367_v61 = vmax.f32 %v671_v5, 0.0  ;;  %v674_v12 = vpop.f32.mrb[112].mxu0 }
 0x1c9   :  { %v675_v46 = vadd.f32 %v674_v12, %v4497_v17  ;;  %v676_v55 = vpop.f32.mrb[113].mxu0  ;;  %3199 = vmatmul.mubr.f32.gmra.mrb[218].mxu0 %v1398_v38 }
 0x1ca   :  { %v677_v33 = vadd.f32 %v676_v55, %v4502_v56  ;;  %1950 = vmatprep.mubr.f32.mxu1 %v1367_v61  ;;  %3201 = vmatprep.mubr.f32.mxu0 %v1405_v40 }
 0x1cb   :  { %1951 = vmatmul.mubr.f32.gmra.mrb[78].mxu1 %v1366_v28  ;;  %v1373_v43 = vmax.f32 %v675_v46, 0.0 }
 0x1cc   :  { %v1374_v41 = vmax.f32 %v677_v33, 0.0  ;;  %v680_v37 = vpop.f32.mrb[114].mxu0 }
 0x1cd   :  { %v681_v53 = vadd.f32 %v680_v37, %v4497_v17  ;;  %v682_v54 = vpop.f32.mrb[115].mxu0  ;;  %3202 = vmatmul.mubr.f32.gmra.mrb[220].mxu0 %v1412_v30 }
 0x1ce   :  { %v683_v58 = vadd.f32 %v682_v54, %v4502_v56  ;;  %1955 = vmatprep.mubr.f32.mxu1 %v1374_v41  ;;  %3204 = vmatprep.mubr.f32.mxu0 %v1419_v62 }
 0x1cf   :  { %1956 = vmatmul.mubr.f32.gmra.mrb[80].mxu1 %v1373_v43  ;;  %v1380_v22 = vmax.f32 %v681_v53, 0.0 }
 0x1d0   :  { %v1381_v45 = vmax.f32 %v683_v58, 0.0  ;;  %v686_v47 = vpop.f32.mrb[116].mxu0 }
 0x1d1   :  { %v687_v49 = vadd.f32 %v686_v47, %v4497_v17  ;;  %v688_v13 = vpop.f32.mrb[117].mxu0  ;;  %3205 = vmatmul.mubr.f32.gmra.mrb[222].mxu0 %v1426_v7 }
 0x1d2   :  { %v689_v34 = vadd.f32 %v688_v13, %v4502_v56  ;;  %1960 = vmatprep.mubr.f32.mxu1 %v1381_v45 }
 0x1d3   :  { %1961 = vmatmul.mubr.f32.gmra.mrb[82].mxu1 %v1380_v22  ;;  %v1387_v59 = vmax.f32 %v687_v49, 0.0 }
 0x1d4   :  { %v1388_v25 = vmax.f32 %v689_v34, 0.0  ;;  %v692_v23 = vpop.f32.mrb[118].mxu0 }
 0x1d5   :  { %v693_v20 = vadd.f32 %v692_v23, %v4497_v17  ;;  %v694_v35 = vpop.f32.mrb[119].mxu0 }
 0x1d6   :  { %v695_v8 = vadd.f32 %v694_v35, %v4502_v56  ;;  %1965 = vmatprep.mubr.f32.mxu1 %v1388_v25 }
 0x1d7   :  { %1966 = vmatmul.mubr.f32.gmra.mrb[84].mxu1 %v1387_v59  ;;  %v1394_v60 = vmax.f32 %v693_v20, 0.0 }
 0x1d8   :  { %v1395_v21 = vmax.f32 %v695_v8, 0.0  ;;  %v698_v39 = vpop.f32.mrb[120].mxu0 }
 0x1d9   :  { %v699_v52 = vadd.f32 %v698_v39, %v4497_v17  ;;  %v700_v9 = vpop.f32.mrb[121].mxu0 }
 0x1da   :  { %v701_v0 = vadd.f32 %v700_v9, %v4502_v56  ;;  %1970 = vmatprep.mubr.f32.mxu1 %v1395_v21 }
 0x1db   :  { %1971 = vmatmul.mubr.f32.gmra.mrb[86].mxu1 %v1394_v60  ;;  %v1401_v63 = vmax.f32 %v699_v52, 0.0 }
 0x1dc   :  { %v1402_v51 = vmax.f32 %v701_v0, 0.0  ;;  %v704_v14 = vpop.f32.mrb[122].mxu0 }
 0x1dd   :  { %v705_v15 = vadd.f32 %v704_v14, %v4497_v17  ;;  %v706_v29 = vpop.f32.mrb[123].mxu0 }
 0x1de   :  { %v707_v50 = vadd.f32 %v706_v29, %v4502_v56  ;;  %1975 = vmatprep.mubr.f32.mxu1 %v1402_v51 }
 0x1df   :  { %1976 = vmatmul.mubr.f32.gmra.mrb[88].mxu1 %v1401_v63  ;;  %v1408_v24 = vmax.f32 %v705_v15, 0.0 }
 0x1e0   :  { %v1409_v2 = vmax.f32 %v707_v50, 0.0  ;;  %v710_v3 = vpop.f32.mrb[124].mxu0 }
 0x1e1   :  { %v711_v42 = vadd.f32 %v710_v3, %v4497_v17  ;;  %v712_v1 = vpop.f32.mrb[125].mxu0 }
 0x1e2   :  { %v713_v16 = vadd.f32 %v712_v1, %v4502_v56  ;;  %1980 = vmatprep.mubr.f32.mxu1 %v1409_v2 }
 0x1e3   :  { %1981 = vmatmul.mubr.f32.gmra.mrb[90].mxu1 %v1408_v24  ;;  %v1415_v18 = vmax.f32 %v711_v42, 0.0 }
 0x1e4   :  { %v1416_v19 = vmax.f32 %v713_v16, 0.0  ;;  %v716_v4 = vpop.f32.mrb[126].mxu0 }
 0x1e5   :  { %v717_v27 = vadd.f32 %v716_v4, %v4497_v17  ;;  %v718_v26 = vpop.f32.mrb[127].mxu0 }
 0x1e6   :  { %v719_v6 = vadd.f32 %v718_v26, %v4502_v56  ;;  %1985 = vmatprep.mubr.f32.mxu1 %v1416_v19 }
 0x1e7   :  { %1986 = vmatmul.mubr.f32.gmra.mrb[92].mxu1 %v1415_v18  ;;  %v1422_v38 = vmax.f32 %v717_v27, 0.0 }
 0x1e8   :  { %v1423_v11 = vmax.f32 %v719_v6, 0.0  ;;  %v787_v5 = vpop.f32.mrb[128].mxu0 }
 0x1e9   :  { %v788_v32 = vadd.f32 %v787_v5, %v4704_v31  ;;  %v789_v40 = vpop.f32.mrb[129].mxu0 }
 0x1ea   :  { %v790_v17 = vadd.f32 %v789_v40, %v4707_v57  ;;  %1990 = vmatprep.mubr.f32.mxu1 %v1423_v11 }
 0x1eb   :  { %1991 = vmatmul.mubr.f32.gmra.mrb[94].mxu1 %v1422_v38  ;;  %v1207_v12 = vmax.f32 %v788_v32, 0.0 }
 0x1ec   :  { %v1208_v44 = vmax.f32 %v790_v17, 0.0  ;;  %v793_v61 = vpop.f32.mrb[130].mxu0 }
 0x1ed   :  { %v794_v28 = vadd.f32 %v793_v61, %v4704_v31  ;;  %v795_v56 = vpop.f32.mrb[131].mxu0 }
 0x1ee   :  { %v796_v46 = vadd.f32 %v795_v56, %v4707_v57  ;;  %2060 = vmatprep.mubr.f32.mxu1 %v1208_v44 }
 0x1ef   :  { %2061 = vmatmul.mubr.f32.vlgmr.msra.gmra.mrb[32].mxu1 %v1207_v12  ;;  %v1214_v30 = vmax.f32 %v794_v28, 0.0 }
 0x1f0   :  { %v1215_v55 = vmax.f32 %v796_v46, 0.0  ;;  %v799_v33 = vpop.f32.mrb[132].mxu0 }
 0x1f1   :  { %v800_v62 = vadd.f32 %v799_v33, %v4704_v31  ;;  %v801_v41 = vpop.f32.mrb[133].mxu0 }
 0x1f2   :  { %v802_v37 = vadd.f32 %v801_v41, %v4707_v57  ;;  %2065 = vmatprep.mubr.f32.mxu1 %v1215_v55 }
 0x1f3   :  { %2066 = vmatmul.mubr.f32.gmra.mrb[34].mxu1 %v1214_v30  ;;  %v1221_v54 = vmax.f32 %v800_v62, 0.0 }
 0x1f4   :  { %v1222_v43 = vmax.f32 %v802_v37, 0.0  ;;  %v805_v53 = vpop.f32.mrb[134].mxu0 }
 0x1f5   :  { %v806_v58 = vadd.f32 %v805_v53, %v4704_v31  ;;  %v807_v7 = vpop.f32.mrb[135].mxu0 }
 0x1f6   :  { %v808_v45 = vadd.f32 %v807_v7, %v4707_v57  ;;  %2070 = vmatprep.mubr.f32.mxu1 %v1222_v43 }
 0x1f7   :  { %2071 = vmatmul.mubr.f32.gmra.mrb[36].mxu1 %v1221_v54  ;;  %v1228_v49 = vmax.f32 %v806_v58, 0.0 }
 0x1f8   :  { %v1229_v47 = vmax.f32 %v808_v45, 0.0  ;;  %v811_v22 = vpop.f32.mrb[136].mxu0 }
 0x1f9   :  { %v812_v13 = vadd.f32 %v811_v22, %v4704_v31  ;;  %v813_v34 = vpop.f32.mrb[137].mxu0 }
 0x1fa   :  { %v814_v25 = vadd.f32 %v813_v34, %v4707_v57  ;;  %2075 = vmatprep.mubr.f32.mxu1 %v1229_v47 }
 0x1fb   :  { %2076 = vmatmul.mubr.f32.gmra.mrb[38].mxu1 %v1228_v49  ;;  %v1235_v20 = vmax.f32 %v812_v13, 0.0 }
 0x1fc   :  { %v1236_v23 = vmax.f32 %v814_v25, 0.0  ;;  %v817_v59 = vpop.f32.mrb[138].mxu0 }
 0x1fd   :  { %v818_v35 = vadd.f32 %v817_v59, %v4704_v31  ;;  %v819_v8 = vpop.f32.mrb[139].mxu0 }
 0x1fe   :  { %v820_v21 = vadd.f32 %v819_v8, %v4707_v57  ;;  %2080 = vmatprep.mubr.f32.mxu1 %v1236_v23 }
 0x1ff   :  { %2081 = vmatmul.mubr.f32.gmra.mrb[40].mxu1 %v1235_v20  ;;  %v1242_v52 = vmax.f32 %v818_v35, 0.0 }
 0x200   :  { %v1243_v39 = vmax.f32 %v820_v21, 0.0  ;;  %v823_v60 = vpop.f32.mrb[140].mxu0 }
 0x201   :  { %v824_v9 = vadd.f32 %v823_v60, %v4704_v31  ;;  %v825_v0 = vpop.f32.mrb[141].mxu0 }
 0x202   :  { %v826_v51 = vadd.f32 %v825_v0, %v4707_v57  ;;  %2085 = vmatprep.mubr.f32.mxu1 %v1243_v39 }
 0x203   :  { %2086 = vmatmul.mubr.f32.gmra.mrb[42].mxu1 %v1242_v52  ;;  %v1249_v15 = vmax.f32 %v824_v9, 0.0 }
 0x204   :  { %v1250_v14 = vmax.f32 %v826_v51, 0.0  ;;  %v829_v63 = vpop.f32.mrb[142].mxu0 }
 0x205   :  { %v830_v29 = vadd.f32 %v829_v63, %v4704_v31  ;;  %v831_v50 = vpop.f32.mrb[143].mxu0 }
 0x206   :  { %v832_v2 = vadd.f32 %v831_v50, %v4707_v57  ;;  %2090 = vmatprep.mubr.f32.mxu1 %v1250_v14 }
 0x207   :  { %2091 = vmatmul.mubr.f32.gmra.mrb[44].mxu1 %v1249_v15  ;;  %v1256_v42 = vmax.f32 %v830_v29, 0.0 }
 0x208   :  { %v1257_v3 = vmax.f32 %v832_v2, 0.0  ;;  %v835_v24 = vpop.f32.mrb[144].mxu0 }
 0x209   :  { %v836_v1 = vadd.f32 %v835_v24, %v4704_v31  ;;  %v837_v10 = vpop.f32.mrb[145].mxu0 }
 0x20a   :  { %v838_v16 = vadd.f32 %v837_v10, %v4707_v57  ;;  %2095 = vmatprep.mubr.f32.mxu1 %v1257_v3 }
 0x20b   :  { %2096 = vmatmul.mubr.f32.gmra.mrb[46].mxu1 %v1256_v42  ;;  %v1263_v4 = vmax.f32 %v836_v1, 0.0 }
 0x20c   :  { %v1264_v48 = vmax.f32 %v838_v16, 0.0  ;;  %v841_v19 = vpop.f32.mrb[146].mxu0 }
 0x20d   :  { %v842_v18 = vadd.f32 %v841_v19, %v4704_v31  ;;  %v843_v27 = vpop.f32.mrb[147].mxu0 }
 0x20e   :  { %v844_v26 = vadd.f32 %v843_v27, %v4707_v57  ;;  %2100 = vmatprep.mubr.f32.mxu1 %v1264_v48 }
 0x20f   :  { %2101 = vmatmul.mubr.f32.gmra.mrb[48].mxu1 %v1263_v4  ;;  %v1270_v11 = vmax.f32 %v842_v18, 0.0 }
 0x210   :  { %v1271_v36 = vmax.f32 %v844_v26, 0.0  ;;  %v847_v6 = vpop.f32.mrb[148].mxu0 }
 0x211   :  { %v848_v5 = vadd.f32 %v847_v6, %v4704_v31  ;;  %v849_v38 = vpop.f32.mrb[149].mxu0 }
 0x212   :  { %v850_v32 = vadd.f32 %v849_v38, %v4707_v57  ;;  %2105 = vmatprep.mubr.f32.mxu1 %v1271_v36 }
 0x213   :  { %2106 = vmatmul.mubr.f32.gmra.mrb[50].mxu1 %v1270_v11  ;;  %v1277_v44 = vmax.f32 %v848_v5, 0.0 }
 0x214   :  { %v1278_v40 = vmax.f32 %v850_v32, 0.0  ;;  %v853_v17 = vpop.f32.mrb[150].mxu0 }
 0x215   :  { %v854_v61 = vadd.f32 %v853_v17, %v4704_v31  ;;  %v855_v12 = vpop.f32.mrb[151].mxu0 }
 0x216   :  { %v856_v28 = vadd.f32 %v855_v12, %v4707_v57  ;;  %2110 = vmatprep.mubr.f32.mxu1 %v1278_v40 }
 0x217   :  { %2111 = vmatmul.mubr.f32.gmra.mrb[52].mxu1 %v1277_v44  ;;  %v1284_v55 = vmax.f32 %v854_v61, 0.0 }
 0x218   :  { %v1285_v56 = vmax.f32 %v856_v28, 0.0  ;;  %v859_v46 = vpop.f32.mrb[152].mxu0 }
 0x219   :  { %v860_v33 = vadd.f32 %v859_v46, %v4704_v31  ;;  %v861_v30 = vpop.f32.mrb[153].mxu0 }
 0x21a   :  { %v862_v62 = vadd.f32 %v861_v30, %v4707_v57  ;;  %2115 = vmatprep.mubr.f32.mxu1 %v1285_v56 }
 0x21b   :  { %2116 = vmatmul.mubr.f32.gmra.mrb[54].mxu1 %v1284_v55  ;;  %v1291_v43 = vmax.f32 %v860_v33, 0.0 }
 0x21c   :  { %v1292_v41 = vmax.f32 %v862_v62, 0.0  ;;  %v865_v37 = vpop.f32.mrb[154].mxu0 }
 0x21d   :  { %v866_v53 = vadd.f32 %v865_v37, %v4704_v31  ;;  %v867_v54 = vpop.f32.mrb[155].mxu0 }
 0x21e   :  { %v868_v58 = vadd.f32 %v867_v54, %v4707_v57  ;;  %2120 = vmatprep.mubr.f32.mxu1 %v1292_v41 }
 0x21f   :  { %2121 = vmatmul.mubr.f32.gmra.mrb[56].mxu1 %v1291_v43  ;;  %v1298_v47 = vmax.f32 %v866_v53, 0.0 }
 0x220   :  { %v1299_v7 = vmax.f32 %v868_v58, 0.0  ;;  %v871_v45 = vpop.f32.mrb[156].mxu0 }
 0x221   :  { %v872_v22 = vadd.f32 %v871_v45, %v4704_v31  ;;  %v873_v49 = vpop.f32.mrb[157].mxu0 }
 0x222   :  { %v874_v13 = vadd.f32 %v873_v49, %v4707_v57  ;;  %2125 = vmatprep.mubr.f32.mxu1 %v1299_v7 }
 0x223   :  { %2126 = vmatmul.mubr.f32.gmra.mrb[58].mxu1 %v1298_v47  ;;  %v1305_v23 = vmax.f32 %v872_v22, 0.0 }
 0x224   :  { %v1306_v34 = vmax.f32 %v874_v13, 0.0  ;;  %v877_v25 = vpop.f32.mrb[158].mxu0 }
 0x225   :  { %v878_v59 = vadd.f32 %v877_v25, %v4704_v31  ;;  %v879_v20 = vpop.f32.mrb[159].mxu0 }
 0x226   :  { %v880_v35 = vadd.f32 %v879_v20, %v4707_v57  ;;  %2130 = vmatprep.mubr.f32.mxu1 %v1306_v34 }
 0x227   :  { %2131 = vmatmul.mubr.f32.gmra.mrb[60].mxu1 %v1305_v23  ;;  %v1312_v39 = vmax.f32 %v878_v59, 0.0 }
 0x228   :  { %v1313_v8 = vmax.f32 %v880_v35, 0.0  ;;  %v883_v21 = vpop.f32.mrb[160].mxu0 }
 0x229   :  { %v884_v60 = vadd.f32 %v883_v21, %v4704_v31  ;;  %v885_v52 = vpop.f32.mrb[161].mxu0 }
 0x22a   :  { %v886_v9 = vadd.f32 %v885_v52, %v4707_v57  ;;  %2135 = vmatprep.mubr.f32.mxu1 %v1313_v8 }
 0x22b   :  { %2136 = vmatmul.mubr.f32.gmra.mrb[62].mxu1 %v1312_v39  ;;  %v1319_v14 = vmax.f32 %v884_v60, 0.0 }
 0x22c   :  { %v1320_v0 = vmax.f32 %v886_v9, 0.0  ;;  %v889_v51 = vpop.f32.mrb[162].mxu0 }
 0x22d   :  { %v890_v63 = vadd.f32 %v889_v51, %v4704_v31  ;;  %v891_v15 = vpop.f32.mrb[163].mxu0 }
 0x22e   :  { %v892_v29 = vadd.f32 %v891_v15, %v4707_v57  ;;  %2140 = vmatprep.mubr.f32.mxu1 %v1320_v0 }
 0x22f   :  { %2141 = vmatmul.mubr.f32.gmra.mrb[64].mxu1 %v1319_v14  ;;  %v1326_v3 = vmax.f32 %v890_v63, 0.0 }
 0x230   :  { %v1327_v50 = vmax.f32 %v892_v29, 0.0  ;;  %v895_v2 = vpop.f32.mrb[164].mxu0 }
 0x231   :  { %v896_v24 = vadd.f32 %v895_v2, %v4704_v31  ;;  %v897_v42 = vpop.f32.mrb[165].mxu0 }
 0x232   :  { %v898_v1 = vadd.f32 %v897_v42, %v4707_v57  ;;  %2145 = vmatprep.mubr.f32.mxu1 %v1327_v50 }
 0x233   :  { %2146 = vmatmul.mubr.f32.gmra.mrb[66].mxu1 %v1326_v3  ;;  %v1333_v48 = vmax.f32 %v896_v24, 0.0 }
 0x234   :  { %v1334_v10 = vmax.f32 %v898_v1, 0.0  ;;  %v901_v16 = vpop.f32.mrb[166].mxu0 }
 0x235   :  { %v902_v19 = vadd.f32 %v901_v16, %v4704_v31  ;;  %v903_v4 = vpop.f32.mrb[167].mxu0 }
 0x236   :  { %v904_v18 = vadd.f32 %v903_v4, %v4707_v57  ;;  %2150 = vmatprep.mubr.f32.mxu1 %v1334_v10 }
 0x237   :  { %2151 = vmatmul.mubr.f32.gmra.mrb[68].mxu1 %v1333_v48  ;;  %v1340_v36 = vmax.f32 %v902_v19, 0.0 }
 0x238   :  { %v1341_v27 = vmax.f32 %v904_v18, 0.0  ;;  %v907_v26 = vpop.f32.mrb[168].mxu0 }
 0x239   :  { %v908_v6 = vadd.f32 %v907_v26, %v4704_v31  ;;  %v909_v11 = vpop.f32.mrb[169].mxu0 }
 0x23a   :  { %v910_v5 = vadd.f32 %v909_v11, %v4707_v57  ;;  %2155 = vmatprep.mubr.f32.mxu1 %v1341_v27 }
 0x23b   :  { %2156 = vmatmul.mubr.f32.gmra.mrb[70].mxu1 %v1340_v36  ;;  %v1347_v40 = vmax.f32 %v908_v6, 0.0 }
 0x23c   :  { %v1348_v38 = vmax.f32 %v910_v5, 0.0  ;;  %v913_v32 = vpop.f32.mrb[170].mxu0 }
 0x23d   :  { %v914_v17 = vadd.f32 %v913_v32, %v4704_v31  ;;  %v915_v44 = vpop.f32.mrb[171].mxu0 }
 0x23e   :  { %v916_v61 = vadd.f32 %v915_v44, %v4707_v57  ;;  %2160 = vmatprep.mubr.f32.mxu1 %v1348_v38 }
 0x23f   :  { %2161 = vmatmul.mubr.f32.gmra.mrb[72].mxu1 %v1347_v40  ;;  %v1354_v56 = vmax.f32 %v914_v17, 0.0 }
 0x240   :  { %v1355_v12 = vmax.f32 %v916_v61, 0.0  ;;  %v919_v28 = vpop.f32.mrb[172].mxu0 }
 0x241   :  { %v920_v46 = vadd.f32 %v919_v28, %v4704_v31  ;;  %v921_v55 = vpop.f32.mrb[173].mxu0 }
 0x242   :  { %v922_v33 = vadd.f32 %v921_v55, %v4707_v57  ;;  %2165 = vmatprep.mubr.f32.mxu1 %v1355_v12 }
 0x243   :  { %2166 = vmatmul.mubr.f32.gmra.mrb[74].mxu1 %v1354_v56  ;;  %v1361_v41 = vmax.f32 %v920_v46, 0.0 }
 0x244   :  { %v1362_v30 = vmax.f32 %v922_v33, 0.0  ;;  %v925_v62 = vpop.f32.mrb[174].mxu0 }
 0x245   :  { %v926_v37 = vadd.f32 %v925_v62, %v4704_v31  ;;  %v927_v43 = vpop.f32.mrb[175].mxu0 }
 0x246   :  { %v928_v53 = vadd.f32 %v927_v43, %v4707_v57  ;;  %2170 = vmatprep.mubr.f32.mxu1 %v1362_v30 }
 0x247   :  { %2171 = vmatmul.mubr.f32.gmra.mrb[76].mxu1 %v1361_v41  ;;  %v1368_v7 = vmax.f32 %v926_v37, 0.0 }
 0x248   :  { %v1369_v54 = vmax.f32 %v928_v53, 0.0  ;;  %v931_v58 = vpop.f32.mrb[176].mxu0 }
 0x249   :  { %v932_v45 = vadd.f32 %v931_v58, %v4704_v31  ;;  %v933_v47 = vpop.f32.mrb[177].mxu0 }
 0x24a   :  { %v934_v22 = vadd.f32 %v933_v47, %v4707_v57  ;;  %2175 = vmatprep.mubr.f32.mxu1 %v1369_v54 }
 0x24b   :  { %2176 = vmatmul.mubr.f32.gmra.mrb[78].mxu1 %v1368_v7  ;;  %v1375_v34 = vmax.f32 %v932_v45, 0.0 }
 0x24c   :  { %v1376_v49 = vmax.f32 %v934_v22, 0.0  ;;  %v937_v13 = vpop.f32.mrb[178].mxu0 }
 0x24d   :  { %v938_v25 = vadd.f32 %v937_v13, %v4704_v31  ;;  %v939_v23 = vpop.f32.mrb[179].mxu0 }
 0x24e   :  { %v940_v59 = vadd.f32 %v939_v23, %v4707_v57  ;;  %2180 = vmatprep.mubr.f32.mxu1 %v1376_v49 }
 0x24f   :  { %2181 = vmatmul.mubr.f32.gmra.mrb[80].mxu1 %v1375_v34  ;;  %v1382_v8 = vmax.f32 %v938_v25, 0.0 }
 0x250   :  { %v1383_v20 = vmax.f32 %v940_v59, 0.0  ;;  %v943_v35 = vpop.f32.mrb[180].mxu0 }
 0x251   :  { %v944_v21 = vadd.f32 %v943_v35, %v4704_v31  ;;  %v945_v39 = vpop.f32.mrb[181].mxu0 }
 0x252   :  { %v946_v60 = vadd.f32 %v945_v39, %v4707_v57  ;;  %2185 = vmatprep.mubr.f32.mxu1 %v1383_v20 }
 0x253   :  { %2186 = vmatmul.mubr.f32.gmra.mrb[82].mxu1 %v1382_v8  ;;  %v1389_v0 = vmax.f32 %v944_v21, 0.0 }
 0x254   :  { %v1390_v52 = vmax.f32 %v946_v60, 0.0  ;;  %v949_v9 = vpop.f32.mrb[182].mxu0 }
 0x255   :  { %v950_v51 = vadd.f32 %v949_v9, %v4704_v31  ;;  %v951_v14 = vpop.f32.mrb[183].mxu0 }
 0x256   :  { %v952_v63 = vadd.f32 %v951_v14, %v4707_v57  ;;  %2190 = vmatprep.mubr.f32.mxu1 %v1390_v52  ;;  %v4826_v52 = vld [vmem:[%s5241_s4] ss:$0 sm:$0xff] }
 0x257   :  { %2191 = vmatmul.mubr.f32.gmra.mrb[84].mxu1 %v1389_v0  ;;  %v1396_v50 = vmax.f32 %v950_v51, 0.0 }
 0x258   :  { %v1397_v15 = vmax.f32 %v952_v63, 0.0  ;;  %v955_v29 = vpop.f32.mrb[184].mxu0 }
 0x259   :  { %v956_v2 = vadd.f32 %v955_v29, %v4704_v31  ;;  %v957_v3 = vpop.f32.mrb[185].mxu0 }
 0x25a   :  { %v958_v24 = vadd.f32 %v957_v3, %v4707_v57  ;;  %2195 = vmatprep.mubr.f32.mxu1 %v1397_v15 }
 0x25b   :  { %2196 = vmatmul.mubr.f32.gmra.mrb[86].mxu1 %v1396_v50  ;;  %v1403_v10 = vmax.f32 %v956_v2, 0.0 }
 0x25c   :  { %v1404_v42 = vmax.f32 %v958_v24, 0.0  ;;  %v961_v1 = vpop.f32.mrb[186].mxu0 }
 0x25d   :  { %v962_v16 = vadd.f32 %v961_v1, %v4704_v31  ;;  %v963_v48 = vpop.f32.mrb[187].mxu0 }
 0x25e   :  { %v964_v19 = vadd.f32 %v963_v48, %v4707_v57  ;;  %2200 = vmatprep.mubr.f32.mxu1 %v1404_v42 }
 0x25f   :  { %2201 = vmatmul.mubr.f32.gmra.mrb[88].mxu1 %v1403_v10  ;;  %v1410_v27 = vmax.f32 %v962_v16, 0.0 }
 0x260   :  { %v1411_v4 = vmax.f32 %v964_v19, 0.0  ;;  %v967_v18 = vpop.f32.mrb[188].mxu0 }
 0x261   :  { %v968_v26 = vadd.f32 %v967_v18, %v4704_v31  ;;  %v969_v36 = vpop.f32.mrb[189].mxu0 }
 0x262   :  { %v970_v6 = vadd.f32 %v969_v36, %v4707_v57  ;;  %2205 = vmatprep.mubr.f32.mxu1 %v1411_v4 }
 0x263   :  { %2206 = vmatmul.mubr.f32.gmra.mrb[90].mxu1 %v1410_v27  ;;  %v1417_v38 = vmax.f32 %v968_v26, 0.0 }
 0x264   :  { %v1418_v11 = vmax.f32 %v970_v6, 0.0  ;;  %v973_v5 = vpop.f32.mrb[190].mxu0 }
 0x265   :  { %v974_v32 = vadd.f32 %v973_v5, %v4704_v31  ;;  %v975_v40 = vpop.f32.mrb[191].mxu0 }
 0x266   :  { %v976_v17 = vadd.f32 %v975_v40, %v4707_v57  ;;  %2210 = vmatprep.mubr.f32.mxu1 %v1418_v11 }
 0x267   :  { %2211 = vmatmul.mubr.f32.gmra.mrb[92].mxu1 %v1417_v38  ;;  %v1424_v12 = vmax.f32 %v974_v32, 0.0 }
 0x268   :  { %v1425_v44 = vmax.f32 %v976_v17, 0.0  ;;  %v3161_v61 = vpop.f32.mrb[192].mxu0 }
 0x269   :  { %v2287_v28 = vpop.f32.mrb[193].mxu0 }
 0x26a   :  { %2215 = vmatprep.mubr.f32.mxu1 %v1425_v44 }
 0x26b   :  { %2216 = vmatmul.mubr.f32.gmra.mrb[94].mxu1 %v1424_v12 }
 0x26c   :  { %v3164_v56 = vpop.f32.mrb[194].mxu0 }
 0x26d   :  { %v2297_v46 = vpop.f32.mrb[195].mxu0 }
 0x270   :  { %v3167_v55 = vpop.f32.mrb[196].mxu0 }
 0x271   :  { %v2307_v33 = vpop.f32.mrb[197].mxu0 }
 0x274   :  { %v4773_v30 = vpop.f32.mrb[198].mxu0 }
 0x275   :  { %v2317_v62 = vpop.f32.mrb[199].mxu0 }
 0x278   :  { %v4775_v41 = vpop.f32.mrb[200].mxu0 }
 0x279   :  { %v4777_v31 = vpop.f32.mrb[201].mxu0 }
 0x27c   :  { %v4779_v57 = vpop.f32.mrb[202].mxu0 }
 0x27d   :  { %v4781_v37 = vpop.f32.mrb[203].mxu0 }
 0x280   :  { %v4783_v43 = vpop.f32.mrb[204].mxu0 }
 0x281   :  { %v4785_v53 = vpop.f32.mrb[205].mxu0 }
 0x284   :  { %v4787_v54 = vpop.f32.mrb[206].mxu0 }
 0x285   :  { %v4789_v58 = vpop.f32.mrb[207].mxu0 }
 0x288   :  { %v4791_v7 = vpop.f32.mrb[208].mxu0 }
 0x289   :  { %v4793_v45 = vpop.f32.mrb[209].mxu0 }
 0x28c   :  { %v4795_v47 = vpop.f32.mrb[210].mxu0 }
 0x28d   :  { %v4797_v22 = vpop.f32.mrb[211].mxu0 }
 0x290   :  { %v4799_v49 = vpop.f32.mrb[212].mxu0 }
 0x291   :  { %v4801_v13 = vpop.f32.mrb[213].mxu0 }
 0x294   :  { %v4803_v34 = vpop.f32.mrb[214].mxu0 }
 0x295   :  { %v4805_v25 = vpop.f32.mrb[215].mxu0 }
 0x298   :  { %v4807_v23 = vpop.f32.mrb[216].mxu0 }
 0x299   :  { %v4809_v59 = vpop.f32.mrb[217].mxu0 }
 0x29c   :  { %v4811_v20 = vpop.f32.mrb[218].mxu0 }
 0x29d   :  { %v4813_v35 = vpop.f32.mrb[219].mxu0 }
 0x2a0   :  { %v4815_v8 = vpop.f32.mrb[220].mxu0 }
 0x2a1   :  { %v4817_v21 = vpop.f32.mrb[221].mxu0 }
 0x2a4   :  { %v4819_v39 = vpop.f32.mrb[222].mxu0 }
 0x2a5   :  { %v4821_v60 = vpop.f32.mrb[223].mxu0 }
 0x2c2   :  { %v2062_v9 = vpop.f32.mrb[32].mxu1 }
 0x2c3   :  { %v3383_v0 = vadd.f32 %v4826_v52, %v2062_v9  ;;  %v2064_v51 = vpop.f32.mrb[33].mxu1 }
 0x2c5   :  { %v4829_v14 = vadd.f32 %v3383_v0, %v2287_v28 }
 0x2c6   :  { %v2067_v63 = vpop.f32.mrb[34].mxu1 }
 0x2c7   :  { %v3384_v15 = vadd.f32 %v4826_v52, %v2067_v63  ;;  %v2069_v29 = vpop.f32.mrb[35].mxu1  ;;  %2446 = vmax.xlane.f32.xlu0 %v4829_v14 }
 0x2c9   :  { %v4833_v50 = vadd.f32 %v3384_v15, %v3161_v61 }
 0x2ca   :  { %v2072_v2 = vpop.f32.mrb[36].mxu1 }
 0x2cb   :  { %v3385_v3 = vadd.f32 %v4826_v52, %v2072_v2  ;;  %v2074_v24 = vpop.f32.mrb[37].mxu1  ;;  %2448 = vmax.xlane.f32.xlu0 %v4833_v50 }
 0x2cd   :  { %v4837_v42 = vadd.f32 %v3385_v3, %v2297_v46 }
 0x2ce   :  { %v2077_v1 = vpop.f32.mrb[38].mxu1 }
 0x2cf   :  { %v3386_v10 = vadd.f32 %v4826_v52, %v2077_v1  ;;  %v2079_v16 = vpop.f32.mrb[39].mxu1  ;;  %2450 = vmax.xlane.f32.xlu1 %v4837_v42 }
 0x2d1   :  { %v4841_v48 = vadd.f32 %v3386_v10, %v3164_v56 }
 0x2d2   :  { %v2082_v19 = vpop.f32.mrb[40].mxu1 }
 0x2d3   :  { %v3387_v4 = vadd.f32 %v4826_v52, %v2082_v19  ;;  %v2084_v18 = vpop.f32.mrb[41].mxu1  ;;  %2452 = vmax.xlane.f32.xlu1 %v4841_v48 }
 0x2d5   :  { %v4845_v27 = vadd.f32 %v3387_v4, %v2307_v33 }
 0x2d6   :  { %v2087_v26 = vpop.f32.mrb[42].mxu1 }
 0x2d7   :  { %v3388_v36 = vadd.f32 %v4826_v52, %v2087_v26  ;;  %v2089_v6 = vpop.f32.mrb[43].mxu1  ;;  %2454 = vmax.xlane.f32.xlu0 %v4845_v27 }
 0x2d9   :  { %v4849_v11 = vadd.f32 %v3388_v36, %v3167_v55 }
 0x2da   :  { %v2092_v5 = vpop.f32.mrb[44].mxu1 }
 0x2db   :  { %v3389_v38 = vadd.f32 %v4826_v52, %v2092_v5  ;;  %v2094_v32 = vpop.f32.mrb[45].mxu1  ;;  %2456 = vmax.xlane.f32.xlu1 %v4849_v11 }
 0x2dd   :  { %v4853_v40 = vadd.f32 %v3389_v38, %v2317_v62 }
 0x2de   :  { %v2097_v17 = vpop.f32.mrb[46].mxu1 }
 0x2df   :  { %v3390_v44 = vadd.f32 %v4826_v52, %v2097_v17  ;;  %v2099_v61 = vpop.f32.mrb[47].mxu1  ;;  %2458 = vmax.xlane.f32.xlu0 %v4853_v40 }
 0x2e1   :  { %v4858_v12 = vadd.f32 %v3390_v44, %v4773_v30 }
 0x2e2   :  { %v2102_v28 = vpop.f32.mrb[48].mxu1 }
 0x2e3   :  { %v3391_v56 = vadd.f32 %v4826_v52, %v2102_v28  ;;  %v2104_v46 = vpop.f32.mrb[49].mxu1  ;;  %2460 = vmax.xlane.f32.xlu1 %v4858_v12 }
 0x2e5   :  { %v4863_v55 = vadd.f32 %v3391_v56, %v4777_v31 }
 0x2e6   :  { %v2107_v33 = vpop.f32.mrb[50].mxu1 }
 0x2e7   :  { %v3392_v62 = vadd.f32 %v4826_v52, %v2107_v33  ;;  %v2109_v9 = vpop.f32.mrb[51].mxu1  ;;  %2462 = vmax.xlane.f32.xlu0 %v4863_v55 }
 0x2e9   :  { %v4868_v0 = vadd.f32 %v3392_v62, %v4775_v41 }
 0x2ea   :  { %v2112_v30 = vpop.f32.mrb[52].mxu1 }
 0x2eb   :  { %v3393_v51 = vadd.f32 %v4826_v52, %v2112_v30  ;;  %v2114_v63 = vpop.f32.mrb[53].mxu1  ;;  %2464 = vmax.xlane.f32.xlu1 %v4868_v0 }
 0x2ed   :  { %v4873_v15 = vadd.f32 %v3393_v51, %v4781_v37 }
 0x2ee   :  { %v2117_v31 = vpop.f32.mrb[54].mxu1 }
 0x2ef   :  { %v3394_v29 = vadd.f32 %v4826_v52, %v2117_v31  ;;  %v2119_v2 = vpop.f32.mrb[55].mxu1  ;;  %2466 = vmax.xlane.f32.xlu0 %v4873_v15 }
 0x2f1   :  { %v4878_v3 = vadd.f32 %v3394_v29, %v4779_v57 }
 0x2f2   :  { %v2122_v41 = vpop.f32.mrb[56].mxu1 }
 0x2f3   :  { %v3395_v24 = vadd.f32 %v4826_v52, %v2122_v41  ;;  %v2124_v1 = vpop.f32.mrb[57].mxu1  ;;  %2468 = vmax.xlane.f32.xlu1 %v4878_v3 }
 0x2f5   :  { %v4883_v10 = vadd.f32 %v3395_v24, %v4785_v53 }
 0x2f6   :  { %v2127_v37 = vpop.f32.mrb[58].mxu1 }
 0x2f7   :  { %v3396_v16 = vadd.f32 %v4826_v52, %v2127_v37  ;;  %v2129_v19 = vpop.f32.mrb[59].mxu1  ;;  %2470 = vmax.xlane.f32.xlu0 %v4883_v10 }
 0x2f9   :  { %v4888_v4 = vadd.f32 %v3396_v16, %v4783_v43 }
 0x2fa   :  { %v2132_v57 = vpop.f32.mrb[60].mxu1 }
 0x2fb   :  { %v3397_v18 = vadd.f32 %v4826_v52, %v2132_v57  ;;  %v2134_v26 = vpop.f32.mrb[61].mxu1  ;;  %2472 = vmax.xlane.f32.xlu1 %v4888_v4 }
 0x2fd   :  { %v4893_v36 = vadd.f32 %v3397_v18, %v4789_v58 }
 0x2fe   :  { %v2137_v53 = vpop.f32.mrb[62].mxu1 }
 0x2ff   :  { %v3398_v6 = vadd.f32 %v4826_v52, %v2137_v53  ;;  %v2139_v5 = vpop.f32.mrb[63].mxu1  ;;  %2474 = vmax.xlane.f32.xlu0 %v4893_v36 }
 0x301   :  { %v4898_v38 = vadd.f32 %v3398_v6, %v4787_v54 }
 0x302   :  { %v2142_v43 = vpop.f32.mrb[64].mxu1 }
 0x303   :  { %v3399_v32 = vadd.f32 %v4826_v52, %v2142_v43  ;;  %v2144_v17 = vpop.f32.mrb[65].mxu1  ;;  %2476 = vmax.xlane.f32.xlu1 %v4898_v38 }
 0x305   :  { %v4903_v44 = vadd.f32 %v3399_v32, %v4793_v45 }
 0x306   :  { %v2147_v58 = vpop.f32.mrb[66].mxu1 }
 0x307   :  { %v3400_v61 = vadd.f32 %v4826_v52, %v2147_v58  ;;  %v2149_v28 = vpop.f32.mrb[67].mxu1  ;;  %2478 = vmax.xlane.f32.xlu0 %v4903_v44 }
 0x309   :  { %v4908_v56 = vadd.f32 %v3400_v61, %v4791_v7 }
 0x30a   :  { %v2152_v54 = vpop.f32.mrb[68].mxu1 }
 0x30b   :  { %v3401_v46 = vadd.f32 %v4826_v52, %v2152_v54  ;;  %v2154_v33 = vpop.f32.mrb[69].mxu1  ;;  %2480 = vmax.xlane.f32.xlu1 %v4908_v56 }
 0x30d   :  { %v4913_v62 = vadd.f32 %v3401_v46, %v4797_v22 }
 0x30e   :  { %v2157_v45 = vpop.f32.mrb[70].mxu1 }
 0x30f   :  { %v3402_v9 = vadd.f32 %v4826_v52, %v2157_v45  ;;  %v2159_v30 = vpop.f32.mrb[71].mxu1  ;;  %2482 = vmax.xlane.f32.xlu0 %v4913_v62 }
 0x311   :  { %v4918_v51 = vadd.f32 %v3402_v9, %v4795_v47 }
 0x312   :  { %v2162_v7 = vpop.f32.mrb[72].mxu1 }
 0x313   :  { %v3403_v63 = vadd.f32 %v4826_v52, %v2162_v7  ;;  %v2164_v31 = vpop.f32.mrb[73].mxu1  ;;  %2484 = vmax.xlane.f32.xlu1 %v4918_v51 }
 0x315   :  { %v4923_v29 = vadd.f32 %v3403_v63, %v4801_v13 }
 0x316   :  { %v2167_v22 = vpop.f32.mrb[74].mxu1 }
 0x317   :  { %v3404_v2 = vadd.f32 %v4826_v52, %v2167_v22  ;;  %v2169_v41 = vpop.f32.mrb[75].mxu1  ;;  %2486 = vmax.xlane.f32.xlu0 %v4923_v29 }
 0x319   :  { %v4928_v24 = vadd.f32 %v3404_v2, %v4799_v49 }
 0x31a   :  { %v2172_v47 = vpop.f32.mrb[76].mxu1 }
 0x31b   :  { %v3405_v1 = vadd.f32 %v4826_v52, %v2172_v47  ;;  %v2174_v37 = vpop.f32.mrb[77].mxu1  ;;  %2488 = vmax.xlane.f32.xlu1 %v4928_v24 }
 0x31d   :  { %v4933_v16 = vadd.f32 %v3405_v1, %v4805_v25 }
 0x31e   :  { %v2177_v13 = vpop.f32.mrb[78].mxu1 }
 0x31f   :  { %v3406_v19 = vadd.f32 %v4826_v52, %v2177_v13  ;;  %v2179_v57 = vpop.f32.mrb[79].mxu1  ;;  %2490 = vmax.xlane.f32.xlu0 %v4933_v16 }
 0x321   :  { %v4938_v18 = vadd.f32 %v3406_v19, %v4803_v34 }
 0x322   :  { %v2182_v49 = vpop.f32.mrb[80].mxu1 }
 0x323   :  { %v3407_v26 = vadd.f32 %v4826_v52, %v2182_v49  ;;  %v2184_v53 = vpop.f32.mrb[81].mxu1  ;;  %2492 = vmax.xlane.f32.xlu1 %v4938_v18 }
 0x325   :  { %v4943_v6 = vadd.f32 %v3407_v26, %v4809_v59 }
 0x326   :  { %v2187_v25 = vpop.f32.mrb[82].mxu1 }
 0x327   :  { %v3408_v5 = vadd.f32 %v4826_v52, %v2187_v25  ;;  %v2189_v43 = vpop.f32.mrb[83].mxu1  ;;  %2494 = vmax.xlane.f32.xlu0 %v4943_v6 }
 0x329   :  { %v4948_v32 = vadd.f32 %v3408_v5, %v4807_v23 }
 0x32a   :  { %v2192_v34 = vpop.f32.mrb[84].mxu1 }
 0x32b   :  { %v3409_v17 = vadd.f32 %v4826_v52, %v2192_v34  ;;  %v2194_v58 = vpop.f32.mrb[85].mxu1  ;;  %2496 = vmax.xlane.f32.xlu1 %v4948_v32 }
 0x32d   :  { %v4953_v61 = vadd.f32 %v3409_v17, %v4813_v35 }
 0x32e   :  { %v2197_v59 = vpop.f32.mrb[86].mxu1 }
 0x32f   :  { %v3410_v28 = vadd.f32 %v4826_v52, %v2197_v59  ;;  %v2199_v54 = vpop.f32.mrb[87].mxu1  ;;  %2498 = vmax.xlane.f32.xlu0 %v4953_v61 }
 0x331   :  { %v4958_v46 = vadd.f32 %v3410_v28, %v4811_v20 }
 0x332   :  { %v2202_v23 = vpop.f32.mrb[88].mxu1 }
 0x333   :  { %v3411_v33 = vadd.f32 %v4826_v52, %v2202_v23  ;;  %v2204_v45 = vpop.f32.mrb[89].mxu1  ;;  %2500 = vmax.xlane.f32.xlu1 %v4958_v46 }
 0x335   :  { %v4963_v9 = vadd.f32 %v3411_v33, %v4817_v21 }
 0x336   :  { %v2207_v35 = vpop.f32.mrb[90].mxu1 }
 0x337   :  { %v3412_v30 = vadd.f32 %v4826_v52, %v2207_v35  ;;  %v2209_v7 = vpop.f32.mrb[91].mxu1  ;;  %2502 = vmax.xlane.f32.xlu0 %v4963_v9 }
 0x339   :  { %v4968_v63 = vadd.f32 %v3412_v30, %v4815_v8 }
 0x33a   :  { %v2212_v20 = vpop.f32.mrb[92].mxu1 }
 0x33b   :  { %v3413_v31 = vadd.f32 %v4826_v52, %v2212_v20  ;;  %v2214_v22 = vpop.f32.mrb[93].mxu1  ;;  %2504 = vmax.xlane.f32.xlu1 %v4968_v63 }
 0x33d   :  { %v4973_v2 = vadd.f32 %v3413_v31, %v4821_v60 }
 0x33e   :  { %v2217_v21 = vpop.f32.mrb[94].mxu1 }
 0x33f   :  { %v3414_v41 = vadd.f32 %v4826_v52, %v2217_v21  ;;  %v2219_v47 = vpop.f32.mrb[95].mxu1  ;;  %2506 = vmax.xlane.f32.xlu0 %v4973_v2 }
 0x341   :  { %v4978_v1 = vadd.f32 %v3414_v41, %v4819_v39 }
 0x343   :  { %2508 = vmax.xlane.f32.xlu1 %v4978_v1 }
 0x354   :  { %v2447_v8 = vpop.xlane.xlu0 %2446 }
 0x355   :  { %v2510_v37 = vsub.f32 %v4829_v14, %v2447_v8 }
 0x357   :  { %v2542_v13 = vmul.f32 1.442695, %v2510_v37 }
 0x358   :  { %v2449_v19 = vpop.xlane.xlu0 %2448 }
 0x359   :  { %3548 = vpow2.f32 %v2542_v13  ;;  %v2511_v60 = vsub.f32 %v4833_v50, %v2449_v19 }
 0x35b   :  { %v2544_v57 = vmul.f32 1.442695, %v2511_v60 }
 0x35c   :  { %v2451_v49 = vpop.xlane.xlu1 %2450 }
 0x35d   :  { %3550 = vpow2.f32 %v2544_v57  ;;  %v2512_v52 = vsub.f32 %v4837_v42, %v2451_v49 }
 0x35f   :  { %v2546_v26 = vmul.f32 1.442695, %v2512_v52 }
 0x360   :  { %v2453_v53 = vpop.xlane.xlu1 %2452 }
 0x361   :  { %3552 = vpow2.f32 %v2546_v26  ;;  %v2513_v39 = vsub.f32 %v4841_v48, %v2453_v53 }
 0x363   :  { %v4985_v25 = vpop.eup %3548  ;;  %v2548_v5 = vmul.f32 1.442695, %v2513_v39 }
 0x364   :  { %2606 = vadd.xlane.f32.xlu0 %v4985_v25  ;;  %v2455_v14 = vpop.xlane.xlu0 %2454 }
 0x365   :  { %3554 = vpow2.f32 %v2548_v5  ;;  %v2514_v43 = vsub.f32 %v4845_v27, %v2455_v14 }
 0x367   :  { %v4989_v50 = vpop.eup %3550  ;;  %v2550_v34 = vmul.f32 1.442695, %v2514_v43 }
 0x368   :  { %v2457_v17 = vpop.xlane.xlu1 %2456  ;;  %2608 = vadd.xlane.f32.xlu1 %v4989_v50 }
 0x369   :  { %3556 = vpow2.f32 %v2550_v34  ;;  %v2515_v42 = vsub.f32 %v4849_v11, %v2457_v17 }
 0x36b   :  { %v4993_v58 = vpop.eup %3552  ;;  %v2552_v48 = vmul.f32 1.442695, %v2515_v42 }
 0x36c   :  { %2610 = vadd.xlane.f32.xlu0 %v4993_v58  ;;  %v2459_v59 = vpop.xlane.xlu0 %2458 }
 0x36d   :  { %3558 = vpow2.f32 %v2552_v48  ;;  %v2516_v28 = vsub.f32 %v4853_v40, %v2459_v59 }
 0x36f   :  { %v4997_v54 = vpop.eup %3554  ;;  %v2554_v27 = vmul.f32 1.442695, %v2516_v28 }
 0x370   :  { %v2461_v23 = vpop.xlane.xlu1 %2460  ;;  %2612 = vadd.xlane.f32.xlu1 %v4997_v54 }
 0x371   :  { %3560 = vpow2.f32 %v2554_v27  ;;  %v2517_v33 = vsub.f32 %v4858_v12, %v2461_v23 }
 0x373   :  { %v5001_v45 = vpop.eup %3556  ;;  %v2556_v11 = vmul.f32 1.442695, %v2517_v33 }
 0x374   :  { %2614 = vadd.xlane.f32.xlu0 %v5001_v45  ;;  %v2463_v35 = vpop.xlane.xlu0 %2462 }
 0x375   :  { %3562 = vpow2.f32 %v2556_v11  ;;  %v2518_v30 = vsub.f32 %v4863_v55, %v2463_v35 }
 0x377   :  { %v5005_v7 = vpop.eup %3558  ;;  %v2558_v40 = vmul.f32 1.442695, %v2518_v30 }
 0x378   :  { %v2465_v20 = vpop.xlane.xlu1 %2464  ;;  %2616 = vadd.xlane.f32.xlu1 %v5005_v7 }
 0x379   :  { %3564 = vpow2.f32 %v2558_v40  ;;  %v2519_v31 = vsub.f32 %v4868_v0, %v2465_v20 }
 0x37b   :  { %v5009_v22 = vpop.eup %3560  ;;  %v2560_v12 = vmul.f32 1.442695, %v2519_v31 }
 0x37c   :  { %2618 = vadd.xlane.f32.xlu0 %v5009_v22  ;;  %v2467_v21 = vpop.xlane.xlu0 %2466 }
 0x37d   :  { %3566 = vpow2.f32 %v2560_v12  ;;  %v2520_v41 = vsub.f32 %v4873_v15, %v2467_v21 }
 0x37f   :  { %v5013_v47 = vpop.eup %3562  ;;  %v2562_v55 = vmul.f32 1.442695, %v2520_v41 }
 0x380   :  { %v2469_v8 = vpop.xlane.xlu1 %2468  ;;  %2620 = vadd.xlane.f32.xlu1 %v5013_v47 }
 0x381   :  { %3568 = vpow2.f32 %v2562_v55  ;;  %v2521_v37 = vsub.f32 %v4878_v3, %v2469_v8 }
 0x383   :  { %v5017_v13 = vpop.eup %3564  ;;  %v2564_v0 = vmul.f32 1.442695, %v2521_v37 }
 0x384   :  { %2622 = vadd.xlane.f32.xlu0 %v5017_v13  ;;  %v2471_v19 = vpop.xlane.xlu0 %2470 }
 0x385   :  { %3570 = vpow2.f32 %v2564_v0  ;;  %v2522_v60 = vsub.f32 %v4883_v10, %v2471_v19 }
 0x387   :  { %v5021_v57 = vpop.eup %3566  ;;  %v2566_v15 = vmul.f32 1.442695, %v2522_v60 }
 0x388   :  { %v2473_v49 = vpop.xlane.xlu1 %2472  ;;  %2624 = vadd.xlane.f32.xlu1 %v5021_v57 }
 0x389   :  { %3572 = vpow2.f32 %v2566_v15  ;;  %v2523_v52 = vsub.f32 %v4888_v4, %v2473_v49 }
 0x38b   :  { %v5025_v26 = vpop.eup %3568  ;;  %v2568_v3 = vmul.f32 1.442695, %v2523_v52 }
 0x38c   :  { %2626 = vadd.xlane.f32.xlu0 %v5025_v26  ;;  %v2475_v53 = vpop.xlane.xlu0 %2474 }
 0x38d   :  { %3574 = vpow2.f32 %v2568_v3  ;;  %v2524_v39 = vsub.f32 %v4893_v36, %v2475_v53 }
 0x38f   :  { %v5029_v5 = vpop.eup %3570  ;;  %v2570_v10 = vmul.f32 1.442695, %v2524_v39 }
 0x390   :  { %v2477_v14 = vpop.xlane.xlu1 %2476  ;;  %2628 = vadd.xlane.f32.xlu1 %v5029_v5 }
 0x391   :  { %3576 = vpow2.f32 %v2570_v10  ;;  %v2525_v43 = vsub.f32 %v4898_v38, %v2477_v14 }
 0x393   :  { %v5033_v34 = vpop.eup %3572  ;;  %v2572_v4 = vmul.f32 1.442695, %v2525_v43 }
 0x394   :  { %2630 = vadd.xlane.f32.xlu0 %v5033_v34  ;;  %v2479_v17 = vpop.xlane.xlu0 %2478 }
 0x395   :  { %3578 = vpow2.f32 %v2572_v4  ;;  %v2526_v42 = vsub.f32 %v4903_v44, %v2479_v17 }
 0x397   :  { %v5037_v48 = vpop.eup %3574  ;;  %v2574_v36 = vmul.f32 1.442695, %v2526_v42 }
 0x398   :  { %v2481_v59 = vpop.xlane.xlu1 %2480  ;;  %2632 = vadd.xlane.f32.xlu1 %v5037_v48 }
 0x399   :  { %3580 = vpow2.f32 %v2574_v36  ;;  %v2527_v28 = vsub.f32 %v4908_v56, %v2481_v59 }
 0x39b   :  { %v5041_v27 = vpop.eup %3576  ;;  %v2576_v38 = vmul.f32 1.442695, %v2527_v28 }
 0x39c   :  { %2634 = vadd.xlane.f32.xlu0 %v5041_v27  ;;  %v2483_v23 = vpop.xlane.xlu0 %2482 }
 0x39d   :  { %3582 = vpow2.f32 %v2576_v38  ;;  %v2528_v33 = vsub.f32 %v4913_v62, %v2483_v23 }
 0x39f   :  { %v5045_v11 = vpop.eup %3578  ;;  %v2578_v44 = vmul.f32 1.442695, %v2528_v33 }
 0x3a0   :  { %v2485_v35 = vpop.xlane.xlu1 %2484  ;;  %2636 = vadd.xlane.f32.xlu1 %v5045_v11 }
 0x3a1   :  { %3584 = vpow2.f32 %v2578_v44  ;;  %v2529_v30 = vsub.f32 %v4918_v51, %v2485_v35 }
 0x3a3   :  { %v5049_v40 = vpop.eup %3580  ;;  %v2580_v56 = vmul.f32 1.442695, %v2529_v30 }
 0x3a4   :  { %2638 = vadd.xlane.f32.xlu0 %v5049_v40  ;;  %v2487_v20 = vpop.xlane.xlu0 %2486 }
 0x3a5   :  { %3586 = vpow2.f32 %v2580_v56  ;;  %v2530_v31 = vsub.f32 %v4923_v29, %v2487_v20 }
 0x3a7   :  { %v5053_v12 = vpop.eup %3582  ;;  %v2582_v62 = vmul.f32 1.442695, %v2530_v31 }
 0x3a8   :  { %v2489_v21 = vpop.xlane.xlu1 %2488  ;;  %2640 = vadd.xlane.f32.xlu1 %v5053_v12 }
 0x3a9   :  { %3588 = vpow2.f32 %v2582_v62  ;;  %v2531_v41 = vsub.f32 %v4928_v24, %v2489_v21 }
 0x3ab   :  { %v5057_v55 = vpop.eup %3584  ;;  %v2584_v51 = vmul.f32 1.442695, %v2531_v41 }
 0x3ac   :  { %2642 = vadd.xlane.f32.xlu0 %v5057_v55  ;;  %v2491_v8 = vpop.xlane.xlu0 %2490 }
 0x3ad   :  { %3590 = vpow2.f32 %v2584_v51  ;;  %v2532_v37 = vsub.f32 %v4933_v16, %v2491_v8 }
 0x3af   :  { %v5061_v0 = vpop.eup %3586  ;;  %v2586_v29 = vmul.f32 1.442695, %v2532_v37 }
 0x3b0   :  { %v2493_v19 = vpop.xlane.xlu1 %2492  ;;  %2644 = vadd.xlane.f32.xlu1 %v5061_v0 }
 0x3b1   :  { %3592 = vpow2.f32 %v2586_v29  ;;  %v2533_v60 = vsub.f32 %v4938_v18, %v2493_v19 }
 0x3b3   :  { %v5065_v15 = vpop.eup %3588  ;;  %v2588_v24 = vmul.f32 1.442695, %v2533_v60 }
 0x3b4   :  { %2646 = vadd.xlane.f32.xlu0 %v5065_v15  ;;  %v2495_v49 = vpop.xlane.xlu0 %2494 }
 0x3b5   :  { %3594 = vpow2.f32 %v2588_v24  ;;  %v2534_v52 = vsub.f32 %v4943_v6, %v2495_v49 }
 0x3b7   :  { %v5069_v3 = vpop.eup %3590  ;;  %v2590_v16 = vmul.f32 1.442695, %v2534_v52 }
 0x3b8   :  { %v2497_v53 = vpop.xlane.xlu1 %2496  ;;  %2648 = vadd.xlane.f32.xlu1 %v5069_v3 }
 0x3b9   :  { %3596 = vpow2.f32 %v2590_v16  ;;  %v2535_v39 = vsub.f32 %v4948_v32, %v2497_v53 }
 0x3bb   :  { %v5073_v10 = vpop.eup %3592  ;;  %v2592_v18 = vmul.f32 1.442695, %v2535_v39 }
 0x3bc   :  { %2650 = vadd.xlane.f32.xlu0 %v5073_v10  ;;  %v2499_v14 = vpop.xlane.xlu0 %2498 }
 0x3bd   :  { %3598 = vpow2.f32 %v2592_v18  ;;  %v2536_v43 = vsub.f32 %v4953_v61, %v2499_v14 }
 0x3bf   :  { %v5077_v4 = vpop.eup %3594  ;;  %v2594_v6 = vmul.f32 1.442695, %v2536_v43 }
 0x3c0   :  { %v2501_v17 = vpop.xlane.xlu1 %2500  ;;  %2652 = vadd.xlane.f32.xlu1 %v5077_v4 }
 0x3c1   :  { %3600 = vpow2.f32 %v2594_v6  ;;  %v2537_v42 = vsub.f32 %v4958_v46, %v2501_v17 }
 0x3c3   :  { %v5081_v36 = vpop.eup %3596  ;;  %v2596_v32 = vmul.f32 1.442695, %v2537_v42 }
 0x3c4   :  { %2654 = vadd.xlane.f32.xlu0 %v5081_v36  ;;  %v2503_v59 = vpop.xlane.xlu0 %2502 }
 0x3c5   :  { %3602 = vpow2.f32 %v2596_v32  ;;  %v2538_v28 = vsub.f32 %v4963_v9, %v2503_v59 }
 0x3c7   :  { %v5085_v38 = vpop.eup %3598  ;;  %v2598_v61 = vmul.f32 1.442695, %v2538_v28 }
 0x3c8   :  { %v2505_v23 = vpop.xlane.xlu1 %2504  ;;  %2656 = vadd.xlane.f32.xlu1 %v5085_v38 }
 0x3c9   :  { %3604 = vpow2.f32 %v2598_v61  ;;  %v2539_v33 = vsub.f32 %v4968_v63, %v2505_v23 }
 0x3cb   :  { %v5089_v44 = vpop.eup %3600  ;;  %v2600_v46 = vmul.f32 1.442695, %v2539_v33 }
 0x3cc   :  { %2658 = vadd.xlane.f32.xlu0 %v5089_v44  ;;  %v2507_v35 = vpop.xlane.xlu0 %2506 }
 0x3cd   :  { %3606 = vpow2.f32 %v2600_v46  ;;  %v2540_v30 = vsub.f32 %v4973_v2, %v2507_v35 }
 0x3cf   :  { %v5093_v56 = vpop.eup %3602  ;;  %v2602_v9 = vmul.f32 1.442695, %v2540_v30 }
 0x3d0   :  { %v2509_v20 = vpop.xlane.xlu1 %2508  ;;  %2660 = vadd.xlane.f32.xlu1 %v5093_v56 }
 0x3d1   :  { %3608 = vpow2.f32 %v2602_v9  ;;  %v2541_v31 = vsub.f32 %v4978_v1, %v2509_v20 }
 0x3d3   :  { %v5097_v62 = vpop.eup %3604  ;;  %v2604_v63 = vmul.f32 1.442695, %v2541_v31 }
 0x3d4   :  { %2662 = vadd.xlane.f32.xlu0 %v5097_v62 }
 0x3d5   :  { %3610 = vpow2.f32 %v2604_v63 }
 0x3d7   :  { %v5100_v21 = vpop.eup %3606 }
 0x3d8   :  { %2664 = vadd.xlane.f32.xlu1 %v5100_v21 }
 0x3db   :  { %v5103_v2 = vpop.eup %3608 }
 0x3dc   :  { %2666 = vadd.xlane.f32.xlu0 %v5103_v2 }
 0x3df   :  { %v5106_v41 = vpop.eup %3610 }
 0x3e0   :  { %2668 = vadd.xlane.f32.xlu1 %v5106_v41 }
 0x3f1   :  { %v2607_v51 = vpop.xlane.xlu0 %2606 }
 0x3f2   :  { %3612 = vrcp.f32 %v2607_v51 }
 0x3f5   :  { %v2609_v1 = vpop.xlane.xlu1 %2608 }
 0x3f6   :  { %3614 = vrcp.f32 %v2609_v1 }
 0x3f9   :  { %v2611_v8 = vpop.xlane.xlu0 %2610 }
 0x3fa   :  { %3616 = vrcp.f32 %v2611_v8 }
 0x3fc   :  { %v3613_v37 = vpop.eup %3612 }
 0x3fd   :  { %v2702_v29 = vmul.f32 %v3613_v37, %v2607_v51  ;;  %v2613_v19 = vpop.xlane.xlu1 %2612 }
 0x3fe   :  { %3618 = vrcp.f32 %v2613_v19 }
 0x3ff   :  { %v2734_v60 = vsub.f32 2.0, %v2702_v29 }
 0x400   :  { %v3615_v24 = vpop.eup %3614 }
 0x401   :  { %v2766_v49 = vmul.f32 %v3613_v37, %v2734_v60  ;;  %v2703_v52 = vmul.f32 %v3615_v24, %v2609_v1  ;;  %v2615_v16 = vpop.xlane.xlu0 %2614 }
 0x402   :  { %3620 = vrcp.f32 %v2615_v16 }
 0x403   :  { %v2798_v53 = vmul.f32 %v4985_v25, %v2766_v49  ;;  %v2735_v39 = vsub.f32 2.0, %v2703_v52 }
 0x404   :  { %v3617_v18 = vpop.eup %3616 }
 0x405   :  { %2830 = vst [vmem:[%s5242_s5] sm:$0xff] %v2798_v53  ;;  %v2767_v14 = vmul.f32 %v3615_v24, %v2735_v39  ;;  %v2704_v43 = vmul.f32 %v3617_v18, %v2611_v8  ;;  %v2617_v6 = vpop.xlane.xlu1 %2616 }
 0x406   :  { %3622 = vrcp.f32 %v2617_v6 }
 0x407   :  { %v2799_v17 = vmul.f32 %v4989_v50, %v2767_v14  ;;  %v2736_v42 = vsub.f32 2.0, %v2704_v43 }
 0x408   :  { %v3619_v32 = vpop.eup %3618 }
 0x409   :  { %2831 = vst [vmem:[%s5242_s5 + $0x8] sm:$0xff] %v2799_v17  ;;  %v2768_v59 = vmul.f32 %v3617_v18, %v2736_v42  ;;  %v2705_v25 = vmul.f32 %v3619_v32, %v2613_v19  ;;  %v2619_v28 = vpop.xlane.xlu0 %2618 }
 0x40a   :  { %3624 = vrcp.f32 %v2619_v28 }
 0x40b   :  { %v2800_v61 = vmul.f32 %v4993_v58, %v2768_v59  ;;  %v2737_v23 = vsub.f32 2.0, %v2705_v25 }
 0x40c   :  { %v3621_v33 = vpop.eup %3620 }
 0x40d   :  { %2832 = vst [vmem:[%s5242_s5 + $0x10] sm:$0xff] %v2800_v61  ;;  %v2769_v46 = vmul.f32 %v3619_v32, %v2737_v23  ;;  %v2706_v50 = vmul.f32 %v3621_v33, %v2615_v16  ;;  %v2621_v35 = vpop.xlane.xlu1 %2620 }
 0x40e   :  { %3626 = vrcp.f32 %v2621_v35 }
 0x40f   :  { %v2801_v30 = vmul.f32 %v4997_v54, %v2769_v46  ;;  %v2738_v9 = vsub.f32 2.0, %v2706_v50 }
 0x410   :  { %v3623_v20 = vpop.eup %3622 }
 0x411   :  { %2833 = vst [vmem:[%s5242_s5 + $0x18] sm:$0xff] %v2801_v30  ;;  %v2770_v31 = vmul.f32 %v3621_v33, %v2738_v9  ;;  %v2707_v58 = vmul.f32 %v3623_v20, %v2617_v6  ;;  %v2623_v63 = vpop.xlane.xlu0 %2622 }
 0x412   :  { %3628 = vrcp.f32 %v2623_v63 }
 0x413   :  { %v2802_v51 = vmul.f32 %v5001_v45, %v2770_v31  ;;  %v2739_v1 = vsub.f32 2.0, %v2707_v58 }
 0x414   :  { %v3625_v8 = vpop.eup %3624 }
 0x415   :  { %2834 = vst [vmem:[%s5242_s5 + $0x20] sm:$0xff] %v2802_v51  ;;  %v2771_v37 = vmul.f32 %v3623_v20, %v2739_v1  ;;  %v2708_v54 = vmul.f32 %v3625_v8, %v2619_v28  ;;  %v2625_v29 = vpop.xlane.xlu1 %2624 }
 0x416   :  { %3630 = vrcp.f32 %v2625_v29 }
 0x417   :  { %v2803_v19 = vmul.f32 %v5005_v7, %v2771_v37  ;;  %v2740_v60 = vsub.f32 2.0, %v2708_v54 }
 0x418   :  { %v3627_v24 = vpop.eup %3626 }
 0x419   :  { %2835 = vst [vmem:[%s5242_s5 + $0x28] sm:$0xff] %v2803_v19  ;;  %v2772_v49 = vmul.f32 %v3625_v8, %v2740_v60  ;;  %v2709_v45 = vmul.f32 %v3627_v24, %v2621_v35  ;;  %v2627_v52 = vpop.xlane.xlu0 %2626 }
 0x41a   :  { %3632 = vrcp.f32 %v2627_v52 }
 0x41b   :  { %v2804_v16 = vmul.f32 %v5009_v22, %v2772_v49  ;;  %v2741_v53 = vsub.f32 2.0, %v2709_v45 }
 0x41c   :  { %v3629_v39 = vpop.eup %3628 }
 0x41d   :  { %2836 = vst [vmem:[%s5242_s5 + $0x30] sm:$0xff] %v2804_v16  ;;  %v2773_v18 = vmul.f32 %v3627_v24, %v2741_v53  ;;  %v2710_v7 = vmul.f32 %v3629_v39, %v2623_v63  ;;  %v2629_v14 = vpop.xlane.xlu1 %2628 }
 0x41e   :  { %3634 = vrcp.f32 %v2629_v14 }
 0x41f   :  { %v2805_v43 = vmul.f32 %v5013_v47, %v2773_v18  ;;  %v2742_v6 = vsub.f32 2.0, %v2710_v7 }
 0x420   :  { %v3631_v17 = vpop.eup %3630 }
 0x421   :  { %2837 = vst [vmem:[%s5242_s5 + $0x38] sm:$0xff] %v2805_v43  ;;  %v2774_v42 = vmul.f32 %v3629_v39, %v2742_v6  ;;  %v2711_v22 = vmul.f32 %v3631_v17, %v2625_v29  ;;  %v2631_v32 = vpop.xlane.xlu0 %2630 }
 0x422   :  { %3636 = vrcp.f32 %v2631_v32 }
 0x423   :  { %v2806_v59 = vmul.f32 %v5017_v13, %v2774_v42  ;;  %v2743_v25 = vsub.f32 2.0, %v2711_v22 }
 0x424   :  { %v3633_v28 = vpop.eup %3632 }
 0x425   :  { %2838 = vst [vmem:[%s5242_s5 + $0x40] sm:$0xff] %v2806_v59  ;;  %v2775_v61 = vmul.f32 %v3631_v17, %v2743_v25  ;;  %v2712_v47 = vmul.f32 %v3633_v28, %v2627_v52  ;;  %v2633_v23 = vpop.xlane.xlu1 %2632 }
 0x426   :  { %3638 = vrcp.f32 %v2633_v23 }
 0x427   :  { %v2807_v33 = vmul.f32 %v5021_v57, %v2775_v61  ;;  %v2744_v46 = vsub.f32 2.0, %v2712_v47 }
 0x428   :  { %v3635_v50 = vpop.eup %3634 }
 0x429   :  { %2839 = vst [vmem:[%s5242_s5 + $0x48] sm:$0xff] %v2807_v33  ;;  %v2776_v35 = vmul.f32 %v3633_v28, %v2744_v46  ;;  %v2713_v13 = vmul.f32 %v3635_v50, %v2629_v14  ;;  %v2635_v30 = vpop.xlane.xlu0 %2634 }
 0x42a   :  { %3640 = vrcp.f32 %v2635_v30 }
 0x42b   :  { %v2808_v9 = vmul.f32 %v5025_v26, %v2776_v35  ;;  %v2745_v20 = vsub.f32 2.0, %v2713_v13 }
 0x42c   :  { %v3637_v31 = vpop.eup %3636 }
 0x42d   :  { %2840 = vst [vmem:[%s5242_s5 + $0x50] sm:$0xff] %v2808_v9  ;;  %v2777_v58 = vmul.f32 %v3635_v50, %v2745_v20  ;;  %v2714_v57 = vmul.f32 %v3637_v31, %v2631_v32  ;;  %v2637_v63 = vpop.xlane.xlu1 %2636 }
 0x42e   :  { %3642 = vrcp.f32 %v2637_v63 }
 0x42f   :  { %v2809_v51 = vmul.f32 %v5029_v5, %v2777_v58  ;;  %v2746_v1 = vsub.f32 2.0, %v2714_v57 }
 0x430   :  { %v3639_v8 = vpop.eup %3638 }
 0x431   :  { %2841 = vst [vmem:[%s5242_s5 + $0x58] sm:$0xff] %v2809_v51  ;;  %v2778_v37 = vmul.f32 %v3637_v31, %v2746_v1  ;;  %v2715_v26 = vmul.f32 %v3639_v8, %v2633_v23  ;;  %v2639_v54 = vpop.xlane.xlu0 %2638 }
 0x432   :  { %3644 = vrcp.f32 %v2639_v54 }
 0x433   :  { %v2810_v29 = vmul.f32 %v5033_v34, %v2778_v37  ;;  %v2747_v19 = vsub.f32 2.0, %v2715_v26 }
 0x434   :  { %v3641_v60 = vpop.eup %3640 }
 0x435   :  { %2842 = vst [vmem:[%s5242_s5 + $0x60] sm:$0xff] %v2810_v29  ;;  %v2779_v24 = vmul.f32 %v3639_v8, %v2747_v19  ;;  %v2716_v5 = vmul.f32 %v3641_v60, %v2635_v30  ;;  %v2641_v49 = vpop.xlane.xlu1 %2640 }
 0x436   :  { %3646 = vrcp.f32 %v2641_v49 }
 0x437   :  { %v2811_v45 = vmul.f32 %v5037_v48, %v2779_v24  ;;  %v2748_v52 = vsub.f32 2.0, %v2716_v5 }
 0x438   :  { %v3643_v16 = vpop.eup %3642 }
 0x439   :  { %2843 = vst [vmem:[%s5242_s5 + $0x68] sm:$0xff] %v2811_v45  ;;  %v2780_v53 = vmul.f32 %v3641_v60, %v2748_v52  ;;  %v2717_v34 = vmul.f32 %v3643_v16, %v2637_v63  ;;  %v2643_v39 = vpop.xlane.xlu0 %2642 }
 0x43a   :  { %3648 = vrcp.f32 %v2643_v39 }
 0x43b   :  { %v2812_v18 = vmul.f32 %v5041_v27, %v2780_v53  ;;  %v2749_v7 = vsub.f32 2.0, %v2717_v34 }
 0x43c   :  { %v3645_v14 = vpop.eup %3644 }
 0x43d   :  { %2844 = vst [vmem:[%s5242_s5 + $0x70] sm:$0xff] %v2812_v18  ;;  %v2781_v43 = vmul.f32 %v3643_v16, %v2749_v7  ;;  %v2718_v48 = vmul.f32 %v3645_v14, %v2639_v54  ;;  %v2645_v6 = vpop.xlane.xlu1 %2644 }
 0x43e   :  { %3650 = vrcp.f32 %v2645_v6 }
 0x43f   :  { %v2813_v17 = vmul.f32 %v5045_v11, %v2781_v43  ;;  %v2750_v42 = vsub.f32 2.0, %v2718_v48 }
 0x440   :  { %v3647_v22 = vpop.eup %3646 }
 0x441   :  { %2845 = vst [vmem:[%s5242_s5 + $0x78] sm:$0xff] %v2813_v17  ;;  %v2782_v32 = vmul.f32 %v3645_v14, %v2750_v42  ;;  %v2719_v27 = vmul.f32 %v3647_v22, %v2641_v49  ;;  %v2647_v59 = vpop.xlane.xlu0 %2646 }
 0x442   :  { %3652 = vrcp.f32 %v2647_v59 }
 0x443   :  { %v2814_v25 = vmul.f32 %v5049_v40, %v2782_v32  ;;  %v2751_v28 = vsub.f32 2.0, %v2719_v27 }
 0x444   :  { %v3649_v61 = vpop.eup %3648 }
 0x445   :  { %2846 = vst [vmem:[%s5242_s5 + $0x80] sm:$0xff] %v2814_v25  ;;  %v2783_v47 = vmul.f32 %v3647_v22, %v2751_v28  ;;  %v2720_v11 = vmul.f32 %v3649_v61, %v2643_v39  ;;  %v2649_v23 = vpop.xlane.xlu1 %2648 }
 0x446   :  { %3654 = vrcp.f32 %v2649_v23 }
 0x447   :  { %v2815_v33 = vmul.f32 %v5053_v12, %v2783_v47  ;;  %v2752_v46 = vsub.f32 2.0, %v2720_v11 }
 0x448   :  { %v3651_v50 = vpop.eup %3650 }
 0x449   :  { %2847 = vst [vmem:[%s5242_s5 + $0x88] sm:$0xff] %v2815_v33  ;;  %v2784_v35 = vmul.f32 %v3649_v61, %v2752_v46  ;;  %v2721_v40 = vmul.f32 %v3651_v50, %v2645_v6  ;;  %v2651_v13 = vpop.xlane.xlu0 %2650 }
 0x44a   :  { %3656 = vrcp.f32 %v2651_v13 }
 0x44b   :  { %v2816_v30 = vmul.f32 %v5057_v55, %v2784_v35  ;;  %v2753_v9 = vsub.f32 2.0, %v2721_v40 }
 0x44c   :  { %v3653_v20 = vpop.eup %3652 }
 0x44d   :  { %2848 = vst [vmem:[%s5242_s5 + $0x90] sm:$0xff] %v2816_v30  ;;  %v2785_v31 = vmul.f32 %v3651_v50, %v2753_v9  ;;  %v2722_v12 = vmul.f32 %v3653_v20, %v2647_v59  ;;  %v2653_v58 = vpop.xlane.xlu1 %2652 }
 0x44e   :  { %3658 = vrcp.f32 %v2653_v58 }
 0x44f   :  { %v2817_v57 = vmul.f32 %v5061_v0, %v2785_v31  ;;  %v2754_v63 = vsub.f32 2.0, %v2722_v12 }
 0x450   :  { %v3655_v51 = vpop.eup %3654 }
 0x451   :  { %2849 = vst [vmem:[%s5242_s5 + $0x98] sm:$0xff] %v2817_v57  ;;  %v2786_v1 = vmul.f32 %v3653_v20, %v2754_v63  ;;  %v2723_v55 = vmul.f32 %v3655_v51, %v2649_v23  ;;  %v2655_v8 = vpop.xlane.xlu0 %2654 }
 0x452   :  { %3660 = vrcp.f32 %v2655_v8 }
 0x453   :  { %v2818_v37 = vmul.f32 %v5065_v15, %v2786_v1  ;;  %v2755_v26 = vsub.f32 2.0, %v2723_v55 }
 0x454   :  { %v3657_v54 = vpop.eup %3656 }
 0x455   :  { %2850 = vst [vmem:[%s5242_s5 + $0xa0] sm:$0xff] %v2818_v37  ;;  %v2787_v29 = vmul.f32 %v3655_v51, %v2755_v26  ;;  %v2724_v0 = vmul.f32 %v3657_v54, %v2651_v13  ;;  %v2657_v19 = vpop.xlane.xlu1 %2656 }
 0x456   :  { %3662 = vrcp.f32 %v2657_v19 }
 0x457   :  { %v2819_v60 = vmul.f32 %v5069_v3, %v2787_v29  ;;  %v2756_v24 = vsub.f32 2.0, %v2724_v0 }
 0x458   :  { %v3659_v5 = vpop.eup %3658 }
 0x459   :  { %2851 = vst [vmem:[%s5242_s5 + $0xa8] sm:$0xff] %v2819_v60  ;;  %v2788_v49 = vmul.f32 %v3657_v54, %v2756_v24  ;;  %v2725_v15 = vmul.f32 %v3659_v5, %v2653_v58  ;;  %v2659_v45 = vpop.xlane.xlu0 %2658 }
 0x45a   :  { %3664 = vrcp.f32 %v2659_v45 }
 0x45b   :  { %v2820_v52 = vmul.f32 %v5073_v10, %v2788_v49  ;;  %v2757_v16 = vsub.f32 2.0, %v2725_v15 }
 0x45c   :  { %v3661_v53 = vpop.eup %3660 }
 0x45d   :  { %2852 = vst [vmem:[%s5242_s5 + $0xb0] sm:$0xff] %v2820_v52  ;;  %v2789_v34 = vmul.f32 %v3659_v5, %v2757_v16  ;;  %v2726_v3 = vmul.f32 %v3661_v53, %v2655_v8  ;;  %v2661_v39 = vpop.xlane.xlu1 %2660 }
 0x45e   :  { %3666 = vrcp.f32 %v2661_v39 }
 0x45f   :  { %v2821_v18 = vmul.f32 %v5077_v4, %v2789_v34  ;;  %v2758_v7 = vsub.f32 2.0, %v2726_v3 }
 0x460   :  { %v3663_v14 = vpop.eup %3662 }
 0x461   :  { %2853 = vst [vmem:[%s5242_s5 + $0xb8] sm:$0xff] %v2821_v18  ;;  %v2790_v43 = vmul.f32 %v3661_v53, %v2758_v7  ;;  %v2727_v10 = vmul.f32 %v3663_v14, %v2657_v19  ;;  %v2663_v48 = vpop.xlane.xlu0 %2662 }
 0x462   :  { %3668 = vrcp.f32 %v2663_v48 }
 0x463   :  { %v2822_v6 = vmul.f32 %v5081_v36, %v2790_v43  ;;  %v2759_v17 = vsub.f32 2.0, %v2727_v10 }
 0x464   :  { %v3665_v42 = vpop.eup %3664 }
 0x465   :  { %2854 = vst [vmem:[%s5242_s5 + $0xc0] sm:$0xff] %v2822_v6  ;;  %v2791_v22 = vmul.f32 %v3663_v14, %v2759_v17  ;;  %v2728_v4 = vmul.f32 %v3665_v42, %v2659_v45  ;;  %v2665_v32 = vpop.xlane.xlu1 %2664 }
 0x466   :  { %3670 = vrcp.f32 %v2665_v32 }
 0x467   :  { %v2823_v27 = vmul.f32 %v5085_v38, %v2791_v22  ;;  %v2760_v59 = vsub.f32 2.0, %v2728_v4 }
 0x468   :  { %v3667_v25 = vpop.eup %3666 }
 0x469   :  { %2855 = vst [vmem:[%s5242_s5 + $0xc8] sm:$0xff] %v2823_v27  ;;  %v2792_v28 = vmul.f32 %v3665_v42, %v2760_v59  ;;  %v2729_v36 = vmul.f32 %v3667_v25, %v2661_v39  ;;  %v2667_v61 = vpop.xlane.xlu0 %2666 }
 0x46a   :  { %3672 = vrcp.f32 %v2667_v61 }
 0x46b   :  { %v2824_v47 = vmul.f32 %v5089_v44, %v2792_v28  ;;  %v2761_v11 = vsub.f32 2.0, %v2729_v36 }
 0x46c   :  { %v3669_v23 = vpop.eup %3668 }
 0x46d   :  { %2856 = vst [vmem:[%s5242_s5 + $0xd0] sm:$0xff] %v2824_v47  ;;  %v2793_v33 = vmul.f32 %v3667_v25, %v2761_v11  ;;  %v2730_v38 = vmul.f32 %v3669_v23, %v2663_v48  ;;  %v2669_v46 = vpop.xlane.xlu1 %2668 }
 0x46e   :  { %3674 = vrcp.f32 %v2669_v46 }
 0x46f   :  { %v2825_v50 = vmul.f32 %v5093_v56, %v2793_v33  ;;  %v2762_v35 = vsub.f32 2.0, %v2730_v38 }
 0x470   :  { %v3671_v40 = vpop.eup %3670 }
 0x471   :  { %2857 = vst [vmem:[%s5242_s5 + $0xd8] sm:$0xff] %v2825_v50  ;;  %v2794_v13 = vmul.f32 %v3669_v23, %v2762_v35  ;;  %v2731_v44 = vmul.f32 %v3671_v40, %v2665_v32 }
 0x473   :  { %v2826_v30 = vmul.f32 %v5097_v62, %v2794_v13  ;;  %v2763_v9 = vsub.f32 2.0, %v2731_v44 }
 0x474   :  { %v3673_v20 = vpop.eup %3672 }
 0x475   :  { %2858 = vst [vmem:[%s5242_s5 + $0xe0] sm:$0xff] %v2826_v30  ;;  %v2795_v31 = vmul.f32 %v3671_v40, %v2763_v9  ;;  %v2732_v12 = vmul.f32 %v3673_v20, %v2667_v61 }
 0x477   :  { %v2827_v56 = vmul.f32 %v5100_v21, %v2795_v31  ;;  %v2764_v58 = vsub.f32 2.0, %v2732_v12 }
 0x478   :  { %v3675_v57 = vpop.eup %3674 }
 0x479   :  { %2859 = vst [vmem:[%s5242_s5 + $0xe8] sm:$0xff] %v2827_v56  ;;  %v2796_v63 = vmul.f32 %v3673_v20, %v2764_v58  ;;  %v2733_v51 = vmul.f32 %v3675_v57, %v2669_v46 }
 0x47b   :  { %v2828_v62 = vmul.f32 %v5103_v2, %v2796_v63  ;;  %v2765_v1 = vsub.f32 2.0, %v2733_v51 }
 0x47d   :  { %2860 = vst [vmem:[%s5242_s5 + $0xf0] sm:$0xff] %v2828_v62  ;;  %v2797_v55 = vmul.f32 %v3675_v57, %v2765_v1 }
 0x47f   :  { %v2829_v8 = vmul.f32 %v5106_v41, %v2797_v55 }
 0x481   :  { %2861 = vst [vmem:[%s5242_s5 + $0xf8] sm:$0xff] %v2829_v8 }
 0x482   :  { %2866 = vsyncpa [#allocation3], 1 }

</bundles_post_ra>
